<compile_context>
chip_gen: v7x
topology: tpu7x:2x2x1
jax: 0.10.0
libtpu: 0.0.40
codegen_flags: <defaults>
</compile_context>

<pallas_src>
import functools

import jax
import jax.numpy as jnp
import numpy as np
from jax.experimental import pallas as pl
from jax.experimental.pallas import tpu as pltpu


def _round_up(x, m):
    return (x + m - 1) // m * m


def _sigmoid(x):
    # explicit formula (exp + reciprocal) -> guaranteed Mosaic lowering
    return 1.0 / (1.0 + jnp.exp(-x))


# -----------------------------------------------------------------------------
# Kernel: one grid step == `Tc` timesteps of the 3-layer acLSTM recurrence.
# -----------------------------------------------------------------------------
def _aclstm_kernel(x_ref,
                   wih1_ref, whh1_ref, b1_ref,
                   wih2_ref, whh2_ref, b2_ref,
                   wih3_ref, whh3_ref, b3_ref,
                   wdec_ref, bdec_ref,
                   out_ref,
                   h0_ref, h1_ref, h2_ref,
                   c0_ref, c1_ref, c2_ref,
                   of_ref,
                   *, hidden_pad, gt_num, cond_num):
    hp = hidden_pad

    # Initialize recurrent state once, at the first time chunk.
    @pl.when(pl.program_id(0) == 0)
    def _init():
        zero_h = jnp.zeros_like(h0_ref)
        h0_ref[...] = zero_h
        h1_ref[...] = zero_h
        h2_ref[...] = zero_h
        c0_ref[...] = zero_h
        c1_ref[...] = zero_h
        c2_ref[...] = zero_h
        of_ref[...] = jnp.zeros_like(of_ref)

    tc = x_ref.shape[0]           # timesteps per chunk (static)
    bp = h0_ref.shape[0]          # padded batch (static)
    gdim = wih1_ref.shape[1]      # 4 * hidden_pad (static)
    outp = of_ref.shape[1]        # padded out size (static)
    t_base = pl.program_id(0) * tc
    period = gt_num + cond_num

    # Weights are VMEM-resident (constant index_map -> single DMA).  Load once
    # per chunk; bias broadcasts hoisted out of the time loop.
    wih1 = wih1_ref[...]
    whh1 = whh1_ref[...]
    wih2 = wih2_ref[...]
    whh2 = whh2_ref[...]
    wih3 = wih3_ref[...]
    whh3 = whh3_ref[...]
    wdec = wdec_ref[...]
    b1 = jnp.broadcast_to(b1_ref[...], (bp, gdim))
    b2 = jnp.broadcast_to(b2_ref[...], (bp, gdim))
    b3 = jnp.broadcast_to(b3_ref[...], (bp, gdim))
    bdec = jnp.broadcast_to(bdec_ref[...], (bp, outp))

    mm_dtype = wih1.dtype

    def gates(x, h, wih, whh, b):
        # fused 4H gate matmul, f32 accumulation on the MXU
        return (jnp.dot(x.astype(mm_dtype), wih,
                        preferred_element_type=jnp.float32)
                + jnp.dot(h.astype(mm_dtype), whh,
                          preferred_element_type=jnp.float32)
                + b)

    def lstm_nonlin(g, c_prev):
        i = _sigmoid(g[:, 0 * hp:1 * hp])
        f = _sigmoid(g[:, 1 * hp:2 * hp])
        gg = jnp.tanh(g[:, 2 * hp:3 * hp])
        o = _sigmoid(g[:, 3 * hp:4 * hp])
        c_new = f * c_prev + i * gg
        h_new = o * jnp.tanh(c_new)
        return h_new, c_new

    def step(i, carry):
        t = t_base + i
        use_gt = (t % period) < gt_num              # scalar teacher-forcing flag
        x_t = x_ref[i]                              # (Bp, INp) f32
        in_frame = jnp.where(use_gt, x_t, of_ref[...])

        # previous-step state (read BEFORE any in-place update)
        prev_h0 = h0_ref[...]
        prev_h1 = h1_ref[...]
        prev_h2 = h2_ref[...]

        # all six gate matmuls are independent -> issue back-to-back
        g1 = gates(in_frame, prev_h0, wih1, whh1, b1)
        g2 = gates(prev_h0, prev_h1, wih2, whh2, b2)
        g3 = gates(prev_h1, prev_h2, wih3, whh3, b3)

        h0n, c0n = lstm_nonlin(g1, c0_ref[...])
        h1n, c1n = lstm_nonlin(g2, c1_ref[...])
        h2n, c2n = lstm_nonlin(g3, c2_ref[...])

        out = jnp.dot(h2n.astype(mm_dtype), wdec,
                      preferred_element_type=jnp.float32) + bdec

        h0_ref[...] = h0n
        h1_ref[...] = h1n
        h2_ref[...] = h2n
        c0_ref[...] = c0n
        c1_ref[...] = c1n
        c2_ref[...] = c2n
        of_ref[...] = out                           # f32 feedback (no bf16 drift)
        out_ref[i] = out.astype(out_ref.dtype)
        return carry

    jax.lax.fori_loop(0, tc, step, 0)


# -----------------------------------------------------------------------------
# Wrapper: weight prep (pad / transpose / gate layout / bf16) + pallas_call.
# -----------------------------------------------------------------------------
def _prep_lstm_weights(cell_params, in_dim, hidden, in_pad, hidden_pad, wdtype):
    h, hp, ip = hidden, hidden_pad, in_pad
    w_ih = cell_params["w_ih"].astype(jnp.float32).reshape(4, h, in_dim)
    w_ih = jnp.pad(w_ih, ((0, 0), (0, hp - h), (0, ip - in_dim)))
    w_ih_t = w_ih.transpose(2, 0, 1).reshape(ip, 4 * hp).astype(wdtype)

    w_hh = cell_params["w_hh"].astype(jnp.float32).reshape(4, h, h)
    w_hh = jnp.pad(w_hh, ((0, 0), (0, hp - h), (0, hp - h)))
    w_hh_t = w_hh.transpose(2, 0, 1).reshape(hp, 4 * hp).astype(wdtype)

    bias = (cell_params["b_ih"] + cell_params["b_hh"]).astype(jnp.float32)
    bias = jnp.pad(bias.reshape(4, h), ((0, 0), (0, hp - h))).reshape(1, 4 * hp)
    return w_ih_t, w_hh_t, bias


def aclstm_forward(params, real_seq, *, condition_num=5, groundtruth_num=5,
                   time_chunk=10, weight_dtype=jnp.bfloat16):
    """real_seq: (B, T, in_frame_size) f32 -> (B, T * out_frame_size) f32."""
    real_seq = jnp.asarray(real_seq, jnp.float32)
    bsz, seq_len, in_size = real_seq.shape
    hidden = params["lstm1"]["w_hh"].shape[1]
    out_size = params["decoder"]["w"].shape[0]
    assert in_size == out_size, "feedback requires in_frame_size == out_frame_size"

    in_pad = _round_up(in_size, 128)
    out_pad = _round_up(out_size, 128)
    hid_pad = _round_up(hidden, 128)
    b_pad = _round_up(bsz, 8)

    tc = min(time_chunk, seq_len)
    t_pad = _round_up(seq_len, tc)
    n_chunks = t_pad // tc

    # ---- weights: pre-transposed, gate-padded, bf16 (biases combined, f32) ----
    wih1, whh1, b1 = _prep_lstm_weights(params["lstm1"], in_size, hidden,
                                        in_pad, hid_pad, weight_dtype)
    wih2, whh2, b2 = _prep_lstm_weights(params["lstm2"], hidden, hidden,
                                        hid_pad, hid_pad, weight_dtype)
    wih3, whh3, b3 = _prep_lstm_weights(params["lstm3"], hidden, hidden,
                                        hid_pad, hid_pad, weight_dtype)

    wdec = params["decoder"]["w"].astype(jnp.float32)            # (OUT, H)
    wdec = jnp.pad(wdec, ((0, out_pad - out_size), (0, hid_pad - hidden)))
    wdec = wdec.T.astype(weight_dtype)                           # (Hp, OUTp)
    bdec = jnp.pad(params["decoder"]["b"].astype(jnp.float32),
                   (0, out_pad - out_size)).reshape(1, out_pad)

    # ---- input: pad B/T/IN, go time-major -------------------------------------
    x = jnp.pad(real_seq, ((0, b_pad - bsz), (0, t_pad - seq_len),
                           (0, in_pad - in_size)))
    x = x.transpose(1, 0, 2)                                     # (Tp, Bp, INp)

    # ---- explicit VMEM budget so resident weights are not tiled down ----------
    weight_bytes = sum(int(np.prod(a.shape)) * a.dtype.itemsize
                       for a in (wih1, whh1, b1, wih2, whh2, b2,
                                 wih3, whh3, b3, wdec, bdec))
    io_bytes = 2 * 2 * tc * b_pad * (in_pad + out_pad) * 4       # double-buffered I/O
    state_bytes = (6 * b_pad * hid_pad + b_pad * out_pad) * 4
    vmem_limit = int(min(64 * 2 ** 20,
                         2 * weight_bytes + io_bytes + state_bytes + 16 * 2 ** 20))

    const = lambda c: (0, 0)   # weights: block index never changes -> DMA'd once
    kernel = functools.partial(_aclstm_kernel, hidden_pad=hid_pad,
                               gt_num=groundtruth_num, cond_num=condition_num)

    out_tm = pl.pallas_call(
        kernel,
        out_shape=jax.ShapeDtypeStruct((t_pad, b_pad, out_pad), jnp.float32),
        grid_spec=pltpu.PrefetchScalarGridSpec(
            num_scalar_prefetch=0,
            grid=(n_chunks,),
            in_specs=[
                pl.BlockSpec((tc, b_pad, in_pad), lambda c: (c, 0, 0)),
                pl.BlockSpec(wih1.shape, const),
                pl.BlockSpec(whh1.shape, const),
                pl.BlockSpec(b1.shape, const),
                pl.BlockSpec(wih2.shape, const),
                pl.BlockSpec(whh2.shape, const),
                pl.BlockSpec(b2.shape, const),
                pl.BlockSpec(wih3.shape, const),
                pl.BlockSpec(whh3.shape, const),
                pl.BlockSpec(b3.shape, const),
                pl.BlockSpec(wdec.shape, const),
                pl.BlockSpec(bdec.shape, const),
            ],
            out_specs=pl.BlockSpec((tc, b_pad, out_pad), lambda c: (c, 0, 0)),
            scratch_shapes=[
                pltpu.VMEM((b_pad, hid_pad), jnp.float32),   # h0
                pltpu.VMEM((b_pad, hid_pad), jnp.float32),   # h1
                pltpu.VMEM((b_pad, hid_pad), jnp.float32),   # h2
                pltpu.VMEM((b_pad, hid_pad), jnp.float32),   # c0
                pltpu.VMEM((b_pad, hid_pad), jnp.float32),   # c1
                pltpu.VMEM((b_pad, hid_pad), jnp.float32),   # c2
                pltpu.VMEM((b_pad, out_pad), jnp.float32),   # fed-back out_frame
            ],
        ),
        compiler_params=pltpu.CompilerParams(
            dimension_semantics=("arbitrary",),              # time recurrence
            vmem_limit_bytes=vmem_limit,
        ),
    )(x, wih1, whh1, b1, wih2, whh2, b2, wih3, whh3, b3, wdec, bdec)

    out = out_tm.transpose(1, 0, 2)[:bsz, :seq_len, :out_size]  # (B, T, OUT)
    return out.reshape(bsz, seq_len * out_size)


# -----------------------------------------------------------------------------
# Pure-JAX reference (same bf16-matmul / f32-state numerics) for validation.
# -----------------------------------------------------------------------------
def aclstm_reference(params, real_seq, *, condition_num=5, groundtruth_num=5,
                     weight_dtype=jnp.bfloat16):
    real_seq = jnp.asarray(real_seq, jnp.float32)
    bsz, seq_len, _ = real_seq.shape
    hidden = params["lstm1"]["w_hh"].shape[1]
    out_size = params["decoder"]["w"].shape[0]

    def cell(x, h, c, p):
        wih = p["w_ih"].T.astype(weight_dtype)
        whh = p["w_hh"].T.astype(weight_dtype)
        bias = (p["b_ih"] + p["b_hh"]).astype(jnp.float32)
        g = (jnp.dot(x.astype(weight_dtype), wih, preferred_element_type=jnp.float32)
             + jnp.dot(h.astype(weight_dtype), whh, preferred_element_type=jnp.float32)
             + bias)
        i = _sigmoid(g[:, 0:hidden])
        f = _sigmoid(g[:, hidden:2 * hidden])
        gg = jnp.tanh(g[:, 2 * hidden:3 * hidden])
        o = _sigmoid(g[:, 3 * hidden:4 * hidden])
        cn = f * c + i * gg
        return o * jnp.tanh(cn), cn

    wdec = params["decoder"]["w"].T.astype(weight_dtype)
    bdec = params["decoder"]["b"].astype(jnp.float32)
    h = [jnp.zeros((bsz, hidden), jnp.float32) for _ in range(3)]
    c = [jnp.zeros((bsz, hidden), jnp.float32) for _ in range(3)]
    out_frame = jnp.zeros((bsz, out_size), jnp.float32)
    period = condition_num + groundtruth_num
    outs = []
    for t in range(seq_len):
        in_frame = real_seq[:, t] if (t % period) < groundtruth_num else out_frame
        h0n, c0n = cell(in_frame, h[0], c[0], params["lstm1"])
        h1n, c1n = cell(h[0], h[1], c[1], params["lstm2"])     # previous h0
        h2n, c2n = cell(h[1], h[2], c[2], params["lstm3"])     # previous h1
        out_frame = (jnp.dot(h2n.astype(weight_dtype), wdec,
                             preferred_element_type=jnp.float32) + bdec)
        h = [h0n, h1n, h2n]
        c = [c0n, c1n, c2n]
        outs.append(out_frame)
    return jnp.concatenate(outs, axis=1)


def init_aclstm_params(key, in_frame_size=132, hidden_size=1024, out_frame_size=132):
    keys = jax.random.split(key, 14)
    s = 1.0 / float(np.sqrt(hidden_size))

    def u(k, shape):
        return jax.random.uniform(k, shape, jnp.float32, -s, s)

    def cell(k0, k1, k2, k3, in_dim):
        return {"w_ih": u(k0, (4 * hidden_size, in_dim)),
                "w_hh": u(k1, (4 * hidden_size, hidden_size)),
                "b_ih": u(k2, (4 * hidden_size,)),
                "b_hh": u(k3, (4 * hidden_size,))}

    return {
        "lstm1": cell(keys[0], keys[1], keys[2], keys[3], in_frame_size),
        "lstm2": cell(keys[4], keys[5], keys[6], keys[7], hidden_size),
        "lstm3": cell(keys[8], keys[9], keys[10], keys[11], hidden_size),
        "decoder": {"w": u(keys[12], (out_frame_size, hidden_size)),
                    "b": u(keys[13], (out_frame_size,))},
    }


if __name__ == "__main__":
    # Small shapes consistent with the module (in=out=132 like acLSTM defaults,
    # smaller hidden / batch / sequence for a quick on-device test).
    BATCH, SEQ, IN_SIZE, HIDDEN, OUT_SIZE = 8, 20, 132, 128, 132

    key = jax.random.PRNGKey(0)
    pkey, xkey = jax.random.split(key)
    params = init_aclstm_params(pkey, IN_SIZE, HIDDEN, OUT_SIZE)
    real_seq = 0.5 * jax.random.normal(xkey, (BATCH, SEQ, IN_SIZE), jnp.float32)

    out = aclstm_forward(params, real_seq, time_chunk=10)
    out = jax.block_until_ready(out)
    assert out.shape == (BATCH, SEQ * OUT_SIZE)

    ref = jax.block_until_ready(aclstm_reference(params, real_seq))
    np.testing.assert_allclose(np.asarray(out), np.asarray(ref),
                               rtol=3e-2, atol=3e-2)

    print("KERNEL_OK")
</pallas_src>

<mosaic_0001>
module attributes {stable_mosaic.version = 11 : i64} {
  func.func @_aclstm_kernel(%arg0: i32, %arg1: memref<10x8x256xf32, #tpu.memory_space<vmem>>, %arg2: memref<256x512xbf16, #tpu.memory_space<vmem>>, %arg3: memref<128x512xbf16, #tpu.memory_space<vmem>>, %arg4: memref<1x512xf32, #tpu.memory_space<vmem>>, %arg5: memref<128x512xbf16, #tpu.memory_space<vmem>>, %arg6: memref<128x512xbf16, #tpu.memory_space<vmem>>, %arg7: memref<1x512xf32, #tpu.memory_space<vmem>>, %arg8: memref<128x512xbf16, #tpu.memory_space<vmem>>, %arg9: memref<128x512xbf16, #tpu.memory_space<vmem>>, %arg10: memref<1x512xf32, #tpu.memory_space<vmem>>, %arg11: memref<128x256xbf16, #tpu.memory_space<vmem>>, %arg12: memref<1x256xf32, #tpu.memory_space<vmem>>, %arg13: memref<10x8x256xf32, #tpu.memory_space<vmem>>, %arg14: memref<8x128xf32, #tpu.memory_space<vmem>>, %arg15: memref<8x128xf32, #tpu.memory_space<vmem>>, %arg16: memref<8x128xf32, #tpu.memory_space<vmem>>, %arg17: memref<8x128xf32, #tpu.memory_space<vmem>>, %arg18: memref<8x128xf32, #tpu.memory_space<vmem>>, %arg19: memref<8x128xf32, #tpu.memory_space<vmem>>, %arg20: memref<8x256xf32, #tpu.memory_space<vmem>>) attributes {dimension_semantics = [#tpu.dimension_semantics<arbitrary>], iteration_bounds = array<i64: 2>, scalar_prefetch = 0 : i64, scratch_operands = 7 : i64, tpu.core_type = #tpu.core_type<tc>, window_params = [{transform_indices = @transform_0, window_bounds = array<i64: 10, 8, 256>}, {pipeline_mode = #tpu.pipeline_mode<synchronous>, transform_indices = @transform_1, window_bounds = array<i64: 256, 512>}, {pipeline_mode = #tpu.pipeline_mode<synchronous>, transform_indices = @transform_2, window_bounds = array<i64: 128, 512>}, {pipeline_mode = #tpu.pipeline_mode<synchronous>, transform_indices = @transform_3, window_bounds = array<i64: 1, 512>}, {pipeline_mode = #tpu.pipeline_mode<synchronous>, transform_indices = @transform_4, window_bounds = array<i64: 128, 512>}, {pipeline_mode = #tpu.pipeline_mode<synchronous>, transform_indices = @transform_5, window_bounds = array<i64: 128, 512>}, {pipeline_mode = #tpu.pipeline_mode<synchronous>, transform_indices = @transform_6, window_bounds = array<i64: 1, 512>}, {pipeline_mode = #tpu.pipeline_mode<synchronous>, transform_indices = @transform_7, window_bounds = array<i64: 128, 512>}, {pipeline_mode = #tpu.pipeline_mode<synchronous>, transform_indices = @transform_8, window_bounds = array<i64: 128, 512>}, {pipeline_mode = #tpu.pipeline_mode<synchronous>, transform_indices = @transform_9, window_bounds = array<i64: 1, 512>}, {pipeline_mode = #tpu.pipeline_mode<synchronous>, transform_indices = @transform_10, window_bounds = array<i64: 128, 256>}, {pipeline_mode = #tpu.pipeline_mode<synchronous>, transform_indices = @transform_11, window_bounds = array<i64: 1, 256>}, {transform_indices = @transform_12, window_bounds = array<i64: 10, 8, 256>}]} {
    %c0_i32 = arith.constant 0 : i32
    %0 = arith.cmpi eq, %arg0, %c0_i32 : i32
    %1 = arith.extui %0 : i1 to i32
    %c0_i32_0 = arith.constant 0 : i32
    %2 = arith.cmpi ne, %1, %c0_i32_0 : i32
    scf.if %2 {
      %cst = arith.constant 0.000000e+00 : f32
      %24 = vector.broadcast %cst : f32 to vector<8x128xf32>
      %c0_25 = arith.constant 0 : index
      %c0_26 = arith.constant 0 : index
      %25 = vector.load %arg14[%c0_25, %c0_26] : memref<8x128xf32, #tpu.memory_space<vmem>>, vector<8x128xf32>
      tpu.vector_store %arg14[%c0_25, %c0_26], %24 {strides = array<i32>} : memref<8x128xf32, #tpu.memory_space<vmem>>, vector<8x128xf32>,
      %c0_27 = arith.constant 0 : index
      %c0_28 = arith.constant 0 : index
      %26 = vector.load %arg15[%c0_27, %c0_28] : memref<8x128xf32, #tpu.memory_space<vmem>>, vector<8x128xf32>
      tpu.vector_store %arg15[%c0_27, %c0_28], %24 {strides = array<i32>} : memref<8x128xf32, #tpu.memory_space<vmem>>, vector<8x128xf32>,
      %c0_29 = arith.constant 0 : index
      %c0_30 = arith.constant 0 : index
      %27 = vector.load %arg16[%c0_29, %c0_30] : memref<8x128xf32, #tpu.memory_space<vmem>>, vector<8x128xf32>
      tpu.vector_store %arg16[%c0_29, %c0_30], %24 {strides = array<i32>} : memref<8x128xf32, #tpu.memory_space<vmem>>, vector<8x128xf32>,
      %c0_31 = arith.constant 0 : index
      %c0_32 = arith.constant 0 : index
      %28 = vector.load %arg17[%c0_31, %c0_32] : memref<8x128xf32, #tpu.memory_space<vmem>>, vector<8x128xf32>
      tpu.vector_store %arg17[%c0_31, %c0_32], %24 {strides = array<i32>} : memref<8x128xf32, #tpu.memory_space<vmem>>, vector<8x128xf32>,
      %c0_33 = arith.constant 0 : index
      %c0_34 = arith.constant 0 : index
      %29 = vector.load %arg18[%c0_33, %c0_34] : memref<8x128xf32, #tpu.memory_space<vmem>>, vector<8x128xf32>
      tpu.vector_store %arg18[%c0_33, %c0_34], %24 {strides = array<i32>} : memref<8x128xf32, #tpu.memory_space<vmem>>, vector<8x128xf32>,
      %c0_35 = arith.constant 0 : index
      %c0_36 = arith.constant 0 : index
      %30 = vector.load %arg19[%c0_35, %c0_36] : memref<8x128xf32, #tpu.memory_space<vmem>>, vector<8x128xf32>
      tpu.vector_store %arg19[%c0_35, %c0_36], %24 {strides = array<i32>} : memref<8x128xf32, #tpu.memory_space<vmem>>, vector<8x128xf32>,
      %cst_37 = arith.constant 0.000000e+00 : f32
      %31 = vector.broadcast %cst_37 : f32 to vector<8x256xf32>
      %c0_38 = arith.constant 0 : index
      %c0_39 = arith.constant 0 : index
      %32 = vector.load %arg20[%c0_38, %c0_39] : memref<8x256xf32, #tpu.memory_space<vmem>>, vector<8x256xf32>
      tpu.vector_store %arg20[%c0_38, %c0_39], %31 {strides = array<i32>} : memref<8x256xf32, #tpu.memory_space<vmem>>, vector<8x256xf32>,
    } else {
    }
    %c10_i32 = arith.constant 10 : i32
    %3 = arith.muli %arg0, %c10_i32 : i32
    %c0 = arith.constant 0 : index
    %c0_1 = arith.constant 0 : index
    %4 = vector.load %arg2[%c0, %c0_1] : memref<256x512xbf16, #tpu.memory_space<vmem>>, vector<256x512xbf16>
    %c0_2 = arith.constant 0 : index
    %c0_3 = arith.constant 0 : index
    %5 = vector.load %arg3[%c0_2, %c0_3] : memref<128x512xbf16, #tpu.memory_space<vmem>>, vector<128x512xbf16>
    %c0_4 = arith.constant 0 : index
    %c0_5 = arith.constant 0 : index
    %6 = vector.load %arg5[%c0_4, %c0_5] : memref<128x512xbf16, #tpu.memory_space<vmem>>, vector<128x512xbf16>
    %c0_6 = arith.constant 0 : index
    %c0_7 = arith.constant 0 : index
    %7 = vector.load %arg6[%c0_6, %c0_7] : memref<128x512xbf16, #tpu.memory_space<vmem>>, vector<128x512xbf16>
    %c0_8 = arith.constant 0 : index
    %c0_9 = arith.constant 0 : index
    %8 = vector.load %arg8[%c0_8, %c0_9] : memref<128x512xbf16, #tpu.memory_space<vmem>>, vector<128x512xbf16>
    %c0_10 = arith.constant 0 : index
    %c0_11 = arith.constant 0 : index
    %9 = vector.load %arg9[%c0_10, %c0_11] : memref<128x512xbf16, #tpu.memory_space<vmem>>, vector<128x512xbf16>
    %c0_12 = arith.constant 0 : index
    %c0_13 = arith.constant 0 : index
    %10 = vector.load %arg11[%c0_12, %c0_13] : memref<128x256xbf16, #tpu.memory_space<vmem>>, vector<128x256xbf16>
    %c0_14 = arith.constant 0 : index
    %c0_15 = arith.constant 0 : index
    %11 = vector.load %arg4[%c0_14, %c0_15] : memref<1x512xf32, #tpu.memory_space<vmem>>, vector<1x512xf32>
    %12 = vector.shape_cast %11 : vector<1x512xf32> to vector<1x512xf32>
    %13 = vector.broadcast %12 : vector<1x512xf32> to vector<8x512xf32>
    %c0_16 = arith.constant 0 : index
    %c0_17 = arith.constant 0 : index
    %14 = vector.load %arg7[%c0_16, %c0_17] : memref<1x512xf32, #tpu.memory_space<vmem>>, vector<1x512xf32>
    %15 = vector.shape_cast %14 : vector<1x512xf32> to vector<1x512xf32>
    %16 = vector.broadcast %15 : vector<1x512xf32> to vector<8x512xf32>
    %c0_18 = arith.constant 0 : index
    %c0_19 = arith.constant 0 : index
    %17 = vector.load %arg10[%c0_18, %c0_19] : memref<1x512xf32, #tpu.memory_space<vmem>>, vector<1x512xf32>
    %18 = vector.shape_cast %17 : vector<1x512xf32> to vector<1x512xf32>
    %19 = vector.broadcast %18 : vector<1x512xf32> to vector<8x512xf32>
    %c0_20 = arith.constant 0 : index
    %c0_21 = arith.constant 0 : index
    %20 = vector.load %arg12[%c0_20, %c0_21] : memref<1x256xf32, #tpu.memory_space<vmem>>, vector<1x256xf32>
    %21 = vector.shape_cast %20 : vector<1x256xf32> to vector<1x256xf32>
    %22 = vector.broadcast %21 : vector<1x256xf32> to vector<8x256xf32>
    %c0_i32_22 = arith.constant 0 : i32
    %c10_i32_23 = arith.constant 10 : i32
    %23 = arith.addi %c0_i32_22, %c10_i32_23 : i32
    %c1_i32 = arith.constant 1 : i32
    scf.for %arg21 = %c0_i32_22 to %23 step %c1_i32  : i32 {
      %24 = arith.addi %3, %arg21 : i32
      %c10_i32_25 = arith.constant 10 : i32
      %c0_i32_26 = arith.constant 0 : i32
      %25 = arith.cmpi eq, %c10_i32_25, %c0_i32_26 : i32
      %c1_i32_27 = arith.constant 1 : i32
      %26 = arith.select %25, %c1_i32_27, %c10_i32_25 : i32
      %27 = arith.remsi %24, %26 : i32
      %c0_i32_28 = arith.constant 0 : i32
      %28 = arith.cmpi ne, %27, %c0_i32_28 : i32
      %c0_i32_29 = arith.constant 0 : i32
      %29 = arith.cmpi slt, %27, %c0_i32_29 : i32
      %c0_i32_30 = arith.constant 0 : i32
      %30 = arith.cmpi slt, %26, %c0_i32_30 : i32
      %31 = arith.xori %29, %30 : i1
      %32 = arith.andi %31, %28 : i1
      %33 = arith.addi %27, %26 : i32
      %34 = arith.select %32, %33, %27 : i32
      %c5_i32 = arith.constant 5 : i32
      %35 = arith.cmpi slt, %34, %c5_i32 : i32
      %36 = arith.index_cast %arg21 : i32 to index
      %c0_31 = arith.constant 0 : index
      %c0_32 = arith.constant 0 : index
      %37 = vector.load %arg1[%36, %c0_31, %c0_32] : memref<10x8x256xf32, #tpu.memory_space<vmem>>, vector<1x8x256xf32>
      %38 = vector.shape_cast %37 : vector<1x8x256xf32> to vector<8x256xf32>
      %c0_33 = arith.constant 0 : index
      %c0_34 = arith.constant 0 : index
      %39 = vector.load %arg20[%c0_33, %c0_34] : memref<8x256xf32, #tpu.memory_space<vmem>>, vector<8x256xf32>
      %40 = arith.select %35, %38, %39 : vector<8x256xf32>
      %c0_35 = arith.constant 0 : index
      %c0_36 = arith.constant 0 : index
      %41 = vector.load %arg14[%c0_35, %c0_36] : memref<8x128xf32, #tpu.memory_space<vmem>>, vector<8x128xf32>
      %c0_37 = arith.constant 0 : index
      %c0_38 = arith.constant 0 : index
      %42 = vector.load %arg15[%c0_37, %c0_38] : memref<8x128xf32, #tpu.memory_space<vmem>>, vector<8x128xf32>
      %c0_39 = arith.constant 0 : index
      %c0_40 = arith.constant 0 : index
      %43 = vector.load %arg16[%c0_39, %c0_40] : memref<8x128xf32, #tpu.memory_space<vmem>>, vector<8x128xf32>
      %44 = arith.truncf %40 : vector<8x256xf32> to vector<8x256xbf16>
      %cst = arith.constant dense<0.000000e+00> : vector<8x512xf32>
      %45 = tpu.matmul %44, %4, %cst {dimension_numbers = #tpu.dot_dimension_numbers<[1], [0], [0], [1], [0, 0, 1, 1], [], []>} : vector<8x256xbf16>, vector<256x512xbf16>, vector<8x512xf32> -> vector<8x512xf32>
      %46 = arith.truncf %41 : vector<8x128xf32> to vector<8x128xbf16>
      %cst_41 = arith.constant dense<0.000000e+00> : vector<8x512xf32>
      %47 = tpu.matmul %46, %5, %cst_41 {dimension_numbers = #tpu.dot_dimension_numbers<[1], [0], [0], [1], [0, 0, 1, 1], [], []>} : vector<8x128xbf16>, vector<128x512xbf16>, vector<8x512xf32> -> vector<8x512xf32>
      %48 = arith.addf %45, %47 : vector<8x512xf32>
      %49 = arith.addf %48, %13 : vector<8x512xf32>
      %50 = arith.truncf %41 : vector<8x128xf32> to vector<8x128xbf16>
      %cst_42 = arith.constant dense<0.000000e+00> : vector<8x512xf32>
      %51 = tpu.matmul %50, %6, %cst_42 {dimension_numbers = #tpu.dot_dimension_numbers<[1], [0], [0], [1], [0, 0, 1, 1], [], []>} : vector<8x128xbf16>, vector<128x512xbf16>, vector<8x512xf32> -> vector<8x512xf32>
      %52 = arith.truncf %42 : vector<8x128xf32> to vector<8x128xbf16>
      %cst_43 = arith.constant dense<0.000000e+00> : vector<8x512xf32>
      %53 = tpu.matmul %52, %7, %cst_43 {dimension_numbers = #tpu.dot_dimension_numbers<[1], [0], [0], [1], [0, 0, 1, 1], [], []>} : vector<8x128xbf16>, vector<128x512xbf16>, vector<8x512xf32> -> vector<8x512xf32>
      %54 = arith.addf %51, %53 : vector<8x512xf32>
      %55 = arith.addf %54, %16 : vector<8x512xf32>
      %56 = arith.truncf %42 : vector<8x128xf32> to vector<8x128xbf16>
      %cst_44 = arith.constant dense<0.000000e+00> : vector<8x512xf32>
      %57 = tpu.matmul %56, %8, %cst_44 {dimension_numbers = #tpu.dot_dimension_numbers<[1], [0], [0], [1], [0, 0, 1, 1], [], []>} : vector<8x128xbf16>, vector<128x512xbf16>, vector<8x512xf32> -> vector<8x512xf32>
      %58 = arith.truncf %43 : vector<8x128xf32> to vector<8x128xbf16>
      %cst_45 = arith.constant dense<0.000000e+00> : vector<8x512xf32>
      %59 = tpu.matmul %58, %9, %cst_45 {dimension_numbers = #tpu.dot_dimension_numbers<[1], [0], [0], [1], [0, 0, 1, 1], [], []>} : vector<8x128xbf16>, vector<128x512xbf16>, vector<8x512xf32> -> vector<8x512xf32>
      %60 = arith.addf %57, %59 : vector<8x512xf32>
      %61 = arith.addf %60, %19 : vector<8x512xf32>
      %c0_46 = arith.constant 0 : index
      %c0_47 = arith.constant 0 : index
      %62 = vector.load %arg17[%c0_46, %c0_47] : memref<8x128xf32, #tpu.memory_space<vmem>>, vector<8x128xf32>
      %63 = vector.extract_strided_slice %49 {offsets = [0, 0], sizes = [8, 128], strides = [1, 1]} : vector<8x512xf32> to vector<8x128xf32>
      %cst_48 = arith.constant 0.000000e+00 : f32
      %64 = vector.broadcast %cst_48 : f32 to vector<8x128xf32>
      %65 = arith.subf %64, %63 : vector<8x128xf32>
      %66 = math.exp %65 : vector<8x128xf32>
      %cst_49 = arith.constant 1.000000e+00 : f32
      %67 = vector.broadcast %cst_49 : f32 to vector<8x128xf32>
      %68 = arith.addf %67, %66 : vector<8x128xf32>
      %cst_50 = arith.constant 1.000000e+00 : f32
      %69 = vector.broadcast %cst_50 : f32 to vector<8x128xf32>
      %70 = arith.divf %69, %68 : vector<8x128xf32>
      %71 = vector.extract_strided_slice %49 {offsets = [0, 128], sizes = [8, 128], strides = [1, 1]} : vector<8x512xf32> to vector<8x128xf32>
      %cst_51 = arith.constant 0.000000e+00 : f32
      %72 = vector.broadcast %cst_51 : f32 to vector<8x128xf32>
      %73 = arith.subf %72, %71 : vector<8x128xf32>
      %74 = math.exp %73 : vector<8x128xf32>
      %cst_52 = arith.constant 1.000000e+00 : f32
      %75 = vector.broadcast %cst_52 : f32 to vector<8x128xf32>
      %76 = arith.addf %75, %74 : vector<8x128xf32>
      %cst_53 = arith.constant 1.000000e+00 : f32
      %77 = vector.broadcast %cst_53 : f32 to vector<8x128xf32>
      %78 = arith.divf %77, %76 : vector<8x128xf32>
      %79 = vector.extract_strided_slice %49 {offsets = [0, 256], sizes = [8, 128], strides = [1, 1]} : vector<8x512xf32> to vector<8x128xf32>
      %80 = math.tanh %79 : vector<8x128xf32>
      %81 = vector.extract_strided_slice %49 {offsets = [0, 384], sizes = [8, 128], strides = [1, 1]} : vector<8x512xf32> to vector<8x128xf32>
      %cst_54 = arith.constant 0.000000e+00 : f32
      %82 = vector.broadcast %cst_54 : f32 to vector<8x128xf32>
      %83 = arith.subf %82, %81 : vector<8x128xf32>
      %84 = math.exp %83 : vector<8x128xf32>
      %cst_55 = arith.constant 1.000000e+00 : f32
      %85 = vector.broadcast %cst_55 : f32 to vector<8x128xf32>
      %86 = arith.addf %85, %84 : vector<8x128xf32>
      %cst_56 = arith.constant 1.000000e+00 : f32
      %87 = vector.broadcast %cst_56 : f32 to vector<8x128xf32>
      %88 = arith.divf %87, %86 : vector<8x128xf32>
      %89 = arith.mulf %78, %62 : vector<8x128xf32>
      %90 = arith.mulf %70, %80 : vector<8x128xf32>
      %91 = arith.addf %89, %90 : vector<8x128xf32>
      %92 = math.tanh %91 : vector<8x128xf32>
      %93 = arith.mulf %88, %92 : vector<8x128xf32>
      %c0_57 = arith.constant 0 : index
      %c0_58 = arith.constant 0 : index
      %94 = vector.load %arg18[%c0_57, %c0_58] : memref<8x128xf32, #tpu.memory_space<vmem>>, vector<8x128xf32>
      %95 = vector.extract_strided_slice %55 {offsets = [0, 0], sizes = [8, 128], strides = [1, 1]} : vector<8x512xf32> to vector<8x128xf32>
      %cst_59 = arith.constant 0.000000e+00 : f32
      %96 = vector.broadcast %cst_59 : f32 to vector<8x128xf32>
      %97 = arith.subf %96, %95 : vector<8x128xf32>
      %98 = math.exp %97 : vector<8x128xf32>
      %cst_60 = arith.constant 1.000000e+00 : f32
      %99 = vector.broadcast %cst_60 : f32 to vector<8x128xf32>
      %100 = arith.addf %99, %98 : vector<8x128xf32>
      %cst_61 = arith.constant 1.000000e+00 : f32
      %101 = vector.broadcast %cst_61 : f32 to vector<8x128xf32>
      %102 = arith.divf %101, %100 : vector<8x128xf32>
      %103 = vector.extract_strided_slice %55 {offsets = [0, 128], sizes = [8, 128], strides = [1, 1]} : vector<8x512xf32> to vector<8x128xf32>
      %cst_62 = arith.constant 0.000000e+00 : f32
      %104 = vector.broadcast %cst_62 : f32 to vector<8x128xf32>
      %105 = arith.subf %104, %103 : vector<8x128xf32>
      %106 = math.exp %105 : vector<8x128xf32>
      %cst_63 = arith.constant 1.000000e+00 : f32
      %107 = vector.broadcast %cst_63 : f32 to vector<8x128xf32>
      %108 = arith.addf %107, %106 : vector<8x128xf32>
      %cst_64 = arith.constant 1.000000e+00 : f32
      %109 = vector.broadcast %cst_64 : f32 to vector<8x128xf32>
      %110 = arith.divf %109, %108 : vector<8x128xf32>
      %111 = vector.extract_strided_slice %55 {offsets = [0, 256], sizes = [8, 128], strides = [1, 1]} : vector<8x512xf32> to vector<8x128xf32>
      %112 = math.tanh %111 : vector<8x128xf32>
      %113 = vector.extract_strided_slice %55 {offsets = [0, 384], sizes = [8, 128], strides = [1, 1]} : vector<8x512xf32> to vector<8x128xf32>
      %cst_65 = arith.constant 0.000000e+00 : f32
      %114 = vector.broadcast %cst_65 : f32 to vector<8x128xf32>
      %115 = arith.subf %114, %113 : vector<8x128xf32>
      %116 = math.exp %115 : vector<8x128xf32>
      %cst_66 = arith.constant 1.000000e+00 : f32
      %117 = vector.broadcast %cst_66 : f32 to vector<8x128xf32>
      %118 = arith.addf %117, %116 : vector<8x128xf32>
      %cst_67 = arith.constant 1.000000e+00 : f32
      %119 = vector.broadcast %cst_67 : f32 to vector<8x128xf32>
      %120 = arith.divf %119, %118 : vector<8x128xf32>
      %121 = arith.mulf %110, %94 : vector<8x128xf32>
      %122 = arith.mulf %102, %112 : vector<8x128xf32>
      %123 = arith.addf %121, %122 : vector<8x128xf32>
      %124 = math.tanh %123 : vector<8x128xf32>
      %125 = arith.mulf %120, %124 : vector<8x128xf32>
      %c0_68 = arith.constant 0 : index
      %c0_69 = arith.constant 0 : index
      %126 = vector.load %arg19[%c0_68, %c0_69] : memref<8x128xf32, #tpu.memory_space<vmem>>, vector<8x128xf32>
      %127 = vector.extract_strided_slice %61 {offsets = [0, 0], sizes = [8, 128], strides = [1, 1]} : vector<8x512xf32> to vector<8x128xf32>
      %cst_70 = arith.constant 0.000000e+00 : f32
      %128 = vector.broadcast %cst_70 : f32 to vector<8x128xf32>
      %129 = arith.subf %128, %127 : vector<8x128xf32>
      %130 = math.exp %129 : vector<8x128xf32>
      %cst_71 = arith.constant 1.000000e+00 : f32
      %131 = vector.broadcast %cst_71 : f32 to vector<8x128xf32>
      %132 = arith.addf %131, %130 : vector<8x128xf32>
      %cst_72 = arith.constant 1.000000e+00 : f32
      %133 = vector.broadcast %cst_72 : f32 to vector<8x128xf32>
      %134 = arith.divf %133, %132 : vector<8x128xf32>
      %135 = vector.extract_strided_slice %61 {offsets = [0, 128], sizes = [8, 128], strides = [1, 1]} : vector<8x512xf32> to vector<8x128xf32>
      %cst_73 = arith.constant 0.000000e+00 : f32
      %136 = vector.broadcast %cst_73 : f32 to vector<8x128xf32>
      %137 = arith.subf %136, %135 : vector<8x128xf32>
      %138 = math.exp %137 : vector<8x128xf32>
      %cst_74 = arith.constant 1.000000e+00 : f32
      %139 = vector.broadcast %cst_74 : f32 to vector<8x128xf32>
      %140 = arith.addf %139, %138 : vector<8x128xf32>
      %cst_75 = arith.constant 1.000000e+00 : f32
      %141 = vector.broadcast %cst_75 : f32 to vector<8x128xf32>
      %142 = arith.divf %141, %140 : vector<8x128xf32>
      %143 = vector.extract_strided_slice %61 {offsets = [0, 256], sizes = [8, 128], strides = [1, 1]} : vector<8x512xf32> to vector<8x128xf32>
      %144 = math.tanh %143 : vector<8x128xf32>
      %145 = vector.extract_strided_slice %61 {offsets = [0, 384], sizes = [8, 128], strides = [1, 1]} : vector<8x512xf32> to vector<8x128xf32>
      %cst_76 = arith.constant 0.000000e+00 : f32
      %146 = vector.broadcast %cst_76 : f32 to vector<8x128xf32>
      %147 = arith.subf %146, %145 : vector<8x128xf32>
      %148 = math.exp %147 : vector<8x128xf32>
      %cst_77 = arith.constant 1.000000e+00 : f32
      %149 = vector.broadcast %cst_77 : f32 to vector<8x128xf32>
      %150 = arith.addf %149, %148 : vector<8x128xf32>
      %cst_78 = arith.constant 1.000000e+00 : f32
      %151 = vector.broadcast %cst_78 : f32 to vector<8x128xf32>
      %152 = arith.divf %151, %150 : vector<8x128xf32>
      %153 = arith.mulf %142, %126 : vector<8x128xf32>
      %154 = arith.mulf %134, %144 : vector<8x128xf32>
      %155 = arith.addf %153, %154 : vector<8x128xf32>
      %156 = math.tanh %155 : vector<8x128xf32>
      %157 = arith.mulf %152, %156 : vector<8x128xf32>
      %158 = arith.truncf %157 : vector<8x128xf32> to vector<8x128xbf16>
      %cst_79 = arith.constant dense<0.000000e+00> : vector<8x256xf32>
      %159 = tpu.matmul %158, %10, %cst_79 {dimension_numbers = #tpu.dot_dimension_numbers<[1], [0], [0], [1], [0, 0, 1, 1], [], []>} : vector<8x128xbf16>, vector<128x256xbf16>, vector<8x256xf32> -> vector<8x256xf32>
      %160 = arith.addf %159, %22 : vector<8x256xf32>
      %c0_80 = arith.constant 0 : index
      %c0_81 = arith.constant 0 : index
      %161 = vector.load %arg14[%c0_80, %c0_81] : memref<8x128xf32, #tpu.memory_space<vmem>>, vector<8x128xf32>
      tpu.vector_store %arg14[%c0_80, %c0_81], %93 {strides = array<i32>} : memref<8x128xf32, #tpu.memory_space<vmem>>, vector<8x128xf32>,
      %c0_82 = arith.constant 0 : index
      %c0_83 = arith.constant 0 : index
      %162 = vector.load %arg15[%c0_82, %c0_83] : memref<8x128xf32, #tpu.memory_space<vmem>>, vector<8x128xf32>
      tpu.vector_store %arg15[%c0_82, %c0_83], %125 {strides = array<i32>} : memref<8x128xf32, #tpu.memory_space<vmem>>, vector<8x128xf32>,
      %c0_84 = arith.constant 0 : index
      %c0_85 = arith.constant 0 : index
      %163 = vector.load %arg16[%c0_84, %c0_85] : memref<8x128xf32, #tpu.memory_space<vmem>>, vector<8x128xf32>
      tpu.vector_store %arg16[%c0_84, %c0_85], %157 {strides = array<i32>} : memref<8x128xf32, #tpu.memory_space<vmem>>, vector<8x128xf32>,
      %c0_86 = arith.constant 0 : index
      %c0_87 = arith.constant 0 : index
      %164 = vector.load %arg17[%c0_86, %c0_87] : memref<8x128xf32, #tpu.memory_space<vmem>>, vector<8x128xf32>
      tpu.vector_store %arg17[%c0_86, %c0_87], %91 {strides = array<i32>} : memref<8x128xf32, #tpu.memory_space<vmem>>, vector<8x128xf32>,
      %c0_88 = arith.constant 0 : index
      %c0_89 = arith.constant 0 : index
      %165 = vector.load %arg18[%c0_88, %c0_89] : memref<8x128xf32, #tpu.memory_space<vmem>>, vector<8x128xf32>
      tpu.vector_store %arg18[%c0_88, %c0_89], %123 {strides = array<i32>} : memref<8x128xf32, #tpu.memory_space<vmem>>, vector<8x128xf32>,
      %c0_90 = arith.constant 0 : index
      %c0_91 = arith.constant 0 : index
      %166 = vector.load %arg19[%c0_90, %c0_91] : memref<8x128xf32, #tpu.memory_space<vmem>>, vector<8x128xf32>
      tpu.vector_store %arg19[%c0_90, %c0_91], %155 {strides = array<i32>} : memref<8x128xf32, #tpu.memory_space<vmem>>, vector<8x128xf32>,
      %c0_92 = arith.constant 0 : index
      %c0_93 = arith.constant 0 : index
      %167 = vector.load %arg20[%c0_92, %c0_93] : memref<8x256xf32, #tpu.memory_space<vmem>>, vector<8x256xf32>
      tpu.vector_store %arg20[%c0_92, %c0_93], %160 {strides = array<i32>} : memref<8x256xf32, #tpu.memory_space<vmem>>, vector<8x256xf32>,
      %168 = arith.index_cast %arg21 : i32 to index
      %c0_94 = arith.constant 0 : index
      %c0_95 = arith.constant 0 : index
      %169 = vector.load %arg13[%168, %c0_94, %c0_95] : memref<10x8x256xf32, #tpu.memory_space<vmem>>, vector<1x8x256xf32>
      %170 = vector.shape_cast %169 : vector<1x8x256xf32> to vector<8x256xf32>
      %171 = vector.shape_cast %160 : vector<8x256xf32> to vector<1x8x256xf32>
      tpu.vector_store %arg13[%168, %c0_94, %c0_95], %171 {strides = array<i32>} : memref<10x8x256xf32, #tpu.memory_space<vmem>>, vector<1x8x256xf32>,
    }
    %c10_i32_24 = arith.constant 10 : i32
    return
  }
  func.func @transform_0(%arg0: i32) -> (i32, i32, i32) {
    %c0_i32 = arith.constant 0 : i32
    %c0_i32_0 = arith.constant 0 : i32
    %c0_i32_1 = arith.constant 0 : i32
    return %arg0, %c0_i32, %c0_i32_0 : i32, i32, i32
  }
  func.func @transform_1(%arg0: i32) -> (i32, i32) {
    %c0_i32 = arith.constant 0 : i32
    %c0_i32_0 = arith.constant 0 : i32
    %c0_i32_1 = arith.constant 0 : i32
    return %c0_i32, %c0_i32_0 : i32, i32
  }
  func.func @transform_2(%arg0: i32) -> (i32, i32) {
    %c0_i32 = arith.constant 0 : i32
    %c0_i32_0 = arith.constant 0 : i32
    %c0_i32_1 = arith.constant 0 : i32
    return %c0_i32, %c0_i32_0 : i32, i32
  }
  func.func @transform_3(%arg0: i32) -> (i32, i32) {
    %c0_i32 = arith.constant 0 : i32
    %c0_i32_0 = arith.constant 0 : i32
    %c0_i32_1 = arith.constant 0 : i32
    return %c0_i32, %c0_i32_0 : i32, i32
  }
  func.func @transform_4(%arg0: i32) -> (i32, i32) {
    %c0_i32 = arith.constant 0 : i32
    %c0_i32_0 = arith.constant 0 : i32
    %c0_i32_1 = arith.constant 0 : i32
    return %c0_i32, %c0_i32_0 : i32, i32
  }
  func.func @transform_5(%arg0: i32) -> (i32, i32) {
    %c0_i32 = arith.constant 0 : i32
    %c0_i32_0 = arith.constant 0 : i32
    %c0_i32_1 = arith.constant 0 : i32
    return %c0_i32, %c0_i32_0 : i32, i32
  }
  func.func @transform_6(%arg0: i32) -> (i32, i32) {
    %c0_i32 = arith.constant 0 : i32
    %c0_i32_0 = arith.constant 0 : i32
    %c0_i32_1 = arith.constant 0 : i32
    return %c0_i32, %c0_i32_0 : i32, i32
  }
  func.func @transform_7(%arg0: i32) -> (i32, i32) {
    %c0_i32 = arith.constant 0 : i32
    %c0_i32_0 = arith.constant 0 : i32
    %c0_i32_1 = arith.constant 0 : i32
    return %c0_i32, %c0_i32_0 : i32, i32
  }
  func.func @transform_8(%arg0: i32) -> (i32, i32) {
    %c0_i32 = arith.constant 0 : i32
    %c0_i32_0 = arith.constant 0 : i32
    %c0_i32_1 = arith.constant 0 : i32
    return %c0_i32, %c0_i32_0 : i32, i32
  }
  func.func @transform_9(%arg0: i32) -> (i32, i32) {
    %c0_i32 = arith.constant 0 : i32
    %c0_i32_0 = arith.constant 0 : i32
    %c0_i32_1 = arith.constant 0 : i32
    return %c0_i32, %c0_i32_0 : i32, i32
  }
  func.func @transform_10(%arg0: i32) -> (i32, i32) {
    %c0_i32 = arith.constant 0 : i32
    %c0_i32_0 = arith.constant 0 : i32
    %c0_i32_1 = arith.constant 0 : i32
    return %c0_i32, %c0_i32_0 : i32, i32
  }
  func.func @transform_11(%arg0: i32) -> (i32, i32) {
    %c0_i32 = arith.constant 0 : i32
    %c0_i32_0 = arith.constant 0 : i32
    %c0_i32_1 = arith.constant 0 : i32
    return %c0_i32, %c0_i32_0 : i32, i32
  }
  func.func @transform_12(%arg0: i32) -> (i32, i32, i32) {
    %c0_i32 = arith.constant 0 : i32
    %c0_i32_0 = arith.constant 0 : i32
    %c0_i32_1 = arith.constant 0 : i32
    return %arg0, %c0_i32, %c0_i32_0 : i32, i32, i32
  }
}

</mosaic_0001>

<bundles_post_ra>
// kernel: tpu_custom_call.1
= control target key start
LH: loop header
LB: loop body
LE: loop exit
PB: predicated region body
PF: predicated region fallthrough
CT: control target
= control target key end

     0   :  { %s5259_s0 = inlined_call_operand.hbm [shape: f32[20,8,256], index: 0, kind: input, shape index: {}]   ;;  %s5260_s1 = inlined_call_operand.hbm [shape: bf16[256,512], index: 1, kind: input, shape index: {}]   ;;  %s5261_s2 = inlined_call_operand.hbm [shape: bf16[128,512], index: 2, kind: input, shape index: {}]   ;;  %s5262_s3 = inlined_call_operand.vmem [shape: f32[1,512], index: 3, kind: input, shape index: {}]   ;;  %s5263_s4 = inlined_call_operand.hbm [shape: bf16[128,512], index: 4, kind: input, shape index: {}]   ;;  %s5264_s5 = inlined_call_operand.hbm [shape: bf16[128,512], index: 5, kind: input, shape index: {}]   ;;  %s5265_s6 = inlined_call_operand.vmem [shape: f32[1,512], index: 6, kind: input, shape index: {}]   ;;  %s5266_s7 = inlined_call_operand.hbm [shape: bf16[128,512], index: 7, kind: input, shape index: {}]   ;;  %s5267_s8 = inlined_call_operand.hbm [shape: bf16[128,512], index: 8, kind: input, shape index: {}]   ;;  %s5268_s9 = inlined_call_operand.vmem [shape: f32[1,512], index: 9, kind: input, shape index: {}]   ;;  %s5269_s10 = inlined_call_operand.hbm [shape: bf16[128,256], index: 10, kind: input, shape index: {}]   ;;  %s5270_s11 = inlined_call_operand.vmem [shape: f32[1,256], index: 11, kind: input, shape index: {}]   ;;  %s5271_s12 = inlined_call_operand.hbm [shape: f32[20,8,256], index: 12, kind: output, shape index: {}]  }
   0x1   :  { %5680 = sst [smem:[#allocation246_spill]] %s5260_s1 }
   0x2   :  { %5681 = sst [smem:[#allocation247_spill]] %s5261_s2 }
   0x3   :  { %5682 = sst [smem:[#allocation248_spill]] %s5265_s6 }
   0x4   :  { %5683 = sst [smem:[#allocation249_spill]] %s5268_s9 }
   0x5   :  { %5684 = sst [smem:[#allocation250_spill]] %s5270_s11 }
   0x6   :  { %5685 = sst [smem:[#allocation251_spill]] %s5271_s12 }
   0x7   :  { %17 = vsyncpa [#allocation10], 0 }
   0x8   :  { %19 = vsyncpa [#allocation10 + $0x1], 0 }
   0x9   :  { %20 = vsyncpa [#allocation13], 0 }
   0xa   :  { %21 = vsyncpa [#allocation16], 0 }
   0xb   :  { %22 = vsyncpa [#allocation19], 0 }
   0xc   :  { %23 = vsyncpa [#allocation22], 0 }
   0xd   :  { %24 = vsyncpa [#allocation11], 0 }
   0xe   :  { %26 = vsyncpa [#allocation11 + $0x1], 0  ;;  %s3772_s21 = smov 0   ;;  %s3774_s22 = smov 0  }
   0xf   :  { %s3776_s23 = smov 0   ;;  %s3778_s24 = smov 0  }
  0x10 LB: > { %s3690_s25 = smov [#allocation12]   ;;  %s3793_s27 = sadd.s32 4294967295, %s3684_s24   ;;  %s3684_s24 = sphi %s3778_s24, %s6167_s24   ;;  %s3680_s23 = sphi %s3776_s23, %s6166_s23   ;;  %s3676_s22 = sphi %s3774_s22, %s6165_s22   ;;  %s3672_s21 = sphi %s3772_s21, %s6164_s21  }
  0x11   : > { %s332_s26 = sshll.u32 %s3690_s25, 4  ;;  %p2908_p0 = scmp.ge.s32.totalorder %s3684_s24, 1  ;;  %s3799_s26 = int_to_ptr.vmem [resolvable:$true] %s332_s26 }
  0x12   : > { %p5273_p1 = scmp.eq.s32.totalorder %s3793_s27, 0  ;;  %p320_p2 = scmp.lt.s32.totalorder %s3684_s24, 3 }
  0x13   : > { %s3691_s29 = smov [#allocation15]   ;;  %s3692_s14 = smov [#allocation18]  }
  0x14   : > { %p3801_p4 = pnand %p2908_p0, %p320_p2  ;;  %s361_s30 = sshll.u32 %s3691_s29, 4  ;;  %s3814_s30 = int_to_ptr.vmem [resolvable:$true] %s361_s30 }
  0x15   : > { %s390_s15 = sshll.u32 %s3692_s14, 4  ;;  %s5688_s1 = sld [smem:[#allocation246_spill]]  ;;  %s3816_s15 = int_to_ptr.vmem [resolvable:$true] %s390_s15 }
  0x16   : > { %s5686_s28 = scalar_select %p3801_p4, 1, 0 }
  0x17   : > { %p3220_p6 = pneg %p3801_p4 }
  0x19   : > { %p3810_p7 = pnand %p3220_p6, %p5273_p1 }
  0x1b   : > { %s3372_s18 = scalar_lea.hbm %s5688_s1, 8192  ;;  %p3826_p9 = pneg %p3810_p7 }
  0x1c   : > { %p3373_p8 = scmp.ne.s32.totalorder %s5688_s1, %s3372_s18  ;;  %p3379_p12 = scmp.lt.u32.totalorder %s3372_s18, %s5688_s1 }
  0x1e   : > { %p3375_p10 = pnand %p3826_p9, %p3373_p8 }
  0x20   : > { %p3376_p11 = pneg %p3375_p10 }
  0x22   : > { %p3381_p13 = pnand %p3379_p12, %p3376_p11 }
  0x24   : > { %3384 = shalt.err (!%p3381_p13)
}
  0x25   : > { %s3385_s16 = scalar_lea.vmem %s3799_s26, 8192  ;;  %p3393_p5 = scmp.lt.s32.totalorder %s3799_s26, %s3799_s26 }
  0x26   : > { %p3386_p0 = scmp.ne.s32.totalorder %s3799_s26, %s3385_s16  ;;  %p3394_p3 = scmp.lt.s32.totalorder %s3385_s16, %s3385_s16 }
  0x28   : > { %p3388_p2 = pnand %p3386_p0, %p3826_p9  ;;  %p3395_p8 = por %p3394_p3, %p3393_p5 }
  0x2a   : > { %p3389_p6 = pneg %p3388_p2 }
  0x2c   : > { %p3396_p10 = pnand %p3395_p8, %p3389_p6 }
  0x2e   : > { %3399 = shalt.err (!%p3396_p10)
}
  0x2f   : > { %s5275_s17 = smov 256   ;;  %s5276_s18 = smov 16  }
  0x30   : > { %3223 = dma.hbm_to_vmem [thread:$0]  (!%p3810_p7), %s5688_s1, 8192, %s3799_s26, [#allocation13], %s5275_s17, %s5275_s17, %s5276_s18  }
  0x31   : > { %s3400_s16 = scalar_lea.hbm %s5263_s4, 4096 }
  0x32   : > { %p3401_p3 = scmp.ne.s32.totalorder %s5263_s4, %s3400_s16  ;;  %p3407_p12 = scmp.lt.u32.totalorder %s3400_s16, %s5263_s4 }
  0x34   : > { %p3403_p5 = pnand %p3401_p3, %p3826_p9 }
  0x36   : > { %p3404_p11 = pneg %p3403_p5 }
  0x38   : > { %p3409_p13 = pnand %p3407_p12, %p3404_p11 }
  0x3a   : > { %3412 = shalt.err (!%p3409_p13)
}
  0x3b   : > { %s3413_s26 = scalar_lea.vmem %s3814_s30, 4096  ;;  %p3421_p8 = scmp.lt.s32.totalorder %s3814_s30, %s3814_s30 }
  0x3c   : > { %p3414_p0 = scmp.ne.s32.totalorder %s3814_s30, %s3413_s26  ;;  %p3422_p10 = scmp.lt.s32.totalorder %s3413_s26, %s3413_s26 }
  0x3e   : > { %p3416_p2 = pnand %p3414_p0, %p3826_p9  ;;  %p3423_p3 = por %p3422_p10, %p3421_p8 }
  0x40   : > { %p3417_p6 = pneg %p3416_p2 }
  0x42   : > { %p3424_p5 = pnand %p3423_p3, %p3417_p6 }
  0x44   : > { %3427 = shalt.err (!%p3424_p5)
}
  0x45   : > { %3229 = dma.hbm_to_vmem [thread:$0]  (!%p3810_p7), %s5263_s4, 4096, %s3814_s30, [#allocation16], %s5275_s17, %s5275_s17, %s5276_s18  }
  0x46   : > { %s3428_s19 = scalar_lea.hbm %s5266_s7, 4096 }
  0x47   : > { %p3429_p11 = scmp.ne.s32.totalorder %s5266_s7, %s3428_s19  ;;  %p3435_p0 = scmp.lt.u32.totalorder %s3428_s19, %s5266_s7 }
  0x49   : > { %p3431_p12 = pnand %p3429_p11, %p3826_p9 }
  0x4b   : > { %p3432_p13 = pneg %p3431_p12 }
  0x4d   : > { %p3437_p2 = pnand %p3435_p0, %p3432_p13 }
  0x4f   : > { %3440 = shalt.err (!%p3437_p2)
}
  0x50   : > { %s3441_s30 = scalar_lea.vmem %s3816_s15, 4096  ;;  %p3449_p3 = scmp.lt.s32.totalorder %s3816_s15, %s3816_s15 }
  0x51   : > { %p3442_p6 = scmp.ne.s32.totalorder %s3816_s15, %s3441_s30  ;;  %p3450_p5 = scmp.lt.s32.totalorder %s3441_s30, %s3441_s30 }
  0x53   : > { %p3444_p8 = pnand %p3442_p6, %p3826_p9  ;;  %p3451_p11 = por %p3450_p5, %p3449_p3 }
  0x55   : > { %p3445_p10 = pneg %p3444_p8 }
  0x57   : > { %p3452_p12 = pnand %p3451_p11, %p3445_p10 }
  0x59   : > { %3455 = shalt.err (!%p3452_p12)
}
  0x5a   : > { %3235 = dma.hbm_to_vmem [thread:$0]  (!%p3810_p7), %s5266_s7, 4096, %s3816_s15, [#allocation19], %s5275_s17, %s5275_s17, %s5276_s18  }
  0x5b   : > { %s3695_s9 = smov [#allocation14]   ;;  %s3696_s12 = smov [#allocation17]  }
  0x5c   : > { %s345_s11 = sshll.u32 %s3695_s9, 4  ;;  %s374_s19 = sshll.u32 %s3696_s12, 4  ;;  %s346_s11 = int_to_ptr.vmem [resolvable:$true] %s345_s11  ;;  %s375_s19 = int_to_ptr.vmem [resolvable:$true] %s374_s19 }
  0x5d   : > { %s5690_s2 = sld [smem:[#allocation247_spill]] }
  0x63   : > { %s3456_s14 = scalar_lea.hbm %s5690_s2, 4096 }
  0x64   : > { %p3457_p13 = scmp.ne.s32.totalorder %s5690_s2, %s3456_s14  ;;  %p3463_p6 = scmp.lt.u32.totalorder %s3456_s14, %s5690_s2 }
  0x66   : > { %p3459_p0 = pnand %p3457_p13, %p3826_p9 }
  0x68   : > { %p3460_p2 = pneg %p3459_p0 }
  0x6a   : > { %p3465_p8 = pnand %p3463_p6, %p3460_p2 }
  0x6c   : > { %3468 = shalt.err (!%p3465_p8)
}
  0x6d   : > { %s3469_s15 = scalar_lea.vmem %s346_s11, 4096  ;;  %p3477_p11 = scmp.lt.s32.totalorder %s346_s11, %s346_s11 }
  0x6e   : > { %p3470_p10 = scmp.ne.s32.totalorder %s346_s11, %s3469_s15  ;;  %p3478_p12 = scmp.lt.s32.totalorder %s3469_s15, %s3469_s15 }
  0x70   : > { %p3472_p3 = pnand %p3470_p10, %p3826_p9  ;;  %p3479_p1 = por %p3478_p12, %p3477_p11 }
  0x72   : > { %p3473_p5 = pneg %p3472_p3 }
  0x74   : > { %p3480_p4 = pnand %p3479_p1, %p3473_p5 }
  0x76   : > { %3483 = shalt.err (!%p3480_p4)
}
  0x77   : > { %3226 = dma.hbm_to_vmem [thread:$0]  (!%p3810_p7), %s5690_s2, 4096, %s346_s11, [#allocation13], %s5275_s17, %s5275_s17, %s5276_s18  }
  0x78   : > { %s3484_s20 = scalar_lea.hbm %s5264_s5, 4096 }
  0x79   : > { %p3485_p1 = scmp.ne.s32.totalorder %s5264_s5, %s3484_s20  ;;  %p3491_p0 = scmp.lt.u32.totalorder %s3484_s20, %s5264_s5 }
  0x7b   : > { %p3487_p4 = pnand %p3485_p1, %p3826_p9 }
  0x7d   : > { %p3488_p13 = pneg %p3487_p4 }
  0x7f   : > { %p3493_p2 = pnand %p3491_p0, %p3488_p13 }
  0x81   : > { %3496 = shalt.err (!%p3493_p2)
}
  0x82   : > { %s3497_s26 = scalar_lea.vmem %s375_s19, 4096  ;;  %p3505_p3 = scmp.lt.s32.totalorder %s375_s19, %s375_s19 }
  0x83   : > { %p3498_p6 = scmp.ne.s32.totalorder %s375_s19, %s3497_s26  ;;  %p3506_p5 = scmp.lt.s32.totalorder %s3497_s26, %s3497_s26 }
  0x85   : > { %p3500_p8 = pnand %p3498_p6, %p3826_p9  ;;  %p3507_p11 = por %p3506_p5, %p3505_p3 }
  0x87   : > { %p3501_p10 = pneg %p3500_p8 }
  0x89   : > { %p3508_p12 = pnand %p3507_p11, %p3501_p10 }
  0x8b   : > { %3511 = shalt.err (!%p3508_p12)
}
  0x8c   : > { %3232 = dma.hbm_to_vmem [thread:$0]  (!%p3810_p7), %s5264_s5, 4096, %s375_s19, [#allocation16], %s5275_s17, %s5275_s17, %s5276_s18  }
  0x8d   : > { %s3697_s1 = smov [#allocation20]   ;;  %s3698_s9 = smov [#allocation21]  }
  0x8e   : > { %s403_s6 = sshll.u32 %s3697_s1, 4  ;;  %s419_s12 = sshll.u32 %s3698_s9, 4  ;;  %s404_s6 = int_to_ptr.vmem [resolvable:$true] %s403_s6  ;;  %s420_s12 = int_to_ptr.vmem [resolvable:$true] %s419_s12 }
  0x8f   : > { %s3512_s14 = scalar_lea.hbm %s5267_s8, 4096 }
  0x90   : > { %p3513_p1 = scmp.ne.s32.totalorder %s5267_s8, %s3512_s14  ;;  %p3519_p0 = scmp.lt.u32.totalorder %s3512_s14, %s5267_s8 }
  0x92   : > { %p3515_p4 = pnand %p3513_p1, %p3826_p9 }
  0x94   : > { %p3516_p13 = pneg %p3515_p4 }
  0x96   : > { %p3521_p2 = pnand %p3519_p0, %p3516_p13 }
  0x98   : > { %3524 = shalt.err (!%p3521_p2)
}
  0x99   : > { %s3525_s19 = scalar_lea.vmem %s404_s6, 4096  ;;  %p3533_p3 = scmp.lt.s32.totalorder %s404_s6, %s404_s6 }
  0x9a   : > { %p3526_p6 = scmp.ne.s32.totalorder %s404_s6, %s3525_s19  ;;  %p3534_p5 = scmp.lt.s32.totalorder %s3525_s19, %s3525_s19 }
  0x9c   : > { %p3528_p8 = pnand %p3526_p6, %p3826_p9  ;;  %p3535_p11 = por %p3534_p5, %p3533_p3 }
  0x9e   : > { %p3529_p10 = pneg %p3528_p8 }
  0xa0   : > { %p3536_p12 = pnand %p3535_p11, %p3529_p10 }
  0xa2   : > { %3539 = shalt.err (!%p3536_p12)
}
  0xa3   : > { %3238 = dma.hbm_to_vmem [thread:$0]  (!%p3810_p7), %s5267_s8, 4096, %s404_s6, [#allocation19], %s5275_s17, %s5275_s17, %s5276_s18  }
  0xa4   : > { %s3540_s29 = scalar_lea.hbm %s5269_s10, 2048 }
  0xa5   : > { %p3541_p1 = scmp.ne.s32.totalorder %s5269_s10, %s3540_s29  ;;  %p3547_p0 = scmp.lt.u32.totalorder %s3540_s29, %s5269_s10 }
  0xa7   : > { %p3543_p4 = pnand %p3541_p1, %p3826_p9 }
  0xa9   : > { %p3544_p13 = pneg %p3543_p4 }
  0xab   : > { %p3549_p2 = pnand %p3547_p0, %p3544_p13 }
  0xad   : > { %3552 = shalt.err (!%p3549_p2)
}
  0xae   : > { %s3553_s11 = scalar_lea.vmem %s420_s12, 2048  ;;  %p3561_p3 = scmp.lt.s32.totalorder %s420_s12, %s420_s12 }
  0xaf   : > { %p3554_p6 = scmp.ne.s32.totalorder %s420_s12, %s3553_s11  ;;  %p3562_p5 = scmp.lt.s32.totalorder %s3553_s11, %s3553_s11 }
  0xb1   : > { %p3556_p8 = pnand %p3554_p6, %p3826_p9  ;;  %p3563_p11 = por %p3562_p5, %p3561_p3 }
  0xb3   : > { %p3557_p10 = pneg %p3556_p8 }
  0xb5   : > { %p3564_p12 = pnand %p3563_p11, %p3557_p10 }
  0xb7   : > { %3567 = shalt.err (!%p3564_p12)
}
  0xb8   : > { %s3699_s6 = smov 128   ;;  %s3700_s25 = smov 8  }
  0xb9   : > { %3241 = dma.hbm_to_vmem [thread:$0]  (!%p3810_p7), %s5269_s10, 2048, %s420_s12, [#allocation22], %s3699_s6, %s3699_s6, %s3700_s25  }
  0xba   : > { %s2907_s1 = sadd.s32 4294967294, %s3684_s24   ;;  %s3985_s9 = sadd.s32 1, %s3684_s24  }
  0xbb   : > { %s39_s20 = sadd.s32 1, %s3680_s23  ;;  %s36_s29 = ssub.s32 %s3684_s24, %s3985_s9 }
  0xbc   : > { %p46_p9 = scmp.ne.s32.totalorder %s3680_s23, %s3676_s22  ;;  %p37_p1 = scmp.eq.s32.totalorder %s36_s29, 0 }
  0xbd   : > { %p47_p4 = scmp.eq.s32.totalorder %s3684_s24, 0  ;;  %p52_p13 = scmp.ne.s32.totalorder %s3676_s22, %s3672_s21 }
  0xbe   : > { %p307_p0 = scmp.eq.s32.totalorder %s3793_s27, 1  ;;  %p5691_p6 = scmp.eq.s32.totalorder %s3793_s27, 0 }
  0xbf   : > { %s3997_s14 = scalar_select %p37_p1, %s3680_s23, %s39_s20  }
  0xc0   : > { %p48_p2 = por %p47_p4, %p46_p9  ;;  %p4001_p8 = por %p5691_p6, %p52_p13 }
  0xc1   : > { %p4005_p7 = por %p307_p0, %p46_p9  ;;  %p313_p10 = scmp.eq.s32.totalorder %s2907_s1, 1 }
  0xc2   : > { %p3257_p3 = scmp.lt.s32.totalorder %s3684_s24, 2  ;;  %s436_s16 = sand.u32 1, %s3680_s23  }
  0xc3   : > { %s5693_s12 = scalar_select %p4005_p7, 1, 0 }
  0xc4   : > { %p4011_p5 = por %p313_p10, %p52_p13  ;;  %s3186_s26 = smul.u32 160, %s436_s16 }
  0xc5   : > { %p4015_p11 = pnand %p3257_p3, %p48_p2  ;;  %s3184_s6 = smul.u32 2560, %s3684_s24 }
  0xc6   : > { %s5694_s30 = scalar_select %p4011_p5, 1, 0 }
  0xc7   : > { %s4023_s15 = scalar_lea.hbm %s5259_s0, %s3184_s6  ;;  %s440_s1 = scalar_lea.vmem [#allocation9], %s3186_s26 }
  0xc8   : > { %s448_s20 = sshll.u32 %s440_s1, 4  ;;  %s4027_s29 = scalar_lea.sflag [#allocation10], %s436_s16  ;;  %s4025_s20 = int_to_ptr.vmem [resolvable:$true] %s448_s20 }
  0xc9   : > { %s3568_s17 = scalar_lea.hbm %s4023_s15, 2560  ;;  %p3570_p9 = pneg %p4015_p11 }
  0xca   : > { %p3569_p12 = scmp.ne.s32.totalorder %s4023_s15, %s3568_s17  ;;  %s3573_s19 = scalar_lea.hbm %s5259_s0, 5120 }
  0xcb   : > { %p3574_p13 = scmp.lt.u32.totalorder %s4023_s15, %s5259_s0  ;;  %p3575_p0 = scmp.lt.u32.totalorder %s3573_s19, %s3568_s17 }
  0xcc   : > { %p3571_p1 = pnand %p3570_p9, %p3569_p12  ;;  %p3577_p6 = scmp.lt.u32.totalorder %s3568_s17, %s4023_s15 }
  0xcd   : > { %p3576_p2 = por %p3575_p0, %p3574_p13 }
  0xce   : > { %p3572_p4 = pneg %p3571_p1 }
  0xcf   : > { %p3578_p10 = por %p3577_p6, %p3576_p2 }
  0xd1   : > { %p3579_p3 = pnand %p3578_p10, %p3572_p4 }
  0xd3   : > { %3582 = shalt.err (!%p3579_p3)
}
  0xd4   : > { %s3583_s16 = scalar_lea.vmem %s4025_s20, 2560  ;;  %s3701_s26 = smov [#allocation9]  }
  0xd5   : > { %p3584_p12 = scmp.ne.s32.totalorder %s4025_s20, %s3583_s16  ;;  %s3588_s1 = sshll.u32 %s3701_s26, 4  ;;  %s3589_s1 = int_to_ptr.vmem [resolvable:$false] %s3588_s1 }
  0xd6   : > { %s3590_s2 = scalar_lea.vmem %s3589_s1, 5120  ;;  %p3591_p7 = scmp.lt.s32.totalorder %s4025_s20, %s3589_s1 }
  0xd7   : > { %p3586_p1 = pnand %p3584_p12, %p3570_p9  ;;  %p3592_p13 = scmp.lt.s32.totalorder %s3590_s2, %s3583_s16 }
  0xd9   : > { %p3587_p5 = pneg %p3586_p1  ;;  %p3593_p0 = por %p3592_p13, %p3591_p7 }
  0xdb   : > { %p3594_p2 = pnand %p3593_p0, %p3587_p5 }
  0xdd   : > { %3597 = shalt.err (!%p3594_p2)
}
  0xde   : > { %s5696_s17 = smov 16   ;;  %s5697_s18 = smov 256  }
  0xdf   : > { %3245 = dma.hbm_to_vmem [thread:$0]  (!%p4015_p11), %s4023_s15, 2560, %s4025_s20, %s4027_s29, %s5697_s18, %s5697_s18, %s5696_s17  }
  0xe0   : > { %p5698_p9 = scmp.ne.s32.totalorder %s5686_s28, 0 }
  0xe2   : > { %460 = sbr.rel (%p5698_p9) target bundleno = 1108 (0x454), region = 68 }
  0xe9   : > { %s4061_s6 = sand.u32 1, %s3676_s22  }
  0xea   : > { %s3187_s25 = smul.u32 160, %s4061_s6  ;;  %s463_s19 = scalar_lea.sflag [#allocation10], %s4061_s6 }
  0xec   : > { %s4065_s16 = scalar_lea.vmem [#allocation9], %s3187_s25 }
  0xed   : > { %3647 = dma.done.wait (%p4001_p8), %s463_s19, 2560  }
  0xee   : > { %3649 = vsyncadd (%p4001_p8), %s463_s19, 4294964736  ;;  %p5699_p7 = scmp.eq.s32.totalorder %s3793_s27, 0 }
  0xf0   : > { %3651 = dma.done.wait (%p5699_p7), [#allocation13], 12288   ;;  %p5700_p5 = pmov %p5699_p7 }
  0xf2   : > { %3653 = vsyncadd (%p5700_p5), [#allocation13], 4294955008  ;;  %p5701_p11 = pmov %p5700_p5 }
  0xf3   : > { %p5702_p4 = pmov %p5700_p5 }
  0xf4   : > { %3655 = dma.done.wait (%p5701_p11), [#allocation16], 8192  }
  0xf5   : > { %3657 = vsyncadd (%p5702_p4), [#allocation16], 4294959104  ;;  %p5703_p6 = pmov %p5702_p4 }
  0xf6   : > { %p5704_p10 = pmov %p5702_p4 }
  0xf7   : > { %3659 = dma.done.wait (%p5703_p6), [#allocation19], 8192  }
  0xf8   : > { %3661 = vsyncadd (%p5704_p10), [#allocation19], 4294959104  ;;  %p5705_p8 = pmov %p5702_p4 }
  0xf9   : > { %p5706_p3 = pmov %p5702_p4 }
  0xfa   : > { %3663 = dma.done.wait (%p5705_p8), [#allocation22], 2048  }
  0xfb   : > { %3665 = vsyncadd (%p5706_p3), [#allocation22], 4294965248  ;;  %s4087_s28 = scalar_lea.vmem [#allocation23], %s3187_s25  ;;  %p5707_p12 = scmp.ne.s32.totalorder %s3793_s27, 0 }
  0xfc   : > { %v3702_v0 = vmov (!%p5707_p12), 0.0  }
  0xfd   : > { %541 = sbr.rel (%p5707_p12) target bundleno = 260 (0x104), region = 104  ;;  %542 = vst [vmem:[#allocation2] sm:$0xff] (!%p5707_p12), %v3702_v0  ;;  %543 = vst [vmem:[#allocation3] sm:$0xff] (!%p5707_p12), %v3702_v0 }
  0xfe   : > { %544 = vst [vmem:[#allocation4] sm:$0xff] (!%p5707_p12), %v3702_v0  ;;  %545 = vst [vmem:[#allocation5] sm:$0xff] (!%p5707_p12), %v3702_v0 }
  0xff   : > { %546 = vst [vmem:[#allocation6] sm:$0xff] (!%p5707_p12), %v3702_v0  ;;  %547 = vst [vmem:[#allocation7] sm:$0xff] (!%p5707_p12), %v3702_v0 }
 0x100   : > { %548 = vst [vmem:[#allocation8] sm:$0xff] (!%p5707_p12), %v3702_v0  ;;  %549 = vst [vmem:[#allocation8 + $0x8] sm:$0xff] (!%p5707_p12), %v3702_v0 }
 0x104 PF: > { %s550_s13 = smul.u32 10, %s3793_s27  ;;  %v4092_v1 = vld [vmem:[#allocation12] sm:$0xff]  ;;  %v4094_v2 = vld [vmem:[#allocation12 + $0x8] sm:$0xff]  ;;  %v4096_v3 = vld [vmem:[#allocation12 + $0x10] sm:$0xff]  ;;  %s5924_s26 = sld [smem:[#allocation248_spill]] }
 0x105   : > { %5708 = vst [vmem:[#allocation30_spill] sm:$0xff] %v4092_v1  ;;  %5709 = vst [vmem:[#allocation31_spill] sm:$0xff] %v4094_v2  ;;  %v4098_v4 = vld [vmem:[#allocation12 + $0x18] sm:$0xff]  ;;  %v4100_v5 = vld [vmem:[#allocation12 + $0x20] sm:$0xff]  ;;  %s5925_s17 = sld [smem:[#allocation249_spill]]  ;;  %s5926_s19 = sld [smem:[#allocation250_spill]] }
 0x106   : > { %5710 = vst [vmem:[#allocation32_spill] sm:$0xff] %v4096_v3  ;;  %5711 = vst [vmem:[#allocation33_spill] sm:$0xff] %v4098_v4  ;;  %v4102_v6 = vld [vmem:[#allocation12 + $0x28] sm:$0xff]  ;;  %v4104_v7 = vld [vmem:[#allocation12 + $0x30] sm:$0xff]  ;;  %s4628_s11 = smov 0  }
 0x107   : > { %5712 = vst [vmem:[#allocation34_spill] sm:$0xff] %v4100_v5  ;;  %5713 = vst [vmem:[#allocation35_spill] sm:$0xff] %v4102_v6  ;;  %v4106_v8 = vld [vmem:[#allocation12 + $0x38] sm:$0xff]  ;;  %v4108_v9 = vld [vmem:[#allocation12 + $0x40] sm:$0xff] }
 0x108   : > { %5714 = vst [vmem:[#allocation36_spill] sm:$0xff] %v4104_v7  ;;  %5715 = vst [vmem:[#allocation37_spill] sm:$0xff] %v4106_v8  ;;  %v4110_v10 = vld [vmem:[#allocation12 + $0x48] sm:$0xff]  ;;  %v4112_v11 = vld [vmem:[#allocation12 + $0x50] sm:$0xff] }
 0x109   : > { %5716 = vst [vmem:[#allocation38_spill] sm:$0xff] %v4108_v9  ;;  %5717 = vst [vmem:[#allocation39_spill] sm:$0xff] %v4110_v10  ;;  %v4114_v12 = vld [vmem:[#allocation12 + $0x58] sm:$0xff]  ;;  %v4116_v13 = vld [vmem:[#allocation12 + $0x60] sm:$0xff] }
 0x10a   : > { %5718 = vst [vmem:[#allocation40_spill] sm:$0xff] %v4112_v11  ;;  %5719 = vst [vmem:[#allocation41_spill] sm:$0xff] %v4114_v12  ;;  %v4118_v14 = vld [vmem:[#allocation12 + $0x68] sm:$0xff]  ;;  %v4120_v15 = vld [vmem:[#allocation12 + $0x70] sm:$0xff] }
 0x10b   : > { %5720 = vst [vmem:[#allocation42_spill] sm:$0xff] %v4116_v13  ;;  %5721 = vst [vmem:[#allocation43_spill] sm:$0xff] %v4118_v14  ;;  %v4122_v16 = vld [vmem:[#allocation12 + $0x78] sm:$0xff]  ;;  %v4124_v17 = vld [vmem:[#allocation12 + $0x80] sm:$0xff] }
 0x10c   : > { %5722 = vst [vmem:[#allocation44_spill] sm:$0xff] %v4120_v15  ;;  %5723 = vst [vmem:[#allocation45_spill] sm:$0xff] %v4122_v16  ;;  %v4126_v18 = vld [vmem:[#allocation12 + $0x88] sm:$0xff]  ;;  %v4128_v19 = vld [vmem:[#allocation12 + $0x90] sm:$0xff] }
 0x10d   : > { %5724 = vst [vmem:[#allocation46_spill] sm:$0xff] %v4124_v17  ;;  %5725 = vst [vmem:[#allocation47_spill] sm:$0xff] %v4126_v18  ;;  %v4130_v20 = vld [vmem:[#allocation12 + $0x98] sm:$0xff]  ;;  %v4132_v21 = vld [vmem:[#allocation12 + $0xa0] sm:$0xff] }
 0x10e   : > { %5726 = vst [vmem:[#allocation48_spill] sm:$0xff] %v4128_v19  ;;  %5727 = vst [vmem:[#allocation49_spill] sm:$0xff] %v4130_v20  ;;  %v4134_v22 = vld [vmem:[#allocation12 + $0xa8] sm:$0xff]  ;;  %v4136_v23 = vld [vmem:[#allocation12 + $0xb0] sm:$0xff] }
 0x10f   : > { %5728 = vst [vmem:[#allocation50_spill] sm:$0xff] %v4132_v21  ;;  %5729 = vst [vmem:[#allocation51_spill] sm:$0xff] %v4134_v22  ;;  %v4138_v24 = vld [vmem:[#allocation12 + $0xb8] sm:$0xff]  ;;  %v4140_v25 = vld [vmem:[#allocation12 + $0xc0] sm:$0xff] }
 0x110   : > { %5730 = vst [vmem:[#allocation52_spill] sm:$0xff] %v4136_v23  ;;  %5731 = vst [vmem:[#allocation53_spill] sm:$0xff] %v4138_v24  ;;  %v4142_v26 = vld [vmem:[#allocation12 + $0xc8] sm:$0xff]  ;;  %v4144_v27 = vld [vmem:[#allocation12 + $0xd0] sm:$0xff] }
 0x111   : > { %5732 = vst [vmem:[#allocation54_spill] sm:$0xff] %v4140_v25  ;;  %5733 = vst [vmem:[#allocation55_spill] sm:$0xff] %v4142_v26  ;;  %v4146_v28 = vld [vmem:[#allocation12 + $0xd8] sm:$0xff]  ;;  %v4148_v29 = vld [vmem:[#allocation12 + $0xe0] sm:$0xff] }
 0x112   : > { %5734 = vst [vmem:[#allocation56_spill] sm:$0xff] %v4144_v27  ;;  %5735 = vst [vmem:[#allocation57_spill] sm:$0xff] %v4146_v28  ;;  %v4150_v30 = vld [vmem:[#allocation12 + $0xe8] sm:$0xff]  ;;  %v4152_v31 = vld [vmem:[#allocation12 + $0xf0] sm:$0xff] }
 0x113   : > { %5736 = vst [vmem:[#allocation58_spill] sm:$0xff] %v4148_v29  ;;  %5737 = vst [vmem:[#allocation59_spill] sm:$0xff] %v4150_v30  ;;  %v4154_v32 = vld [vmem:[#allocation12 + $0xf8] sm:$0xff]  ;;  %v4156_v33 = vld [vmem:[#allocation12 + $0x100] sm:$0xff] }
 0x114   : > { %5738 = vst [vmem:[#allocation60_spill] sm:$0xff] %v4152_v31  ;;  %5739 = vst [vmem:[#allocation61_spill] sm:$0xff] %v4154_v32  ;;  %v4158_v34 = vld [vmem:[#allocation12 + $0x108] sm:$0xff]  ;;  %v4160_v35 = vld [vmem:[#allocation12 + $0x110] sm:$0xff] }
 0x115   : > { %5740 = vst [vmem:[#allocation62_spill] sm:$0xff] %v4156_v33  ;;  %5741 = vst [vmem:[#allocation63_spill] sm:$0xff] %v4158_v34  ;;  %v4162_v36 = vld [vmem:[#allocation12 + $0x118] sm:$0xff]  ;;  %v4164_v37 = vld [vmem:[#allocation12 + $0x120] sm:$0xff] }
 0x116   : > { %5742 = vst [vmem:[#allocation64_spill] sm:$0xff] %v4160_v35  ;;  %5743 = vst [vmem:[#allocation65_spill] sm:$0xff] %v4162_v36  ;;  %v4166_v38 = vld [vmem:[#allocation12 + $0x128] sm:$0xff]  ;;  %v4168_v39 = vld [vmem:[#allocation12 + $0x130] sm:$0xff] }
 0x117   : > { %5744 = vst [vmem:[#allocation66_spill] sm:$0xff] %v4164_v37  ;;  %5745 = vst [vmem:[#allocation67_spill] sm:$0xff] %v4166_v38  ;;  %v4170_v40 = vld [vmem:[#allocation12 + $0x138] sm:$0xff]  ;;  %v4172_v41 = vld [vmem:[#allocation12 + $0x140] sm:$0xff] }
 0x118   : > { %5746 = vst [vmem:[#allocation68_spill] sm:$0xff] %v4168_v39  ;;  %5747 = vst [vmem:[#allocation69_spill] sm:$0xff] %v4170_v40  ;;  %v4174_v42 = vld [vmem:[#allocation12 + $0x148] sm:$0xff]  ;;  %v4176_v43 = vld [vmem:[#allocation12 + $0x150] sm:$0xff] }
 0x119   : > { %5748 = vst [vmem:[#allocation70_spill] sm:$0xff] %v4172_v41  ;;  %5749 = vst [vmem:[#allocation71_spill] sm:$0xff] %v4174_v42  ;;  %v4178_v44 = vld [vmem:[#allocation12 + $0x158] sm:$0xff]  ;;  %v4180_v45 = vld [vmem:[#allocation12 + $0x160] sm:$0xff] }
 0x11a   : > { %5750 = vst [vmem:[#allocation72_spill] sm:$0xff] %v4176_v43  ;;  %5751 = vst [vmem:[#allocation73_spill] sm:$0xff] %v4178_v44  ;;  %v4182_v46 = vld [vmem:[#allocation12 + $0x168] sm:$0xff]  ;;  %v4184_v47 = vld [vmem:[#allocation12 + $0x170] sm:$0xff] }
 0x11b   : > { %5752 = vst [vmem:[#allocation74_spill] sm:$0xff] %v4180_v45  ;;  %5753 = vst [vmem:[#allocation75_spill] sm:$0xff] %v4182_v46  ;;  %v4186_v48 = vld [vmem:[#allocation12 + $0x178] sm:$0xff]  ;;  %v4188_v49 = vld [vmem:[#allocation12 + $0x180] sm:$0xff] }
 0x11c   : > { %5754 = vst [vmem:[#allocation76_spill] sm:$0xff] %v4184_v47  ;;  %5755 = vst [vmem:[#allocation77_spill] sm:$0xff] %v4186_v48  ;;  %v4190_v50 = vld [vmem:[#allocation12 + $0x188] sm:$0xff]  ;;  %v4192_v51 = vld [vmem:[#allocation12 + $0x190] sm:$0xff] }
 0x11d   : > { %5756 = vst [vmem:[#allocation78_spill] sm:$0xff] %v4188_v49  ;;  %5757 = vst [vmem:[#allocation79_spill] sm:$0xff] %v4190_v50  ;;  %v4194_v52 = vld [vmem:[#allocation12 + $0x198] sm:$0xff]  ;;  %v4196_v53 = vld [vmem:[#allocation12 + $0x1a0] sm:$0xff] }
 0x11e   : > { %5758 = vst [vmem:[#allocation80_spill] sm:$0xff] %v4192_v51  ;;  %5759 = vst [vmem:[#allocation81_spill] sm:$0xff] %v4194_v52  ;;  %v4198_v54 = vld [vmem:[#allocation12 + $0x1a8] sm:$0xff]  ;;  %v4200_v55 = vld [vmem:[#allocation12 + $0x1b0] sm:$0xff] }
 0x11f   : > { %5760 = vst [vmem:[#allocation82_spill] sm:$0xff] %v4196_v53  ;;  %5761 = vst [vmem:[#allocation83_spill] sm:$0xff] %v4198_v54  ;;  %v4202_v56 = vld [vmem:[#allocation12 + $0x1b8] sm:$0xff]  ;;  %v4204_v57 = vld [vmem:[#allocation12 + $0x1c0] sm:$0xff] }
 0x120   : > { %5762 = vst [vmem:[#allocation84_spill] sm:$0xff] %v4200_v55  ;;  %5763 = vst [vmem:[#allocation85_spill] sm:$0xff] %v4202_v56  ;;  %v4206_v58 = vld [vmem:[#allocation12 + $0x1c8] sm:$0xff]  ;;  %v4208_v59 = vld [vmem:[#allocation12 + $0x1d0] sm:$0xff] }
 0x121   : > { %5764 = vst [vmem:[#allocation86_spill] sm:$0xff] %v4204_v57  ;;  %5765 = vst [vmem:[#allocation87_spill] sm:$0xff] %v4206_v58  ;;  %v4210_v60 = vld [vmem:[#allocation12 + $0x1d8] sm:$0xff]  ;;  %v4212_v61 = vld [vmem:[#allocation12 + $0x1e0] sm:$0xff] }
 0x122   : > { %5766 = vst [vmem:[#allocation88_spill] sm:$0xff] %v4208_v59  ;;  %5767 = vst [vmem:[#allocation89_spill] sm:$0xff] %v4210_v60  ;;  %v4214_v62 = vld [vmem:[#allocation12 + $0x1e8] sm:$0xff]  ;;  %v4216_v63 = vld [vmem:[#allocation12 + $0x1f0] sm:$0xff] }
 0x123   : > { %5768 = vst [vmem:[#allocation90_spill] sm:$0xff] %v4212_v61  ;;  %5769 = vst [vmem:[#allocation91_spill] sm:$0xff] %v4214_v62  ;;  %v4218_v0 = vld [vmem:[#allocation12 + $0x1f8] sm:$0xff]  ;;  %v4220_v54 = vld [vmem:[#allocation14] sm:$0xff] }
 0x124   : > { %5770 = vst [vmem:[#allocation92_spill] sm:$0xff] %v4216_v63  ;;  %5771 = vst [vmem:[#allocation93_spill] sm:$0xff] %v4218_v0  ;;  %v4222_v53 = vld [vmem:[#allocation14 + $0x8] sm:$0xff]  ;;  %v4224_v56 = vld [vmem:[#allocation14 + $0x10] sm:$0xff] }
 0x125   : > { %5772 = vst [vmem:[#allocation94_spill] sm:$0xff] %v4220_v54  ;;  %5773 = vst [vmem:[#allocation95_spill] sm:$0xff] %v4222_v53  ;;  %v4226_v57 = vld [vmem:[#allocation14 + $0x18] sm:$0xff]  ;;  %v4228_v58 = vld [vmem:[#allocation14 + $0x20] sm:$0xff] }
 0x126   : > { %v4230_v59 = vld [vmem:[#allocation14 + $0x28] sm:$0xff]  ;;  %v4232_v60 = vld [vmem:[#allocation14 + $0x30] sm:$0xff]  ;;  %v4234_v61 = vld [vmem:[#allocation14 + $0x38] sm:$0xff] }
 0x127   : > { %v4236_v62 = vld [vmem:[#allocation14 + $0x40] sm:$0xff]  ;;  %v4238_v63 = vld [vmem:[#allocation14 + $0x48] sm:$0xff]  ;;  %v4240_v0 = vld [vmem:[#allocation14 + $0x50] sm:$0xff] }
 0x128   : > { %5774 = vst [vmem:[#allocation96_spill] sm:$0xff] %v4240_v0  ;;  %v4242_v55 = vld [vmem:[#allocation14 + $0x58] sm:$0xff]  ;;  %v4244_v50 = vld [vmem:[#allocation14 + $0x60] sm:$0xff]  ;;  %v4246_v52 = vld [vmem:[#allocation14 + $0x68] sm:$0xff] }
 0x129   : > { %v4248_v49 = vld [vmem:[#allocation14 + $0x70] sm:$0xff]  ;;  %v4250_v51 = vld [vmem:[#allocation14 + $0x78] sm:$0xff]  ;;  %v4252_v46 = vld [vmem:[#allocation14 + $0x80] sm:$0xff] }
 0x12a   : > { %v4254_v48 = vld [vmem:[#allocation14 + $0x88] sm:$0xff]  ;;  %v4256_v45 = vld [vmem:[#allocation14 + $0x90] sm:$0xff]  ;;  %v4258_v47 = vld [vmem:[#allocation14 + $0x98] sm:$0xff] }
 0x12b   : > { %v4260_v42 = vld [vmem:[#allocation14 + $0xa0] sm:$0xff]  ;;  %v4262_v44 = vld [vmem:[#allocation14 + $0xa8] sm:$0xff]  ;;  %v4264_v41 = vld [vmem:[#allocation14 + $0xb0] sm:$0xff] }
 0x12c   : > { %v4266_v43 = vld [vmem:[#allocation14 + $0xb8] sm:$0xff]  ;;  %v4268_v38 = vld [vmem:[#allocation14 + $0xc0] sm:$0xff]  ;;  %v4270_v40 = vld [vmem:[#allocation14 + $0xc8] sm:$0xff] }
 0x12d   : > { %5775 = vst [vmem:[#allocation97_spill] sm:$0xff] %v4268_v38  ;;  %v4272_v37 = vld [vmem:[#allocation14 + $0xd0] sm:$0xff]  ;;  %v4274_v39 = vld [vmem:[#allocation14 + $0xd8] sm:$0xff]  ;;  %v4276_v34 = vld [vmem:[#allocation14 + $0xe0] sm:$0xff] }
 0x12e   : > { %5776 = vst [vmem:[#allocation98_spill] sm:$0xff] %v4272_v37  ;;  %5777 = vst [vmem:[#allocation99_spill] sm:$0xff] %v4276_v34  ;;  %v4278_v36 = vld [vmem:[#allocation14 + $0xe8] sm:$0xff]  ;;  %v4280_v33 = vld [vmem:[#allocation14 + $0xf0] sm:$0xff] }
 0x12f   : > { %5778 = vst [vmem:[#allocation100_spill] sm:$0xff] %v4280_v33  ;;  %v4282_v35 = vld [vmem:[#allocation14 + $0xf8] sm:$0xff]  ;;  %v4284_v30 = vld [vmem:[#allocation15] sm:$0xff]  ;;  %v4286_v32 = vld [vmem:[#allocation15 + $0x8] sm:$0xff] }
 0x130   : > { %5779 = vst [vmem:[#allocation101_spill] sm:$0xff] %v4284_v30  ;;  %5780 = vst [vmem:[#allocation102_spill] sm:$0xff] %v4286_v32  ;;  %v4288_v29 = vld [vmem:[#allocation15 + $0x10] sm:$0xff]  ;;  %v4290_v31 = vld [vmem:[#allocation15 + $0x18] sm:$0xff] }
 0x131   : > { %5781 = vst [vmem:[#allocation103_spill] sm:$0xff] %v4288_v29  ;;  %5782 = vst [vmem:[#allocation104_spill] sm:$0xff] %v4290_v31  ;;  %v4292_v26 = vld [vmem:[#allocation15 + $0x20] sm:$0xff]  ;;  %v4294_v28 = vld [vmem:[#allocation15 + $0x28] sm:$0xff] }
 0x132   : > { %5783 = vst [vmem:[#allocation105_spill] sm:$0xff] %v4292_v26  ;;  %5784 = vst [vmem:[#allocation106_spill] sm:$0xff] %v4294_v28  ;;  %v4296_v25 = vld [vmem:[#allocation15 + $0x30] sm:$0xff]  ;;  %v4298_v27 = vld [vmem:[#allocation15 + $0x38] sm:$0xff] }
 0x133   : > { %5785 = vst [vmem:[#allocation107_spill] sm:$0xff] %v4296_v25  ;;  %5786 = vst [vmem:[#allocation108_spill] sm:$0xff] %v4298_v27  ;;  %v4300_v22 = vld [vmem:[#allocation15 + $0x40] sm:$0xff]  ;;  %v4302_v24 = vld [vmem:[#allocation15 + $0x48] sm:$0xff] }
 0x134   : > { %5787 = vst [vmem:[#allocation109_spill] sm:$0xff] %v4300_v22  ;;  %5788 = vst [vmem:[#allocation110_spill] sm:$0xff] %v4302_v24  ;;  %v4304_v21 = vld [vmem:[#allocation15 + $0x50] sm:$0xff]  ;;  %v4306_v30 = vld [vmem:[#allocation15 + $0x58] sm:$0xff] }
 0x135   : > { %5789 = vst [vmem:[#allocation111_spill] sm:$0xff] %v4304_v21  ;;  %5790 = vst [vmem:[#allocation112_spill] sm:$0xff] %v4306_v30  ;;  %v4308_v32 = vld [vmem:[#allocation15 + $0x60] sm:$0xff]  ;;  %v4310_v29 = vld [vmem:[#allocation15 + $0x68] sm:$0xff] }
 0x136   : > { %5791 = vst [vmem:[#allocation113_spill] sm:$0xff] %v4308_v32  ;;  %5792 = vst [vmem:[#allocation114_spill] sm:$0xff] %v4310_v29  ;;  %v4312_v31 = vld [vmem:[#allocation15 + $0x70] sm:$0xff]  ;;  %v4314_v26 = vld [vmem:[#allocation15 + $0x78] sm:$0xff] }
 0x137   : > { %5793 = vst [vmem:[#allocation115_spill] sm:$0xff] %v4312_v31  ;;  %5794 = vst [vmem:[#allocation116_spill] sm:$0xff] %v4314_v26  ;;  %v4316_v28 = vld [vmem:[#allocation15 + $0x80] sm:$0xff]  ;;  %v4318_v25 = vld [vmem:[#allocation15 + $0x88] sm:$0xff] }
 0x138   : > { %5795 = vst [vmem:[#allocation117_spill] sm:$0xff] %v4316_v28  ;;  %5796 = vst [vmem:[#allocation118_spill] sm:$0xff] %v4318_v25  ;;  %v4320_v27 = vld [vmem:[#allocation15 + $0x90] sm:$0xff]  ;;  %v4322_v22 = vld [vmem:[#allocation15 + $0x98] sm:$0xff] }
 0x139   : > { %5797 = vst [vmem:[#allocation119_spill] sm:$0xff] %v4320_v27  ;;  %5798 = vst [vmem:[#allocation120_spill] sm:$0xff] %v4322_v22  ;;  %v4324_v24 = vld [vmem:[#allocation15 + $0xa0] sm:$0xff]  ;;  %v4326_v21 = vld [vmem:[#allocation15 + $0xa8] sm:$0xff] }
 0x13a   : > { %5799 = vst [vmem:[#allocation121_spill] sm:$0xff] %v4324_v24  ;;  %5800 = vst [vmem:[#allocation122_spill] sm:$0xff] %v4326_v21  ;;  %v4328_v30 = vld [vmem:[#allocation15 + $0xb0] sm:$0xff]  ;;  %v4330_v32 = vld [vmem:[#allocation15 + $0xb8] sm:$0xff] }
 0x13b   : > { %5801 = vst [vmem:[#allocation123_spill] sm:$0xff] %v4328_v30  ;;  %5802 = vst [vmem:[#allocation124_spill] sm:$0xff] %v4330_v32  ;;  %v4332_v29 = vld [vmem:[#allocation15 + $0xc0] sm:$0xff]  ;;  %v4334_v31 = vld [vmem:[#allocation15 + $0xc8] sm:$0xff] }
 0x13c   : > { %5803 = vst [vmem:[#allocation125_spill] sm:$0xff] %v4332_v29  ;;  %5804 = vst [vmem:[#allocation126_spill] sm:$0xff] %v4334_v31  ;;  %v4336_v26 = vld [vmem:[#allocation15 + $0xd0] sm:$0xff]  ;;  %v4338_v28 = vld [vmem:[#allocation15 + $0xd8] sm:$0xff] }
 0x13d   : > { %5805 = vst [vmem:[#allocation127_spill] sm:$0xff] %v4336_v26  ;;  %5806 = vst [vmem:[#allocation128_spill] sm:$0xff] %v4338_v28  ;;  %v4340_v25 = vld [vmem:[#allocation15 + $0xe0] sm:$0xff]  ;;  %v4342_v27 = vld [vmem:[#allocation15 + $0xe8] sm:$0xff] }
 0x13e   : > { %5807 = vst [vmem:[#allocation129_spill] sm:$0xff] %v4340_v25  ;;  %5808 = vst [vmem:[#allocation130_spill] sm:$0xff] %v4342_v27  ;;  %v4344_v22 = vld [vmem:[#allocation15 + $0xf0] sm:$0xff]  ;;  %v4346_v24 = vld [vmem:[#allocation15 + $0xf8] sm:$0xff] }
 0x13f   : > { %5809 = vst [vmem:[#allocation131_spill] sm:$0xff] %v4344_v22  ;;  %5810 = vst [vmem:[#allocation132_spill] sm:$0xff] %v4346_v24  ;;  %v4348_v21 = vld [vmem:[#allocation17] sm:$0xff]  ;;  %v4350_v30 = vld [vmem:[#allocation17 + $0x8] sm:$0xff] }
 0x140   : > { %5811 = vst [vmem:[#allocation133_spill] sm:$0xff] %v4348_v21  ;;  %5812 = vst [vmem:[#allocation134_spill] sm:$0xff] %v4350_v30  ;;  %v4352_v32 = vld [vmem:[#allocation17 + $0x10] sm:$0xff]  ;;  %v4354_v29 = vld [vmem:[#allocation17 + $0x18] sm:$0xff] }
 0x141   : > { %5813 = vst [vmem:[#allocation135_spill] sm:$0xff] %v4352_v32  ;;  %5814 = vst [vmem:[#allocation136_spill] sm:$0xff] %v4354_v29  ;;  %v4356_v31 = vld [vmem:[#allocation17 + $0x20] sm:$0xff]  ;;  %v4358_v26 = vld [vmem:[#allocation17 + $0x28] sm:$0xff] }
 0x142   : > { %5815 = vst [vmem:[#allocation137_spill] sm:$0xff] %v4356_v31  ;;  %5816 = vst [vmem:[#allocation138_spill] sm:$0xff] %v4358_v26  ;;  %v4360_v28 = vld [vmem:[#allocation17 + $0x30] sm:$0xff]  ;;  %v4362_v25 = vld [vmem:[#allocation17 + $0x38] sm:$0xff] }
 0x143   : > { %5817 = vst [vmem:[#allocation139_spill] sm:$0xff] %v4360_v28  ;;  %5818 = vst [vmem:[#allocation140_spill] sm:$0xff] %v4362_v25  ;;  %v4364_v27 = vld [vmem:[#allocation17 + $0x40] sm:$0xff]  ;;  %v4366_v22 = vld [vmem:[#allocation17 + $0x48] sm:$0xff] }
 0x144   : > { %5819 = vst [vmem:[#allocation141_spill] sm:$0xff] %v4364_v27  ;;  %5820 = vst [vmem:[#allocation142_spill] sm:$0xff] %v4366_v22  ;;  %v4368_v24 = vld [vmem:[#allocation17 + $0x50] sm:$0xff]  ;;  %v4370_v21 = vld [vmem:[#allocation17 + $0x58] sm:$0xff] }
 0x145   : > { %5821 = vst [vmem:[#allocation143_spill] sm:$0xff] %v4368_v24  ;;  %5822 = vst [vmem:[#allocation144_spill] sm:$0xff] %v4370_v21  ;;  %v4372_v30 = vld [vmem:[#allocation17 + $0x60] sm:$0xff]  ;;  %v4374_v32 = vld [vmem:[#allocation17 + $0x68] sm:$0xff] }
 0x146   : > { %5823 = vst [vmem:[#allocation145_spill] sm:$0xff] %v4372_v30  ;;  %5824 = vst [vmem:[#allocation146_spill] sm:$0xff] %v4374_v32  ;;  %v4376_v29 = vld [vmem:[#allocation17 + $0x70] sm:$0xff]  ;;  %v4378_v31 = vld [vmem:[#allocation17 + $0x78] sm:$0xff] }
 0x147   : > { %5825 = vst [vmem:[#allocation147_spill] sm:$0xff] %v4376_v29  ;;  %5826 = vst [vmem:[#allocation148_spill] sm:$0xff] %v4378_v31  ;;  %v4380_v26 = vld [vmem:[#allocation17 + $0x80] sm:$0xff]  ;;  %v4382_v28 = vld [vmem:[#allocation17 + $0x88] sm:$0xff] }
 0x148   : > { %5827 = vst [vmem:[#allocation149_spill] sm:$0xff] %v4380_v26  ;;  %5828 = vst [vmem:[#allocation150_spill] sm:$0xff] %v4382_v28  ;;  %v4384_v25 = vld [vmem:[#allocation17 + $0x90] sm:$0xff]  ;;  %v4386_v27 = vld [vmem:[#allocation17 + $0x98] sm:$0xff] }
 0x149   : > { %5829 = vst [vmem:[#allocation151_spill] sm:$0xff] %v4384_v25  ;;  %5830 = vst [vmem:[#allocation152_spill] sm:$0xff] %v4386_v27  ;;  %v4388_v22 = vld [vmem:[#allocation17 + $0xa0] sm:$0xff]  ;;  %v4390_v24 = vld [vmem:[#allocation17 + $0xa8] sm:$0xff] }
 0x14a   : > { %5831 = vst [vmem:[#allocation153_spill] sm:$0xff] %v4388_v22  ;;  %5832 = vst [vmem:[#allocation154_spill] sm:$0xff] %v4390_v24  ;;  %v4392_v21 = vld [vmem:[#allocation17 + $0xb0] sm:$0xff]  ;;  %v4394_v30 = vld [vmem:[#allocation17 + $0xb8] sm:$0xff] }
 0x14b   : > { %5833 = vst [vmem:[#allocation155_spill] sm:$0xff] %v4392_v21  ;;  %5834 = vst [vmem:[#allocation156_spill] sm:$0xff] %v4394_v30  ;;  %v4396_v32 = vld [vmem:[#allocation17 + $0xc0] sm:$0xff]  ;;  %v4398_v29 = vld [vmem:[#allocation17 + $0xc8] sm:$0xff] }
 0x14c   : > { %5835 = vst [vmem:[#allocation157_spill] sm:$0xff] %v4396_v32  ;;  %5836 = vst [vmem:[#allocation158_spill] sm:$0xff] %v4398_v29  ;;  %v4400_v31 = vld [vmem:[#allocation17 + $0xd0] sm:$0xff]  ;;  %v4402_v26 = vld [vmem:[#allocation17 + $0xd8] sm:$0xff] }
 0x14d   : > { %5837 = vst [vmem:[#allocation159_spill] sm:$0xff] %v4400_v31  ;;  %5838 = vst [vmem:[#allocation160_spill] sm:$0xff] %v4402_v26  ;;  %v4404_v28 = vld [vmem:[#allocation17 + $0xe0] sm:$0xff]  ;;  %v4406_v25 = vld [vmem:[#allocation17 + $0xe8] sm:$0xff] }
 0x14e   : > { %5839 = vst [vmem:[#allocation161_spill] sm:$0xff] %v4404_v28  ;;  %5840 = vst [vmem:[#allocation162_spill] sm:$0xff] %v4406_v25  ;;  %v4408_v27 = vld [vmem:[#allocation17 + $0xf0] sm:$0xff]  ;;  %v4410_v22 = vld [vmem:[#allocation17 + $0xf8] sm:$0xff] }
 0x14f   : > { %5841 = vst [vmem:[#allocation163_spill] sm:$0xff] %v4408_v27  ;;  %5842 = vst [vmem:[#allocation164_spill] sm:$0xff] %v4410_v22  ;;  %v4412_v24 = vld [vmem:[#allocation18] sm:$0xff]  ;;  %v4414_v21 = vld [vmem:[#allocation18 + $0x8] sm:$0xff] }
 0x150   : > { %5843 = vst [vmem:[#allocation165_spill] sm:$0xff] %v4412_v24  ;;  %5844 = vst [vmem:[#allocation166_spill] sm:$0xff] %v4414_v21  ;;  %v4416_v30 = vld [vmem:[#allocation18 + $0x10] sm:$0xff]  ;;  %v4418_v32 = vld [vmem:[#allocation18 + $0x18] sm:$0xff] }
 0x151   : > { %5845 = vst [vmem:[#allocation167_spill] sm:$0xff] %v4416_v30  ;;  %5846 = vst [vmem:[#allocation168_spill] sm:$0xff] %v4418_v32  ;;  %v4420_v29 = vld [vmem:[#allocation18 + $0x20] sm:$0xff]  ;;  %v4422_v31 = vld [vmem:[#allocation18 + $0x28] sm:$0xff] }
 0x152   : > { %5847 = vst [vmem:[#allocation169_spill] sm:$0xff] %v4420_v29  ;;  %5848 = vst [vmem:[#allocation170_spill] sm:$0xff] %v4422_v31  ;;  %v4424_v26 = vld [vmem:[#allocation18 + $0x30] sm:$0xff]  ;;  %v4426_v28 = vld [vmem:[#allocation18 + $0x38] sm:$0xff] }
 0x153   : > { %5849 = vst [vmem:[#allocation171_spill] sm:$0xff] %v4424_v26  ;;  %5850 = vst [vmem:[#allocation172_spill] sm:$0xff] %v4426_v28  ;;  %v4428_v25 = vld [vmem:[#allocation18 + $0x40] sm:$0xff]  ;;  %v4430_v27 = vld [vmem:[#allocation18 + $0x48] sm:$0xff] }
 0x154   : > { %5851 = vst [vmem:[#allocation173_spill] sm:$0xff] %v4428_v25  ;;  %5852 = vst [vmem:[#allocation174_spill] sm:$0xff] %v4430_v27  ;;  %v4432_v22 = vld [vmem:[#allocation18 + $0x50] sm:$0xff]  ;;  %v4434_v24 = vld [vmem:[#allocation18 + $0x58] sm:$0xff] }
 0x155   : > { %5853 = vst [vmem:[#allocation175_spill] sm:$0xff] %v4432_v22  ;;  %5854 = vst [vmem:[#allocation176_spill] sm:$0xff] %v4434_v24  ;;  %v4436_v21 = vld [vmem:[#allocation18 + $0x60] sm:$0xff]  ;;  %v4438_v30 = vld [vmem:[#allocation18 + $0x68] sm:$0xff] }
 0x156   : > { %5855 = vst [vmem:[#allocation177_spill] sm:$0xff] %v4436_v21  ;;  %5856 = vst [vmem:[#allocation178_spill] sm:$0xff] %v4438_v30  ;;  %v4440_v32 = vld [vmem:[#allocation18 + $0x70] sm:$0xff]  ;;  %v4442_v29 = vld [vmem:[#allocation18 + $0x78] sm:$0xff] }
 0x157   : > { %5857 = vst [vmem:[#allocation179_spill] sm:$0xff] %v4440_v32  ;;  %5858 = vst [vmem:[#allocation180_spill] sm:$0xff] %v4442_v29  ;;  %v4444_v31 = vld [vmem:[#allocation18 + $0x80] sm:$0xff]  ;;  %v4446_v26 = vld [vmem:[#allocation18 + $0x88] sm:$0xff] }
 0x158   : > { %5859 = vst [vmem:[#allocation181_spill] sm:$0xff] %v4444_v31  ;;  %5860 = vst [vmem:[#allocation182_spill] sm:$0xff] %v4446_v26  ;;  %v4448_v28 = vld [vmem:[#allocation18 + $0x90] sm:$0xff]  ;;  %v4450_v25 = vld [vmem:[#allocation18 + $0x98] sm:$0xff] }
 0x159   : > { %5861 = vst [vmem:[#allocation183_spill] sm:$0xff] %v4448_v28  ;;  %5862 = vst [vmem:[#allocation184_spill] sm:$0xff] %v4450_v25  ;;  %v4452_v27 = vld [vmem:[#allocation18 + $0xa0] sm:$0xff]  ;;  %v4454_v22 = vld [vmem:[#allocation18 + $0xa8] sm:$0xff] }
 0x15a   : > { %5863 = vst [vmem:[#allocation185_spill] sm:$0xff] %v4452_v27  ;;  %5864 = vst [vmem:[#allocation186_spill] sm:$0xff] %v4454_v22  ;;  %v4456_v24 = vld [vmem:[#allocation18 + $0xb0] sm:$0xff]  ;;  %v4458_v21 = vld [vmem:[#allocation18 + $0xb8] sm:$0xff] }
 0x15b   : > { %5865 = vst [vmem:[#allocation187_spill] sm:$0xff] %v4456_v24  ;;  %5866 = vst [vmem:[#allocation188_spill] sm:$0xff] %v4458_v21  ;;  %v4460_v30 = vld [vmem:[#allocation18 + $0xc0] sm:$0xff]  ;;  %v4462_v32 = vld [vmem:[#allocation18 + $0xc8] sm:$0xff] }
 0x15c   : > { %5867 = vst [vmem:[#allocation189_spill] sm:$0xff] %v4460_v30  ;;  %5868 = vst [vmem:[#allocation190_spill] sm:$0xff] %v4462_v32  ;;  %v4464_v29 = vld [vmem:[#allocation18 + $0xd0] sm:$0xff]  ;;  %v4466_v31 = vld [vmem:[#allocation18 + $0xd8] sm:$0xff] }
 0x15d   : > { %5869 = vst [vmem:[#allocation191_spill] sm:$0xff] %v4464_v29  ;;  %5870 = vst [vmem:[#allocation192_spill] sm:$0xff] %v4466_v31  ;;  %v4468_v26 = vld [vmem:[#allocation18 + $0xe0] sm:$0xff]  ;;  %v4470_v28 = vld [vmem:[#allocation18 + $0xe8] sm:$0xff] }
 0x15e   : > { %5871 = vst [vmem:[#allocation193_spill] sm:$0xff] %v4468_v26  ;;  %5872 = vst [vmem:[#allocation194_spill] sm:$0xff] %v4470_v28  ;;  %v4472_v25 = vld [vmem:[#allocation18 + $0xf0] sm:$0xff]  ;;  %v4474_v27 = vld [vmem:[#allocation18 + $0xf8] sm:$0xff] }
 0x15f   : > { %5873 = vst [vmem:[#allocation195_spill] sm:$0xff] %v4472_v25  ;;  %5874 = vst [vmem:[#allocation196_spill] sm:$0xff] %v4474_v27  ;;  %v4476_v22 = vld [vmem:[#allocation20] sm:$0xff]  ;;  %v4478_v24 = vld [vmem:[#allocation20 + $0x8] sm:$0xff] }
 0x160   : > { %5875 = vst [vmem:[#allocation197_spill] sm:$0xff] %v4476_v22  ;;  %5876 = vst [vmem:[#allocation198_spill] sm:$0xff] %v4478_v24  ;;  %v4480_v21 = vld [vmem:[#allocation20 + $0x10] sm:$0xff]  ;;  %v4482_v30 = vld [vmem:[#allocation20 + $0x18] sm:$0xff] }
 0x161   : > { %5877 = vst [vmem:[#allocation199_spill] sm:$0xff] %v4480_v21  ;;  %5878 = vst [vmem:[#allocation200_spill] sm:$0xff] %v4482_v30  ;;  %v4484_v32 = vld [vmem:[#allocation20 + $0x20] sm:$0xff]  ;;  %v4486_v29 = vld [vmem:[#allocation20 + $0x28] sm:$0xff] }
 0x162   : > { %5879 = vst [vmem:[#allocation201_spill] sm:$0xff] %v4484_v32  ;;  %5880 = vst [vmem:[#allocation202_spill] sm:$0xff] %v4486_v29  ;;  %v4488_v31 = vld [vmem:[#allocation20 + $0x30] sm:$0xff]  ;;  %v4490_v26 = vld [vmem:[#allocation20 + $0x38] sm:$0xff]  ;;  %v793_v32 = vlaneseq }
 0x163   : > { %5881 = vst [vmem:[#allocation203_spill] sm:$0xff] %v4488_v31  ;;  %5882 = vst [vmem:[#allocation204_spill] sm:$0xff] %v4490_v26  ;;  %v4492_v28 = vld [vmem:[#allocation20 + $0x40] sm:$0xff]  ;;  %v4494_v25 = vld [vmem:[#allocation20 + $0x48] sm:$0xff] }
 0x164   : > { %5883 = vst [vmem:[#allocation205_spill] sm:$0xff] %v4492_v28  ;;  %5884 = vst [vmem:[#allocation206_spill] sm:$0xff] %v4494_v25  ;;  %v4496_v27 = vld [vmem:[#allocation20 + $0x50] sm:$0xff]  ;;  %v4498_v22 = vld [vmem:[#allocation20 + $0x58] sm:$0xff] }
 0x165   : > { %5885 = vst [vmem:[#allocation207_spill] sm:$0xff] %v4496_v27  ;;  %5886 = vst [vmem:[#allocation208_spill] sm:$0xff] %v4498_v22  ;;  %v4500_v24 = vld [vmem:[#allocation20 + $0x60] sm:$0xff]  ;;  %v4502_v21 = vld [vmem:[#allocation20 + $0x68] sm:$0xff] }
 0x166   : > { %5887 = vst [vmem:[#allocation209_spill] sm:$0xff] %v4500_v24  ;;  %5888 = vst [vmem:[#allocation210_spill] sm:$0xff] %v4502_v21  ;;  %v4504_v30 = vld [vmem:[#allocation20 + $0x70] sm:$0xff]  ;;  %v4506_v29 = vld [vmem:[#allocation20 + $0x78] sm:$0xff] }
 0x167   : > { %5889 = vst [vmem:[#allocation211_spill] sm:$0xff] %v4504_v30  ;;  %5890 = vst [vmem:[#allocation212_spill] sm:$0xff] %v4506_v29  ;;  %v4508_v31 = vld [vmem:[#allocation20 + $0x80] sm:$0xff]  ;;  %v4510_v26 = vld [vmem:[#allocation20 + $0x88] sm:$0xff] }
 0x168   : > { %5891 = vst [vmem:[#allocation213_spill] sm:$0xff] %v4508_v31  ;;  %5892 = vst [vmem:[#allocation214_spill] sm:$0xff] %v4510_v26  ;;  %v4512_v28 = vld [vmem:[#allocation20 + $0x90] sm:$0xff]  ;;  %v4514_v25 = vld [vmem:[#allocation20 + $0x98] sm:$0xff]  ;;  %v794_v31 = vshrl.u32 %v793_v32, 7 }
 0x169   : > { %5893 = vst [vmem:[#allocation215_spill] sm:$0xff] %v4512_v28  ;;  %5894 = vst [vmem:[#allocation216_spill] sm:$0xff] %v4514_v25  ;;  %v4516_v27 = vld [vmem:[#allocation20 + $0xa0] sm:$0xff]  ;;  %v4518_v22 = vld [vmem:[#allocation20 + $0xa8] sm:$0xff] }
 0x16a   : > { %5895 = vst [vmem:[#allocation217_spill] sm:$0xff] %v4516_v27  ;;  %5896 = vst [vmem:[#allocation218_spill] sm:$0xff] %v4518_v22  ;;  %v4520_v24 = vld [vmem:[#allocation20 + $0xb0] sm:$0xff]  ;;  %v4522_v21 = vld [vmem:[#allocation20 + $0xb8] sm:$0xff] }
 0x16b   : > { %5897 = vst [vmem:[#allocation219_spill] sm:$0xff] %v4520_v24  ;;  %5898 = vst [vmem:[#allocation220_spill] sm:$0xff] %v4522_v21  ;;  %v4524_v30 = vld [vmem:[#allocation20 + $0xc0] sm:$0xff]  ;;  %v4526_v23 = vld [vmem:[#allocation20 + $0xc8] sm:$0xff] }
 0x16c   : > { %5899 = vst [vmem:[#allocation221_spill] sm:$0xff] %v4524_v30  ;;  %5900 = vst [vmem:[#allocation222_spill] sm:$0xff] %v4526_v23  ;;  %v4528_v29 = vld [vmem:[#allocation20 + $0xd0] sm:$0xff]  ;;  %v4530_v26 = vld [vmem:[#allocation20 + $0xd8] sm:$0xff] }
 0x16d   : > { %5901 = vst [vmem:[#allocation223_spill] sm:$0xff] %v4528_v29  ;;  %5902 = vst [vmem:[#allocation224_spill] sm:$0xff] %v4530_v26  ;;  %v4532_v28 = vld [vmem:[#allocation20 + $0xe0] sm:$0xff]  ;;  %v4534_v25 = vld [vmem:[#allocation20 + $0xe8] sm:$0xff] }
 0x16e   : > { %5903 = vst [vmem:[#allocation225_spill] sm:$0xff] %v4532_v28  ;;  %5904 = vst [vmem:[#allocation226_spill] sm:$0xff] %v4534_v25  ;;  %v4536_v27 = vld [vmem:[#allocation20 + $0xf0] sm:$0xff]  ;;  %v4538_v22 = vld [vmem:[#allocation20 + $0xf8] sm:$0xff]  ;;  %v4554_v28 = vsub.s32 0, %v794_v31 }
 0x16f   : > { %5905 = vst [vmem:[#allocation227_spill] sm:$0xff] %v4536_v27  ;;  %5906 = vst [vmem:[#allocation228_spill] sm:$0xff] %v4538_v22  ;;  %v4540_v24 = vld [vmem:[#allocation21] sm:$0xff]  ;;  %v4542_v21 = vld [vmem:[#allocation21 + $0x8] sm:$0xff] }
 0x170   : > { %5907 = vst [vmem:[#allocation229_spill] sm:$0xff] %v4540_v24  ;;  %5908 = vst [vmem:[#allocation230_spill] sm:$0xff] %v4542_v21  ;;  %v4544_v30 = vld [vmem:[#allocation21 + $0x10] sm:$0xff]  ;;  %v4546_v23 = vld [vmem:[#allocation21 + $0x18] sm:$0xff]  ;;  %v4562_v24 = vsub.s32 1, %v794_v31  ;;  %v4564_v21 = vsub.s32 2, %v794_v31 }
 0x171   : > { %5909 = vst [vmem:[#allocation231_spill] sm:$0xff] %v4544_v30  ;;  %5910 = vst [vmem:[#allocation232_spill] sm:$0xff] %v4546_v23  ;;  %v4548_v29 = vld [vmem:[#allocation21 + $0x20] sm:$0xff]  ;;  %v4550_v32 = vld [vmem:[#allocation21 + $0x28] sm:$0xff]  ;;  %v4566_v30 = vsub.s32 3, %v794_v31 }
 0x172   : > { %5911 = vst [vmem:[#allocation233_spill] sm:$0xff] %v4548_v29  ;;  %5912 = vst [vmem:[#allocation234_spill] sm:$0xff] %v4550_v32  ;;  %v4552_v26 = vld [vmem:[#allocation21 + $0x30] sm:$0xff]  ;;  %v4556_v25 = vld [vmem:[#allocation21 + $0x38] sm:$0xff] }
 0x173   : > { %5913 = vst [vmem:[#allocation235_spill] sm:$0xff] %v4552_v26  ;;  %5914 = vst [vmem:[#allocation236_spill] sm:$0xff] %v4556_v25  ;;  %v4558_v27 = vld [vmem:[#allocation21 + $0x40] sm:$0xff]  ;;  %v4560_v22 = vld [vmem:[#allocation21 + $0x48] sm:$0xff] }
 0x174   : > { %5915 = vst [vmem:[#allocation237_spill] sm:$0xff] %v4558_v27  ;;  %5916 = vst [vmem:[#allocation238_spill] sm:$0xff] %v4560_v22  ;;  %v4568_v23 = vld [vmem:[#allocation21 + $0x50] sm:$0xff]  ;;  %v4570_v29 = vld [vmem:[#allocation21 + $0x58] sm:$0xff] }
 0x175   : > { %5917 = vst [vmem:[#allocation239_spill] sm:$0xff] %v4568_v23  ;;  %5918 = vst [vmem:[#allocation240_spill] sm:$0xff] %v4570_v29  ;;  %v4572_v32 = vld [vmem:[#allocation21 + $0x60] sm:$0xff]  ;;  %v4574_v26 = vld [vmem:[#allocation21 + $0x68] sm:$0xff] }
 0x176   : > { %5919 = vst [vmem:[#allocation241_spill] sm:$0xff] %v4572_v32  ;;  %5920 = vst [vmem:[#allocation242_spill] sm:$0xff] %v4574_v26  ;;  %v4576_v18 = vld [vmem:[#allocation21 + $0x70] sm:$0xff]  ;;  %v4578_v25 = vld [vmem:[#allocation21 + $0x78] sm:$0xff] }
 0x177   : > { %5921 = vst [vmem:[#allocation243_spill] sm:$0xff] %v4576_v18  ;;  %5922 = vst [vmem:[#allocation244_spill] sm:$0xff] %v4578_v25  ;;  %v4583_v27 = vld [vmem:[%s5262_s3] sm:$0xf] }
 0x178   : > { %5923 = vst [vmem:[#allocation245_spill] sm:$0xff] %v4583_v27  ;;  %v4588_v31 = vld [vmem:[%s5924_s26] sm:$0xf] }
 0x179   : > { %v4593_v32 = vld [vmem:[%s5925_s17] sm:$0xf] }
 0x17a   : > { %v4606_v29 = vld [vmem:[%s5926_s19] sm:$0x3] }
 0x17b LB: >> { %v5927_v19 = vld [vmem:[#allocation48_spill] sm:$0xff]  ;;  %v5928_v17 = vld [vmem:[#allocation46_spill] sm:$0xff]  ;;  %v5929_v16 = vld [vmem:[#allocation45_spill] sm:$0xff]  ;;  %v2938_v27 = vcombine.high %v4228_v58, %v4232_v60  ;;  %v2940_v23 = vcombine.high %v4230_v59, %v4234_v61  ;;  %s4648_s15 = sadd.s32 %s3688_s11, %s550_s13  ;;  %v2937_v26 = vcombine.low %v4228_v58, %v4232_v60  ;;  %s3180_s17 = sshll.u32 %s3688_s11, 4  ;;  %s3688_s11 = sphi %s4628_s11, %s874_s11  }
 0x17c   : >> { %v5930_v15 = vld [vmem:[#allocation44_spill] sm:$0xff]  ;;  %v5931_v14 = vld [vmem:[#allocation43_spill] sm:$0xff]  ;;  %v5932_v13 = vld [vmem:[#allocation42_spill] sm:$0xff]  ;;  %s877_s20 = ssub.s32 0, %s4648_s15  ;;  %p876_p1 = scmp.lt.s32.totalorder %s4648_s15, 0 }
 0x17d   : >> { %v5933_v12 = vld [vmem:[#allocation41_spill] sm:$0xff]  ;;  %v5934_v11 = vld [vmem:[#allocation40_spill] sm:$0xff]  ;;  %v5935_v10 = vld [vmem:[#allocation39_spill] sm:$0xff]  ;;  %s2928_s29 = smin.u32 %s877_s20, %s4648_s15  ;;  %s4703_s18 = scalar_lea.vmem %s4065_s16, %s3180_s17 [#allocation9] }
 0x17e   : >> { %v5936_v9 = vld [vmem:[#allocation38_spill] sm:$0xff]  ;;  %v5937_v8 = vld [vmem:[#allocation37_spill] sm:$0xff]  ;;  %v5938_v7 = vld [vmem:[#allocation36_spill] sm:$0xff]  ;;  %3322 = sdivrem.u32 %s2928_s29, 10  ;;  %s2740_s19 = scalar_lea.vmem %s4087_s28, %s3180_s17 [#allocation23] }
 0x17f   : >> { %v5939_v6 = vld [vmem:[#allocation35_spill] sm:$0xff]  ;;  %v5940_v5 = vld [vmem:[#allocation34_spill] sm:$0xff]  ;;  %v5941_v4 = vld [vmem:[#allocation33_spill] sm:$0xff]  ;;  %s874_s11 = sadd.s32 1, %s3688_s11  }
 0x180   : >> { %v5942_v3 = vld [vmem:[#allocation32_spill] sm:$0xff]  ;;  %v5943_v2 = vld [vmem:[#allocation31_spill] sm:$0xff]  ;;  %v5944_v1 = vld [vmem:[#allocation30_spill] sm:$0xff]  ;;  %p871_p2 = scmp.ge.s32.totalorder %s874_s11, 10  }
 0x181   : >> { %v5945_v34 = vld [vmem:[#allocation99_spill] sm:$0xff]  ;;  %v5946_v33 = vld [vmem:[#allocation100_spill] sm:$0xff]  ;;  %v5947_v38 = vld [vmem:[#allocation97_spill] sm:$0xff]  ;;  %s3185_s15 = smul.u32 (%p871_p2), 2560, %s3793_s27  ;;  %s2758_s20 = sshll.u32 (%p871_p2), %s4087_s28, 4  ;;  %s5215_s20 = int_to_ptr.vmem [resolvable:$true] %s2758_s20 }
 0x182   : >> { %v5948_v37 = vld [vmem:[#allocation98_spill] sm:$0xff]  ;;  %v5949_v0 = vld [vmem:[#allocation96_spill] sm:$0xff]  ;;  %v5951_v53 = vld [vmem:[#allocation95_spill] sm:$0xff]  ;;  %s2744_s17 = scalar_lea.sflag (%p871_p2), [#allocation11], %s4061_s6  ;;  %p6161_p7 = scmp.ne.s32.totalorder (%p871_p2), %s5693_s12, 0 }
 0x183   : >> { %v5950_v54 = vld [vmem:[#allocation94_spill] sm:$0xff]  ;;  %v2936_v22 = vcombine.high %v5951_v53, %v4226_v57  ;;  %v2935_v25 = vcombine.low %v5951_v53, %v4226_v57  ;;  %v2939_v53 = vcombine.low %v4230_v59, %v4234_v61  ;;  %s3704_s16 = smov (%p871_p2), [#allocation23]  }
 0x184   : >> { %v2934_v20 = vcombine.high %v5950_v54, %v4224_v56  ;;  %v2933_v18 = vcombine.low %v5950_v54, %v4224_v56  ;;  %v5472_v54 = vmov 0   ;;  %s3602_s13 = sshll.u32 (%p871_p2), %s3704_s16, 4  ;;  %s3603_s13 = int_to_ptr.vmem [resolvable:$false] %s3602_s13 }
 0x185   : >> { %1109 = vmatprep.subr.bf16.mxu1 %v2936_v22  ;;  %v2944_v22 = vcombine.high %v4238_v63, %v4242_v55  ;;  %1100 = vmatprep.mubr.bf16.mxu0 %v5472_v54  ;;  %s3604_s27 = scalar_lea.vmem (%p871_p2), %s3603_s13, 5120  ;;  %p3605_p4 = scmp.lt.s32.totalorder (%p871_p2), %s5215_s20, %s3603_s13 }
 0x186   : >> { %1068 = vmatprep.subr.bf16.mxu0 %v2934_v20  ;;  %1110 = vmatpush1.bf16.msra.mxu1 %v2935_v25  ;;  %v2942_v20 = vcombine.high %v4236_v62, %v5949_v0  ;;  %v2946_v25 = vcombine.high %v4244_v50, %v4248_v49 }
 0x187   : >> { %1069 = vmatpush1.bf16.msra.mxu0 %v2933_v18  ;;  %1111 = vmatprep.subr.bf16.mxu1 %v2940_v23  ;;  %v2941_v18 = vcombine.low %v4236_v62, %v5949_v0  ;;  %v2943_v23 = vcombine.low %v4238_v63, %v4242_v55  ;;  %s3323_s26 = spop.drf %3322  ;;  %v894_v0 = vld [vmem:[%s4703_s18 + $0x8] sm:$0xff] }
 0x188   : >> { %1070 = vmatprep.subr.bf16.mxu0 %v2938_v27  ;;  %1141 = vmatprep.mubr.bf16.mxu1 %v5472_v54  ;;  %v2948_v27 = vcombine.high %v4246_v52, %v4250_v51  ;;  %s881_s1 = ssub.s32 0, %s3323_s26  ;;  %v902_v54 = vld [vmem:[#allocation2] sm:$0xff] }
 0x189   : >> { %s6169_s1 = smov (!%p876_p1, %s881_s1), %s3323_s26 }
 0x18a   : >> { %1112 = vmatpush1.bf16.msra.mxu1 %v2939_v53  ;;  %v2947_v53 = vcombine.low %v4246_v52, %v4250_v51  ;;  %p2930_p13 = scmp.lt.s32.totalorder %s6169_s1, 0  ;;  %s887_s2 = sadd.s32 10, %s6169_s1 }
 0x18b   : >> { %1071 = vmatpush1.bf16.msra.mxu0 %v2937_v26  ;;  %1113 = vmatprep.subr.bf16.mxu1 %v2944_v22  ;;  %v2945_v26 = vcombine.low %v4244_v50, %v4248_v49  ;;  %v2952_v22 = vcombine.high %v4254_v48, %v4258_v47 }
 0x18c   : >> { %1072 = vmatprep.subr.bf16.mxu0 %v2942_v20  ;;  %v2950_v20 = vcombine.high %v4252_v46, %v4256_v45  ;;  %s6171_s2 = smov (!%p2930_p13, %s887_s2), %s6169_s1  ;;  %s6160_s1 = sld [smem:[#allocation251_spill]] (%p871_p2) }
 0x18d   : >> { %p889_p0 = scmp.lt.s32.totalorder %s6171_s2, 5 }
 0x18e   : >> { %1114 = vmatpush1.bf16.msra.mxu1 %v2943_v23  ;;  %v2951_v23 = vcombine.low %v4254_v48, %v4258_v47 }
 0x18f   : >> { %1073 = vmatpush1.bf16.msra.mxu0 %v2941_v18  ;;  %1115 = vmatprep.subr.bf16.mxu1 %v2948_v27  ;;  %v2949_v18 = vcombine.low %v4252_v46, %v4256_v45  ;;  %v2956_v27 = vcombine.high %v4262_v44, %v4266_v43  ;;  %s897_s25 = scalar_select %p889_p0, 1, 0 }
 0x190   : >> { %1074 = vmatprep.subr.bf16.mxu0 %v2946_v25  ;;  %v2954_v25 = vcombine.high %v4260_v42, %v4264_v41 }
 0x192   : >> { %1116 = vmatpush1.bf16.msra.mxu1 %v2947_v53  ;;  %v2955_v53 = vcombine.low %v4262_v44, %v4266_v43  ;;  %s5213_s2 = scalar_lea.hbm (%p871_p2), %s6160_s1, %s3185_s15 }
 0x193   : >> { %1075 = vmatpush1.bf16.msra.mxu0 %v2945_v26  ;;  %1117 = vmatprep.subr.bf16.mxu1 %v2952_v22  ;;  %v2953_v26 = vcombine.low %v4260_v42, %v4264_v41  ;;  %v2960_v22 = vcombine.high %v4270_v40, %v4274_v39 }
 0x194   : >> { %1076 = vmatprep.subr.bf16.mxu0 %v2950_v20  ;;  %v2958_v20 = vcombine.high %v5947_v38, %v5948_v37 }
 0x196   : >> { %1118 = vmatpush1.bf16.msra.mxu1 %v2951_v23  ;;  %v2959_v23 = vcombine.low %v4270_v40, %v4274_v39 }
 0x197   : >> { %1077 = vmatpush1.bf16.msra.mxu0 %v2949_v18  ;;  %1119 = vmatprep.subr.bf16.mxu1 %v2956_v27  ;;  %v2957_v18 = vcombine.low %v5947_v38, %v5948_v37  ;;  %v2964_v27 = vcombine.high %v4278_v36, %v4282_v35  ;;  %v896_v37 = vld [vmem:[#allocation8 + $0x8] sm:$0xff]  ;;  %v2968_v38 = vcombine.high %v5943_v2, %v5941_v4 }
 0x198   : >> { %1078 = vmatprep.subr.bf16.mxu0 %v2954_v25  ;;  %v2962_v25 = vcombine.high %v5945_v34, %v5946_v33 }
 0x19a   : >> { %1120 = vmatpush1.bf16.msra.mxu1 %v2955_v53  ;;  %v2963_v53 = vcombine.low %v4278_v36, %v4282_v35 }
 0x19b   : >> { %1079 = vmatpush1.bf16.msra.mxu0 %v2953_v26  ;;  %1121 = vmatprep.subr.bf16.mxu1 %v2960_v22  ;;  %v2961_v26 = vcombine.low %v5945_v34, %v5946_v33  ;;  %v2966_v22 = vcombine.high %v5944_v1, %v5942_v3 }
 0x19c   : >> { %1080 = vmatprep.subr.bf16.mxu0 %v2958_v20  ;;  %v898_v20 = vstv %s897_s25 }
 0x19d   : >> { %vm4718_vm0 = vcmp.eq.s32.totalorder %v898_v20, 1  ;;  %v2970_v20 = vcombine.high %v5940_v5, %v5938_v7 }
 0x19e   : >> { %1122 = vmatpush1.bf16.msra.mxu1 %v2959_v23  ;;  %v4722_v23 = vpack.c.bf16 %v902_v54, %v902_v54  ;;  %v901_v33 = vsel %vm4718_vm0, %v894_v0, %v896_v37  ;;  %v2972_v54 = vcombine.high %v5939_v6, %v5937_v8  ;;  %v2969_v37 = vcombine.low %v5940_v5, %v5938_v7  ;;  %v5963_v5 = vld [vmem:[#allocation55_spill] sm:$0xff]  ;;  %v5964_v7 = vld [vmem:[#allocation60_spill] sm:$0xff] }
 0x19f   : >> { %1081 = vmatpush1.bf16.msra.mxu0 %v2957_v18  ;;  %1123 = vmatprep.subr.bf16.mxu1 %v2964_v27  ;;  %v2967_v27 = vcombine.low %v5943_v2, %v5941_v4  ;;  %v906_v34 = vpack.c.bf16 %v901_v33, %v901_v33  ;;  %v2971_v0 = vcombine.low %v5939_v6, %v5937_v8  ;;  %v5961_v4 = vld [vmem:[#allocation54_spill] sm:$0xff]  ;;  %v5967_v8 = vld [vmem:[#allocation59_spill] sm:$0xff] }
 0x1a0   : >> { %1082 = vmatprep.subr.bf16.mxu0 %v2962_v25  ;;  %v2965_v25 = vcombine.low %v5944_v1, %v5942_v3  ;;  %v2976_v33 = vcombine.high %v5935_v10, %v5933_v12  ;;  %v5959_v1 = vld [vmem:[#allocation51_spill] sm:$0xff]  ;;  %v5960_v3 = vld [vmem:[#allocation56_spill] sm:$0xff] }
 0x1a2   : >> { %1124 = vmatpush1.bf16.msra.mxu1 %v2963_v53  ;;  %v2975_v53 = vcombine.low %v5935_v10, %v5933_v12  ;;  %v893_v10 = vld [vmem:[%s4703_s18] sm:$0xff]  ;;  %s3598_s18 = scalar_lea.vmem (%p871_p2), %s5215_s20, 2560 }
 0x1a3   : >> { %1083 = vmatpush1.bf16.msra.mxu0 %v2961_v26  ;;  %1511 = vmatprep.subr.bf16.mxu1 %v2968_v38  ;;  %v2974_v38 = vcombine.high %v5936_v9, %v5934_v11  ;;  %v2973_v26 = vcombine.low %v5936_v9, %v5934_v11  ;;  %v895_v11 = vld [vmem:[#allocation8] sm:$0xff]  ;;  %p3599_p9 = scmp.ne.s32.totalorder (%p871_p2), %s5215_s20, %s3598_s18  ;;  %p3606_p6 = scmp.lt.s32.totalorder (%p871_p2), %s3604_s27, %s3598_s18 }
 0x1a4   : >> { %1470 = vmatprep.subr.bf16.mxu0 %v2966_v22  ;;  %v2978_v22 = vcombine.high %v5932_v13, %v5930_v15 }
 0x1a5   : >> { %1142 = vmatmul.mubr.bf16.vlgmr.msra.gmra.mrb[0].mxu1 %v4722_v23  ;;  %p3600_p5 = pnand (%p871_p2), %p3599_p9, %p6161_p7  ;;  %p3607_p10 = por (%p871_p2), %p3606_p6, %p3605_p4 }
 0x1a6   : >> { %1101 = vmatmul.mubr.bf16.vlgmr.msra.gmra.mrb[0].mxu0 %v4722_v23  ;;  %1512 = vmatpush1.bf16.msra.mxu1 %v2967_v27  ;;  %v2979_v27 = vcombine.low %v5931_v14, %v5929_v16 }
 0x1a7   : >> { %1471 = vmatpush1.bf16.msra.mxu0 %v2965_v25  ;;  %1513 = vmatprep.subr.bf16.mxu1 %v2972_v54  ;;  %v2980_v25 = vcombine.high %v5931_v14, %v5929_v16  ;;  %v5954_v54 = vld [vmem:[#allocation49_spill] sm:$0xff]  ;;  %p3601_p11 = pneg (%p871_p2), %p3600_p5 }
 0x1a8   : >> { %1472 = vmatprep.subr.bf16.mxu0 %v2970_v20  ;;  %1502 = vmatprep.mubr.bf16.mxu0 %v906_v34  ;;  %v2982_v20 = vcombine.high %v5928_v17, %v5927_v19 }
 0x1a9   : >> { %1543 = vmatprep.mubr.bf16.mxu1 %v906_v34  ;;  %v2977_v34 = vcombine.low %v5932_v13, %v5930_v15  ;;  %v900_v13 = vsel %vm4718_vm0, %v893_v10, %v895_v11  ;;  %p3608_p8 = pnand (%p871_p2), %p3607_p10, %p3601_p11 }
 0x1aa   : >> { %1514 = vmatpush1.bf16.msra.mxu1 %v2971_v0 }
 0x1ab   : >> { %1473 = vmatpush1.bf16.msra.mxu0 %v2969_v37  ;;  %1515 = vmatprep.subr.bf16.mxu1 %v2976_v33  ;;  %v5955_v37 = vld [vmem:[#allocation47_spill] sm:$0xff] }
 0x1ac   : >> { %1474 = vmatprep.subr.bf16.mxu0 %v2974_v38  ;;  %v2984_v0 = vcombine.high %v5955_v37, %v5954_v54  ;;  %v2981_v38 = vcombine.low %v5928_v17, %v5927_v19  ;;  %v2983_v33 = vcombine.low %v5955_v37, %v5954_v54 }
 0x1ae   : >> { %1516 = vmatpush1.bf16.msra.mxu1 %v2975_v53  ;;  %v5957_v53 = vld [vmem:[#allocation50_spill] sm:$0xff] }
 0x1af   : >> { %1475 = vmatpush1.bf16.msra.mxu0 %v2973_v26  ;;  %1517 = vmatprep.subr.bf16.mxu1 %v2980_v25  ;;  %v5956_v26 = vld [vmem:[#allocation52_spill] sm:$0xff]  ;;  %v5958_v25 = vld [vmem:[#allocation53_spill] sm:$0xff] }
 0x1b0   : >> { %1476 = vmatprep.subr.bf16.mxu0 %v2978_v22  ;;  %v2986_v22 = vcombine.high %v5957_v53, %v5956_v26  ;;  %v2988_v2 = vcombine.high %v5959_v1, %v5958_v25 }
 0x1b2   : >> { %1518 = vmatpush1.bf16.msra.mxu1 %v2979_v27  ;;  %v2987_v27 = vcombine.low %v5959_v1, %v5958_v25  ;;  %v5965_v1 = vld [vmem:[#allocation58_spill] sm:$0xff] }
 0x1b3   : >> { %1477 = vmatpush1.bf16.msra.mxu0 %v2977_v34  ;;  %1519 = vmatprep.subr.bf16.mxu1 %v2984_v0  ;;  %v2985_v34 = vcombine.low %v5957_v53, %v5956_v26  ;;  %v5962_v0 = vld [vmem:[#allocation57_spill] sm:$0xff] }
 0x1b4   : >> { %1478 = vmatprep.subr.bf16.mxu0 %v2982_v20  ;;  %v2990_v20 = vcombine.high %v5961_v4, %v5960_v3  ;;  %v2992_v6 = vcombine.high %v5963_v5, %v5962_v0 }
 0x1b6   : >> { %1520 = vmatpush1.bf16.msra.mxu1 %v2983_v33  ;;  %v2991_v33 = vcombine.low %v5963_v5, %v5962_v0  ;;  %v5969_v0 = vld [vmem:[#allocation62_spill] sm:$0xff] }
 0x1b7   : >> { %1479 = vmatpush1.bf16.msra.mxu0 %v2981_v38  ;;  %1521 = vmatprep.subr.bf16.mxu1 %v2988_v2  ;;  %v2989_v38 = vcombine.low %v5961_v4, %v5960_v3  ;;  %v5966_v2 = vld [vmem:[#allocation61_spill] sm:$0xff]  ;;  %v5968_v3 = vld [vmem:[#allocation64_spill] sm:$0xff]  ;;  %v5971_v4 = vld [vmem:[#allocation63_spill] sm:$0xff] }
 0x1b8   : >> { %1480 = vmatprep.subr.bf16.mxu0 %v2986_v22  ;;  %v2994_v22 = vcombine.high %v5965_v1, %v5964_v7  ;;  %v2996_v9 = vcombine.high %v5967_v8, %v5966_v2 }
 0x1ba   : >> { %1522 = vmatpush1.bf16.msra.mxu1 %v2987_v27  ;;  %v2995_v27 = vcombine.low %v5967_v8, %v5966_v2  ;;  %v5973_v2 = vld [vmem:[#allocation66_spill] sm:$0xff] }
 0x1bb   : >> { %1481 = vmatpush1.bf16.msra.mxu0 %v2985_v34  ;;  %1523 = vmatprep.subr.bf16.mxu1 %v2992_v6  ;;  %v2993_v34 = vcombine.low %v5965_v1, %v5964_v7  ;;  %v5970_v6 = vld [vmem:[#allocation65_spill] sm:$0xff]  ;;  %v5972_v1 = vld [vmem:[#allocation68_spill] sm:$0xff]  ;;  %v5975_v7 = vld [vmem:[#allocation67_spill] sm:$0xff] }
 0x1bc   : >> { %1482 = vmatprep.subr.bf16.mxu0 %v2990_v20  ;;  %v2998_v20 = vcombine.high %v5969_v0, %v5968_v3  ;;  %v3000_v5 = vcombine.high %v5971_v4, %v5970_v6 }
 0x1be   : >> { %1524 = vmatpush1.bf16.msra.mxu1 %v2991_v33  ;;  %v2999_v33 = vcombine.low %v5971_v4, %v5970_v6  ;;  %v5979_v4 = vld [vmem:[#allocation71_spill] sm:$0xff] }
 0x1bf   : >> { %1483 = vmatpush1.bf16.msra.mxu0 %v2989_v38  ;;  %1525 = vmatprep.subr.bf16.mxu1 %v2996_v9  ;;  %v2997_v38 = vcombine.low %v5969_v0, %v5968_v3  ;;  %v5974_v9 = vld [vmem:[#allocation69_spill] sm:$0xff]  ;;  %v5976_v0 = vld [vmem:[#allocation72_spill] sm:$0xff]  ;;  %v5977_v3 = vld [vmem:[#allocation70_spill] sm:$0xff] }
 0x1c0   : >> { %1484 = vmatprep.subr.bf16.mxu0 %v2994_v22  ;;  %v3002_v22 = vcombine.high %v5973_v2, %v5972_v1  ;;  %v3004_v8 = vcombine.high %v5975_v7, %v5974_v9 }
 0x1c2   : >> { %1526 = vmatpush1.bf16.msra.mxu1 %v2995_v27  ;;  %v3003_v27 = vcombine.low %v5975_v7, %v5974_v9  ;;  %v5983_v7 = vld [vmem:[#allocation75_spill] sm:$0xff] }
 0x1c3   : >> { %1485 = vmatpush1.bf16.msra.mxu0 %v2993_v34  ;;  %1527 = vmatprep.subr.bf16.mxu1 %v3000_v5  ;;  %v3001_v34 = vcombine.low %v5973_v2, %v5972_v1  ;;  %v5978_v5 = vld [vmem:[#allocation73_spill] sm:$0xff]  ;;  %v5980_v1 = vld [vmem:[#allocation76_spill] sm:$0xff]  ;;  %v5981_v2 = vld [vmem:[#allocation74_spill] sm:$0xff] }
 0x1c4   : >> { %1486 = vmatprep.subr.bf16.mxu0 %v2998_v20  ;;  %v3006_v20 = vcombine.high %v5977_v3, %v5976_v0  ;;  %v3008_v6 = vcombine.high %v5979_v4, %v5978_v5 }
 0x1c6   : >> { %1528 = vmatpush1.bf16.msra.mxu1 %v2999_v33  ;;  %v3007_v33 = vcombine.low %v5979_v4, %v5978_v5  ;;  %v5987_v4 = vld [vmem:[#allocation79_spill] sm:$0xff] }
 0x1c7   : >> { %1487 = vmatpush1.bf16.msra.mxu0 %v2997_v38  ;;  %1529 = vmatprep.subr.bf16.mxu1 %v3004_v8  ;;  %v3005_v38 = vcombine.low %v5977_v3, %v5976_v0  ;;  %v5982_v8 = vld [vmem:[#allocation77_spill] sm:$0xff]  ;;  %v5984_v0 = vld [vmem:[#allocation80_spill] sm:$0xff]  ;;  %v5985_v3 = vld [vmem:[#allocation78_spill] sm:$0xff] }
 0x1c8   : >> { %1488 = vmatprep.subr.bf16.mxu0 %v3002_v22  ;;  %v3010_v22 = vcombine.high %v5981_v2, %v5980_v1  ;;  %v3012_v9 = vcombine.high %v5983_v7, %v5982_v8 }
 0x1ca   : >> { %1530 = vmatpush1.bf16.msra.mxu1 %v3003_v27  ;;  %v3011_v27 = vcombine.low %v5983_v7, %v5982_v8  ;;  %v5991_v7 = vld [vmem:[#allocation83_spill] sm:$0xff] }
 0x1cb   : >> { %1489 = vmatpush1.bf16.msra.mxu0 %v3001_v34  ;;  %1531 = vmatprep.subr.bf16.mxu1 %v3008_v6  ;;  %v3009_v34 = vcombine.low %v5981_v2, %v5980_v1  ;;  %v5986_v6 = vld [vmem:[#allocation81_spill] sm:$0xff]  ;;  %v5988_v1 = vld [vmem:[#allocation84_spill] sm:$0xff]  ;;  %v5989_v2 = vld [vmem:[#allocation82_spill] sm:$0xff] }
 0x1cc   : >> { %1490 = vmatprep.subr.bf16.mxu0 %v3006_v20  ;;  %v3014_v20 = vcombine.high %v5985_v3, %v5984_v0  ;;  %v3016_v5 = vcombine.high %v5987_v4, %v5986_v6 }
 0x1ce   : >> { %1532 = vmatpush1.bf16.msra.mxu1 %v3007_v33  ;;  %v3015_v33 = vcombine.low %v5987_v4, %v5986_v6  ;;  %v5995_v4 = vld [vmem:[#allocation87_spill] sm:$0xff] }
 0x1cf   : >> { %1491 = vmatpush1.bf16.msra.mxu0 %v3005_v38  ;;  %1533 = vmatprep.subr.bf16.mxu1 %v3012_v9  ;;  %v3013_v38 = vcombine.low %v5985_v3, %v5984_v0  ;;  %v5990_v9 = vld [vmem:[#allocation85_spill] sm:$0xff]  ;;  %v5992_v0 = vld [vmem:[#allocation88_spill] sm:$0xff] }
 0x1d0   : >> { %1492 = vmatprep.subr.bf16.mxu0 %v3010_v22  ;;  %v3018_v22 = vcombine.high %v5989_v2, %v5988_v1  ;;  %v3020_v8 = vcombine.high %v5991_v7, %v5990_v9  ;;  %v5994_v3 = vld [vmem:[#allocation89_spill] sm:$0xff] }
 0x1d1   : >> { %v3024_v6 = vcombine.high %v5995_v4, %v5994_v3 }
 0x1d2   : >> { %1534 = vmatpush1.bf16.msra.mxu1 %v3011_v27  ;;  %v3019_v27 = vcombine.low %v5991_v7, %v5990_v9  ;;  %v5999_v7 = vld [vmem:[#allocation91_spill] sm:$0xff] }
 0x1d3   : >> { %1493 = vmatpush1.bf16.msra.mxu0 %v3009_v34  ;;  %1535 = vmatprep.subr.bf16.mxu1 %v3016_v5  ;;  %v3017_v34 = vcombine.low %v5989_v2, %v5988_v1  ;;  %v5996_v1 = vld [vmem:[#allocation92_spill] sm:$0xff]  ;;  %v5997_v2 = vld [vmem:[#allocation90_spill] sm:$0xff] }
 0x1d4   : >> { %1494 = vmatprep.subr.bf16.mxu0 %v3014_v20  ;;  %v5993_v20 = vld [vmem:[#allocation86_spill] sm:$0xff] }
 0x1d5   : >> { %v3022_v5 = vcombine.high %v5993_v20, %v5992_v0 }
 0x1d6   : >> { %1536 = vmatpush1.bf16.msra.mxu1 %v3015_v33  ;;  %v3023_v33 = vcombine.low %v5995_v4, %v5994_v3  ;;  %v6002_v3 = vld [vmem:[#allocation136_spill] sm:$0xff]  ;;  %v6003_v4 = vld [vmem:[#allocation134_spill] sm:$0xff] }
 0x1d7   : >> { %1495 = vmatpush1.bf16.msra.mxu0 %v3013_v38  ;;  %1537 = vmatprep.subr.bf16.mxu1 %v3020_v8  ;;  %v3021_v38 = vcombine.low %v5993_v20, %v5992_v0  ;;  %v5998_v8 = vld [vmem:[#allocation93_spill] sm:$0xff]  ;;  %v3032_v12 = vcombine.high %v6003_v4, %v6002_v3 }
 0x1d8   : >> { %1496 = vmatprep.subr.bf16.mxu0 %v3018_v22  ;;  %v3026_v22 = vcombine.high %v5997_v2, %v5996_v1  ;;  %v3028_v9 = vcombine.high %v5999_v7, %v5998_v8 }
 0x1da   : >> { %1538 = vmatpush1.bf16.msra.mxu1 %v3019_v27  ;;  %v3027_v27 = vcombine.low %v5999_v7, %v5998_v8  ;;  %v6006_v7 = vld [vmem:[#allocation140_spill] sm:$0xff]  ;;  %v6007_v8 = vld [vmem:[#allocation138_spill] sm:$0xff] }
 0x1db   : >> { %1497 = vmatpush1.bf16.msra.mxu0 %v3017_v34  ;;  %1539 = vmatprep.subr.bf16.mxu1 %v3024_v6  ;;  %v3025_v34 = vcombine.low %v5997_v2, %v5996_v1  ;;  %v6001_v6 = vld [vmem:[#allocation133_spill] sm:$0xff]  ;;  %v905_v1 = vpack.c.bf16 %v900_v13, %v900_v13  ;;  %v3036_v14 = vcombine.high %v6007_v8, %v6006_v7  ;;  %v6008_v13 = vld [vmem:[#allocation143_spill] sm:$0xff] }
 0x1dc   : >> { %1498 = vmatprep.subr.bf16.mxu0 %v3022_v5  ;;  %v6000_v5 = vld [vmem:[#allocation135_spill] sm:$0xff]  ;;  %v3035_v11 = vcombine.low %v6007_v8, %v6006_v7  ;;  %v6020_v8 = vld [vmem:[#allocation150_spill] sm:$0xff] }
 0x1dd   : >> { %v3030_v0 = vcombine.high %v6001_v6, %v6000_v5  ;;  %v6017_v7 = vld [vmem:[#allocation151_spill] sm:$0xff] }
 0x1de   : >> { %1540 = vmatpush1.bf16.msra.mxu1 %v3023_v33  ;;  %v3031_v33 = vcombine.low %v6003_v4, %v6002_v3  ;;  %v6012_v3 = vmov 0   ;;  %v6015_v4 = vld [vmem:[#allocation148_spill] sm:$0xff] }
 0x1df   : >> { %1499 = vmatpush1.bf16.msra.mxu0 %v3021_v38  ;;  %1541 = vmatprep.subr.bf16.mxu1 %v3028_v9  ;;  %v3029_v38 = vcombine.low %v6001_v6, %v6000_v5  ;;  %v6004_v9 = vld [vmem:[#allocation139_spill] sm:$0xff]  ;;  %v6016_v5 = vld [vmem:[#allocation146_spill] sm:$0xff] }
 0x1e0   : >> { %1500 = vmatprep.subr.bf16.mxu0 %v3026_v22  ;;  %v6005_v22 = vld [vmem:[#allocation137_spill] sm:$0xff]  ;;  %v3044_v6 = vcombine.high %v6016_v5, %v6015_v4 }
 0x1e1   : >> { %v3034_v2 = vcombine.high %v6005_v22, %v6004_v9  ;;  %v3033_v10 = vcombine.low %v6005_v22, %v6004_v9 }
 0x1e2   : >> { %1542 = vmatpush1.bf16.msra.mxu1 %v3027_v27 }
 0x1e3   : >> { %1501 = vmatpush1.bf16.msra.mxu0 %v3025_v34  ;;  %1758 = vmatprep.subr.bf16.mxu1 %v3032_v12  ;;  %v6009_v12 = vld [vmem:[#allocation141_spill] sm:$0xff]  ;;  %v6011_v34 = vld [vmem:[#allocation142_spill] sm:$0xff] }
 0x1e4   : >> { %1717 = vmatprep.subr.bf16.mxu0 %v3030_v0  ;;  %v3038_v18 = vcombine.high %v6009_v12, %v6008_v13  ;;  %v6010_v0 = vld [vmem:[#allocation144_spill] sm:$0xff] }
 0x1e5   : >> { %1544 = vmatmul.mubr.bf16.vlgmr.msra.gmra.mrb[4].mxu1 %v905_v1  ;;  %v3040_v27 = vcombine.high %v6011_v34, %v6010_v0 }
 0x1e6   : >> { %1503 = vmatmul.mubr.bf16.vlgmr.msra.gmra.mrb[4].mxu0 %v905_v1  ;;  %1759 = vmatpush1.bf16.msra.mxu1 %v3031_v33  ;;  %v3037_v1 = vcombine.low %v6009_v12, %v6008_v13 }
 0x1e7   : >> { %1718 = vmatpush1.bf16.msra.mxu0 %v3029_v38  ;;  %1760 = vmatprep.subr.bf16.mxu1 %v3036_v14  ;;  %v3039_v38 = vcombine.low %v6011_v34, %v6010_v0  ;;  %v6013_v14 = vld [vmem:[#allocation147_spill] sm:$0xff]  ;;  %v6018_v0 = vld [vmem:[#allocation149_spill] sm:$0xff] }
 0x1e8   : >> { %1719 = vmatprep.subr.bf16.mxu0 %v3034_v2  ;;  %1749 = vmatprep.mubr.bf16.mxu0 %v6012_v3  ;;  %v6014_v2 = vld [vmem:[#allocation145_spill] sm:$0xff] }
 0x1e9   : >> { %1790 = vmatprep.mubr.bf16.mxu1 %v6012_v3  ;;  %v3042_v33 = vcombine.high %v6014_v2, %v6013_v14 }
 0x1ea   : >> { %1761 = vmatpush1.bf16.msra.mxu1 %v3035_v11  ;;  %v3043_v11 = vcombine.low %v6016_v5, %v6015_v4  ;;  %v6022_v4 = vld [vmem:[#allocation153_spill] sm:$0xff]  ;;  %v6024_v5 = vld [vmem:[#allocation154_spill] sm:$0xff] }
 0x1eb   : >> { %1720 = vmatpush1.bf16.msra.mxu0 %v3033_v10  ;;  %1762 = vmatprep.subr.bf16.mxu1 %v3040_v27  ;;  %v3041_v10 = vcombine.low %v6014_v2, %v6013_v14  ;;  %v6019_v27 = vld [vmem:[#allocation152_spill] sm:$0xff]  ;;  %v6021_v2 = vld [vmem:[#allocation155_spill] sm:$0xff] }
 0x1ec   : >> { %1721 = vmatprep.subr.bf16.mxu0 %v3038_v18  ;;  %v3046_v18 = vcombine.high %v6018_v0, %v6017_v7  ;;  %v3048_v9 = vcombine.high %v6020_v8, %v6019_v27 }
 0x1ee   : >> { %1763 = vmatpush1.bf16.msra.mxu1 %v3039_v38  ;;  %v3047_v38 = vcombine.low %v6020_v8, %v6019_v27  ;;  %v6028_v8 = vld [vmem:[#allocation158_spill] sm:$0xff] }
 0x1ef   : >> { %1722 = vmatpush1.bf16.msra.mxu0 %v3037_v1  ;;  %1764 = vmatprep.subr.bf16.mxu1 %v3044_v6  ;;  %v3045_v1 = vcombine.low %v6018_v0, %v6017_v7  ;;  %v6023_v6 = vld [vmem:[#allocation156_spill] sm:$0xff]  ;;  %v6025_v0 = vld [vmem:[#allocation159_spill] sm:$0xff]  ;;  %v6026_v7 = vld [vmem:[#allocation157_spill] sm:$0xff] }
 0x1f0   : >> { %1723 = vmatprep.subr.bf16.mxu0 %v3042_v33  ;;  %v3050_v33 = vcombine.high %v6022_v4, %v6021_v2  ;;  %v3052_v12 = vcombine.high %v6024_v5, %v6023_v6 }
 0x1f2   : >> { %1765 = vmatpush1.bf16.msra.mxu1 %v3043_v11  ;;  %v3051_v11 = vcombine.low %v6024_v5, %v6023_v6  ;;  %v6032_v5 = vld [vmem:[#allocation162_spill] sm:$0xff] }
 0x1f3   : >> { %1724 = vmatpush1.bf16.msra.mxu0 %v3041_v10  ;;  %1766 = vmatprep.subr.bf16.mxu1 %v3048_v9  ;;  %v3049_v10 = vcombine.low %v6022_v4, %v6021_v2  ;;  %v6027_v9 = vld [vmem:[#allocation160_spill] sm:$0xff]  ;;  %v6029_v2 = vld [vmem:[#allocation163_spill] sm:$0xff]  ;;  %v6030_v4 = vld [vmem:[#allocation161_spill] sm:$0xff] }
 0x1f4   : >> { %1725 = vmatprep.subr.bf16.mxu0 %v3046_v18  ;;  %v3054_v18 = vcombine.high %v6026_v7, %v6025_v0  ;;  %v3056_v13 = vcombine.high %v6028_v8, %v6027_v9 }
 0x1f6   : >> { %1767 = vmatpush1.bf16.msra.mxu1 %v3047_v38  ;;  %v3055_v38 = vcombine.low %v6028_v8, %v6027_v9  ;;  %v6035_v8 = vld [vmem:[#allocation104_spill] sm:$0xff]  ;;  %v6036_v9 = vld [vmem:[#allocation102_spill] sm:$0xff] }
 0x1f7   : >> { %1726 = vmatpush1.bf16.msra.mxu0 %v3045_v1  ;;  %1768 = vmatprep.subr.bf16.mxu1 %v3052_v12  ;;  %v3053_v1 = vcombine.low %v6026_v7, %v6025_v0  ;;  %v6031_v12 = vld [vmem:[#allocation164_spill] sm:$0xff]  ;;  %v903_v0 = vld [vmem:[#allocation3] sm:$0xff]  ;;  %v3064_v14 = vcombine.high %v6036_v9, %v6035_v8 }
 0x1f8   : >> { %1727 = vmatprep.subr.bf16.mxu0 %v3050_v33  ;;  %v3058_v33 = vcombine.high %v6030_v4, %v6029_v2  ;;  %v3060_v6 = vcombine.high %v6032_v5, %v6031_v12  ;;  %v6033_v7 = vld [vmem:[#allocation103_spill] sm:$0xff]  ;;  %v4925_v15 = vpack.c.bf16 %v903_v0, %v903_v0 }
 0x1fa   : >> { %1769 = vmatpush1.bf16.msra.mxu1 %v3051_v11  ;;  %v3059_v11 = vcombine.low %v6032_v5, %v6031_v12  ;;  %v6040_v5 = vld [vmem:[#allocation106_spill] sm:$0xff] }
 0x1fb   : >> { %1728 = vmatpush1.bf16.msra.mxu0 %v3049_v10  ;;  %1770 = vmatprep.subr.bf16.mxu1 %v3056_v13  ;;  %v3057_v10 = vcombine.low %v6030_v4, %v6029_v2  ;;  %v6039_v4 = vld [vmem:[#allocation108_spill] sm:$0xff] }
 0x1fc   : >> { %1729 = vmatprep.subr.bf16.mxu0 %v3054_v18  ;;  %v6034_v18 = vld [vmem:[#allocation101_spill] sm:$0xff]  ;;  %v3068_v12 = vcombine.high %v6040_v5, %v6039_v4 }
 0x1fd   : >> { %v3062_v13 = vcombine.high %v6034_v18, %v6033_v7 }
 0x1fe   : >> { %1771 = vmatpush1.bf16.msra.mxu1 %v3055_v38  ;;  %v3063_v38 = vcombine.low %v6036_v9, %v6035_v8  ;;  %v6044_v8 = vld [vmem:[#allocation110_spill] sm:$0xff] }
 0x1ff   : >> { %1730 = vmatpush1.bf16.msra.mxu0 %v3053_v1  ;;  %1772 = vmatprep.subr.bf16.mxu1 %v3060_v6  ;;  %v3061_v1 = vcombine.low %v6034_v18, %v6033_v7  ;;  %v6038_v6 = vld [vmem:[#allocation105_spill] sm:$0xff]  ;;  %v6043_v7 = vld [vmem:[#allocation112_spill] sm:$0xff] }
 0x200   : >> { %1731 = vmatprep.subr.bf16.mxu0 %v3058_v33  ;;  %v6037_v33 = vld [vmem:[#allocation107_spill] sm:$0xff]  ;;  %v3072_v9 = vcombine.high %v6044_v8, %v6043_v7 }
 0x201   : >> { %v3066_v2 = vcombine.high %v6038_v6, %v6037_v33  ;;  %v3065_v0 = vcombine.low %v6038_v6, %v6037_v33  ;;  %v6048_v6 = vld [vmem:[#allocation114_spill] sm:$0xff] }
 0x202   : >> { %1773 = vmatpush1.bf16.msra.mxu1 %v3059_v11  ;;  %v6042_v11 = vld [vmem:[#allocation109_spill] sm:$0xff] }
 0x203   : >> { %1732 = vmatpush1.bf16.msra.mxu0 %v3057_v10  ;;  %2000 = vmatprep.subr.bf16.mxu1 %v3064_v14  ;;  %v3067_v10 = vcombine.low %v6040_v5, %v6039_v4  ;;  %v6041_v14 = vld [vmem:[#allocation111_spill] sm:$0xff]  ;;  %v6047_v5 = vld [vmem:[#allocation116_spill] sm:$0xff] }
 0x204   : >> { %1959 = vmatprep.subr.bf16.mxu0 %v3062_v13  ;;  %v3070_v13 = vcombine.high %v6042_v11, %v6041_v14  ;;  %v3076_v16 = vcombine.high %v6048_v6, %v6047_v5 }
 0x205   : >> { %1791 = vmatmul.mubr.bf16.vlgmr.msra.gmra.mrb[8].mxu1 %v4925_v15 }
 0x206   : >> { %1750 = vmatmul.mubr.bf16.vlgmr.msra.gmra.mrb[8].mxu0 %v4925_v15  ;;  %2001 = vmatpush1.bf16.msra.mxu1 %v3063_v38  ;;  %v3071_v38 = vcombine.low %v6044_v8, %v6043_v7  ;;  %v6050_v7 = vld [vmem:[#allocation117_spill] sm:$0xff]  ;;  %v6052_v8 = vld [vmem:[#allocation118_spill] sm:$0xff] }
 0x207   : >> { %1960 = vmatpush1.bf16.msra.mxu0 %v3061_v1  ;;  %2002 = vmatprep.subr.bf16.mxu1 %v3068_v12  ;;  %v3069_v1 = vcombine.low %v6042_v11, %v6041_v14  ;;  %v6046_v12 = vld [vmem:[#allocation113_spill] sm:$0xff]  ;;  %v6049_v11 = vld [vmem:[#allocation119_spill] sm:$0xff] }
 0x208   : >> { %1961 = vmatprep.subr.bf16.mxu0 %v3066_v2  ;;  %1991 = vmatprep.mubr.bf16.mxu0 %v6012_v3  ;;  %v6045_v2 = vld [vmem:[#allocation115_spill] sm:$0xff] }
 0x209   : >> { %2032 = vmatprep.mubr.bf16.mxu1 %v6012_v3  ;;  %v3074_v4 = vcombine.high %v6046_v12, %v6045_v2 }
 0x20a   : >> { %2003 = vmatpush1.bf16.msra.mxu1 %v3067_v10  ;;  %v3075_v10 = vcombine.low %v6048_v6, %v6047_v5  ;;  %v6054_v5 = vld [vmem:[#allocation121_spill] sm:$0xff]  ;;  %v6056_v6 = vld [vmem:[#allocation122_spill] sm:$0xff] }
 0x20b   : >> { %1962 = vmatpush1.bf16.msra.mxu0 %v3065_v0  ;;  %2004 = vmatprep.subr.bf16.mxu1 %v3072_v9  ;;  %v3073_v0 = vcombine.low %v6046_v12, %v6045_v2  ;;  %v6051_v9 = vld [vmem:[#allocation120_spill] sm:$0xff]  ;;  %v6053_v2 = vld [vmem:[#allocation123_spill] sm:$0xff] }
 0x20c   : >> { %1963 = vmatprep.subr.bf16.mxu0 %v3070_v13  ;;  %v3078_v13 = vcombine.high %v6050_v7, %v6049_v11  ;;  %v3080_v14 = vcombine.high %v6052_v8, %v6051_v9 }
 0x20e   : >> { %2005 = vmatpush1.bf16.msra.mxu1 %v3071_v38  ;;  %v3079_v38 = vcombine.low %v6052_v8, %v6051_v9  ;;  %v6058_v8 = vld [vmem:[#allocation125_spill] sm:$0xff]  ;;  %v6060_v9 = vld [vmem:[#allocation126_spill] sm:$0xff] }
 0x20f   : >> { %1964 = vmatpush1.bf16.msra.mxu0 %v3069_v1  ;;  %2006 = vmatprep.subr.bf16.mxu1 %v3076_v16  ;;  %v3077_v1 = vcombine.low %v6050_v7, %v6049_v11  ;;  %v6055_v16 = vld [vmem:[#allocation124_spill] sm:$0xff]  ;;  %v6057_v7 = vld [vmem:[#allocation127_spill] sm:$0xff] }
 0x210   : >> { %1965 = vmatprep.subr.bf16.mxu0 %v3074_v4  ;;  %v3082_v4 = vcombine.high %v6054_v5, %v6053_v2  ;;  %v3084_v12 = vcombine.high %v6056_v6, %v6055_v16 }
 0x212   : >> { %2007 = vmatpush1.bf16.msra.mxu1 %v3075_v10  ;;  %v3083_v10 = vcombine.low %v6056_v6, %v6055_v16  ;;  %v6064_v6 = vld [vmem:[#allocation130_spill] sm:$0xff] }
 0x213   : >> { %1966 = vmatpush1.bf16.msra.mxu0 %v3073_v0  ;;  %2008 = vmatprep.subr.bf16.mxu1 %v3080_v14  ;;  %v3081_v0 = vcombine.low %v6054_v5, %v6053_v2  ;;  %v6059_v14 = vld [vmem:[#allocation128_spill] sm:$0xff]  ;;  %v6061_v2 = vld [vmem:[#allocation131_spill] sm:$0xff]  ;;  %v6062_v5 = vld [vmem:[#allocation129_spill] sm:$0xff] }
 0x214   : >> { %1967 = vmatprep.subr.bf16.mxu0 %v3078_v13  ;;  %v3086_v13 = vcombine.high %v6058_v8, %v6057_v7  ;;  %v3088_v11 = vcombine.high %v6060_v9, %v6059_v14 }
 0x216   : >> { %2009 = vmatpush1.bf16.msra.mxu1 %v3079_v38  ;;  %v3087_v38 = vcombine.low %v6060_v9, %v6059_v14  ;;  %v6068_v9 = vld [vmem:[#allocation198_spill] sm:$0xff] }
 0x217   : >> { %1968 = vmatpush1.bf16.msra.mxu0 %v3077_v1  ;;  %2010 = vmatprep.subr.bf16.mxu1 %v3084_v12  ;;  %v3085_v1 = vcombine.low %v6058_v8, %v6057_v7  ;;  %v6063_v12 = vld [vmem:[#allocation132_spill] sm:$0xff]  ;;  %v6065_v7 = vld [vmem:[#allocation199_spill] sm:$0xff]  ;;  %v6066_v8 = vld [vmem:[#allocation197_spill] sm:$0xff] }
 0x218   : >> { %1969 = vmatprep.subr.bf16.mxu0 %v3082_v4  ;;  %v3090_v4 = vcombine.high %v6062_v5, %v6061_v2  ;;  %v3092_v16 = vcombine.high %v6064_v6, %v6063_v12 }
 0x21a   : >> { %2011 = vmatpush1.bf16.msra.mxu1 %v3083_v10  ;;  %v3091_v10 = vcombine.low %v6064_v6, %v6063_v12  ;;  %v6072_v6 = vld [vmem:[#allocation202_spill] sm:$0xff] }
 0x21b   : >> { %1970 = vmatpush1.bf16.msra.mxu0 %v3081_v0  ;;  %2012 = vmatprep.subr.bf16.mxu1 %v3088_v11  ;;  %v3089_v0 = vcombine.low %v6062_v5, %v6061_v2  ;;  %v6067_v11 = vld [vmem:[#allocation200_spill] sm:$0xff]  ;;  %v6069_v2 = vld [vmem:[#allocation203_spill] sm:$0xff]  ;;  %v6070_v5 = vld [vmem:[#allocation201_spill] sm:$0xff] }
 0x21c   : >> { %1971 = vmatprep.subr.bf16.mxu0 %v3086_v13  ;;  %v3094_v13 = vcombine.high %v6066_v8, %v6065_v7  ;;  %v3096_v14 = vcombine.high %v6068_v9, %v6067_v11 }
 0x21e   : >> { %2013 = vmatpush1.bf16.msra.mxu1 %v3087_v38  ;;  %v3095_v38 = vcombine.low %v6068_v9, %v6067_v11  ;;  %v6076_v9 = vld [vmem:[#allocation206_spill] sm:$0xff] }
 0x21f   : >> { %1972 = vmatpush1.bf16.msra.mxu0 %v3085_v1  ;;  %2014 = vmatprep.subr.bf16.mxu1 %v3092_v16  ;;  %v3093_v1 = vcombine.low %v6066_v8, %v6065_v7  ;;  %v6071_v16 = vld [vmem:[#allocation204_spill] sm:$0xff] }
 0x220   : >> { %1973 = vmatprep.subr.bf16.mxu0 %v3090_v4  ;;  %v3098_v4 = vcombine.high %v6070_v5, %v6069_v2  ;;  %v3100_v12 = vcombine.high %v6072_v6, %v6071_v16  ;;  %v6075_v8 = vld [vmem:[#allocation208_spill] sm:$0xff] }
 0x221   : >> { %v3104_v11 = vcombine.high %v6076_v9, %v6075_v8 }
 0x222   : >> { %2015 = vmatpush1.bf16.msra.mxu1 %v3091_v10  ;;  %v3099_v10 = vcombine.low %v6072_v6, %v6071_v16 }
 0x223   : >> { %1974 = vmatpush1.bf16.msra.mxu0 %v3089_v0  ;;  %2247 = vmatprep.subr.bf16.mxu1 %v3096_v14  ;;  %v3097_v0 = vcombine.low %v6070_v5, %v6069_v2  ;;  %v6073_v14 = vld [vmem:[#allocation207_spill] sm:$0xff]  ;;  %v6079_v2 = vld [vmem:[#allocation212_spill] sm:$0xff]  ;;  %v6080_v5 = vld [vmem:[#allocation210_spill] sm:$0xff] }
 0x224   : >> { %2206 = vmatprep.subr.bf16.mxu0 %v3094_v13  ;;  %v6074_v13 = vld [vmem:[#allocation205_spill] sm:$0xff]  ;;  %v3108_v6 = vcombine.high %v6080_v5, %v6079_v2 }
 0x225   : >> { %2033 = vmatmul.mubr.bf16.vlgmr.msra.gmra.mrb[12].mxu1 %v4722_v23  ;;  %v3102_v7 = vcombine.high %v6074_v13, %v6073_v14 }
 0x226   : >> { %1992 = vmatmul.mubr.bf16.vlgmr.msra.gmra.mrb[12].mxu0 %v4722_v23  ;;  %2248 = vmatpush1.bf16.msra.mxu1 %v3095_v38  ;;  %v3101_v23 = vcombine.low %v6074_v13, %v6073_v14  ;;  %v6078_v38 = vld [vmem:[#allocation209_spill] sm:$0xff]  ;;  %v6081_v13 = vld [vmem:[#allocation215_spill] sm:$0xff] }
 0x227   : >> { %2207 = vmatpush1.bf16.msra.mxu0 %v3093_v1  ;;  %2249 = vmatprep.subr.bf16.mxu1 %v3100_v12  ;;  %v3103_v1 = vcombine.low %v6076_v9, %v6075_v8  ;;  %v6077_v12 = vld [vmem:[#allocation211_spill] sm:$0xff]  ;;  %v6082_v8 = vld [vmem:[#allocation213_spill] sm:$0xff]  ;;  %v6084_v9 = vld [vmem:[#allocation214_spill] sm:$0xff] }
 0x228   : >> { %2208 = vmatprep.subr.bf16.mxu0 %v3098_v4  ;;  %2238 = vmatprep.mubr.bf16.mxu0 %v6012_v3  ;;  %v3106_v4 = vcombine.high %v6078_v38, %v6077_v12 }
 0x229   : >> { %2279 = vmatprep.mubr.bf16.mxu1 %v6012_v3 }
 0x22a   : >> { %2250 = vmatpush1.bf16.msra.mxu1 %v3099_v10  ;;  %v3107_v10 = vcombine.low %v6080_v5, %v6079_v2  ;;  %v6086_v2 = vld [vmem:[#allocation217_spill] sm:$0xff]  ;;  %v6088_v5 = vld [vmem:[#allocation218_spill] sm:$0xff] }
 0x22b   : >> { %2209 = vmatpush1.bf16.msra.mxu0 %v3097_v0  ;;  %2251 = vmatprep.subr.bf16.mxu1 %v3104_v11  ;;  %v3105_v0 = vcombine.low %v6078_v38, %v6077_v12  ;;  %v6083_v11 = vld [vmem:[#allocation216_spill] sm:$0xff]  ;;  %v6085_v12 = vld [vmem:[#allocation219_spill] sm:$0xff] }
 0x22c   : >> { %2210 = vmatprep.subr.bf16.mxu0 %v3102_v7  ;;  %v3110_v7 = vcombine.high %v6082_v8, %v6081_v13  ;;  %v3112_v14 = vcombine.high %v6084_v9, %v6083_v11 }
 0x22e   : >> { %2252 = vmatpush1.bf16.msra.mxu1 %v3103_v1  ;;  %v3111_v1 = vcombine.low %v6084_v9, %v6083_v11  ;;  %v6090_v9 = vld [vmem:[#allocation221_spill] sm:$0xff]  ;;  %v6092_v11 = vld [vmem:[#allocation222_spill] sm:$0xff] }
 0x22f   : >> { %2211 = vmatpush1.bf16.msra.mxu0 %v3101_v23  ;;  %2253 = vmatprep.subr.bf16.mxu1 %v3108_v6  ;;  %v3109_v23 = vcombine.low %v6082_v8, %v6081_v13  ;;  %v6087_v6 = vld [vmem:[#allocation220_spill] sm:$0xff]  ;;  %v6089_v8 = vld [vmem:[#allocation223_spill] sm:$0xff] }
 0x230   : >> { %2212 = vmatprep.subr.bf16.mxu0 %v3106_v4  ;;  %v3114_v4 = vcombine.high %v6086_v2, %v6085_v12  ;;  %v3116_v16 = vcombine.high %v6088_v5, %v6087_v6 }
 0x232   : >> { %2254 = vmatpush1.bf16.msra.mxu1 %v3107_v10  ;;  %v3115_v10 = vcombine.low %v6088_v5, %v6087_v6  ;;  %v6094_v5 = vld [vmem:[#allocation225_spill] sm:$0xff]  ;;  %v6096_v6 = vld [vmem:[#allocation226_spill] sm:$0xff] }
 0x233   : >> { %2213 = vmatpush1.bf16.msra.mxu0 %v3105_v0  ;;  %2255 = vmatprep.subr.bf16.mxu1 %v3112_v14  ;;  %v3113_v0 = vcombine.low %v6086_v2, %v6085_v12  ;;  %v6091_v14 = vld [vmem:[#allocation224_spill] sm:$0xff]  ;;  %v6093_v2 = vld [vmem:[#allocation227_spill] sm:$0xff] }
 0x234   : >> { %2214 = vmatprep.subr.bf16.mxu0 %v3110_v7  ;;  %v3118_v7 = vcombine.high %v6090_v9, %v6089_v8  ;;  %v3120_v13 = vcombine.high %v6092_v11, %v6091_v14 }
 0x236   : >> { %2256 = vmatpush1.bf16.msra.mxu1 %v3111_v1  ;;  %v3119_v1 = vcombine.low %v6092_v11, %v6091_v14  ;;  %v6099_v11 = vld [vmem:[#allocation168_spill] sm:$0xff]  ;;  %v6100_v14 = vld [vmem:[#allocation166_spill] sm:$0xff] }
 0x237   : >> { %2215 = vmatpush1.bf16.msra.mxu0 %v3109_v23  ;;  %2257 = vmatprep.subr.bf16.mxu1 %v3116_v16  ;;  %v3117_v23 = vcombine.low %v6090_v9, %v6089_v8  ;;  %v6095_v16 = vld [vmem:[#allocation228_spill] sm:$0xff]  ;;  %v6097_v9 = vld [vmem:[#allocation167_spill] sm:$0xff]  ;;  %v3128_v17 = vcombine.high %v6100_v14, %v6099_v11 }
 0x238   : >> { %2216 = vmatprep.subr.bf16.mxu0 %v3114_v4  ;;  %v3122_v4 = vcombine.high %v6094_v5, %v6093_v2  ;;  %v3124_v12 = vcombine.high %v6096_v6, %v6095_v16  ;;  %v904_v8 = vld [vmem:[#allocation4] sm:$0xff] }
 0x239   : >> { %v2045_v18 = vpack.c.bf16 %v904_v8, %v904_v8 }
 0x23a   : >> { %2258 = vmatpush1.bf16.msra.mxu1 %v3115_v10  ;;  %v3123_v10 = vcombine.low %v6096_v6, %v6095_v16  ;;  %v6104_v6 = vld [vmem:[#allocation170_spill] sm:$0xff] }
 0x23b   : >> { %2217 = vmatpush1.bf16.msra.mxu0 %v3113_v0  ;;  %2259 = vmatprep.subr.bf16.mxu1 %v3120_v13  ;;  %v3121_v0 = vcombine.low %v6094_v5, %v6093_v2  ;;  %v6101_v2 = vld [vmem:[#allocation171_spill] sm:$0xff]  ;;  %v6103_v5 = vld [vmem:[#allocation172_spill] sm:$0xff] }
 0x23c   : >> { %2218 = vmatprep.subr.bf16.mxu0 %v3118_v7  ;;  %v6098_v7 = vld [vmem:[#allocation165_spill] sm:$0xff]  ;;  %v3132_v16 = vcombine.high %v6104_v6, %v6103_v5 }
 0x23d   : >> { %v3126_v13 = vcombine.high %v6098_v7, %v6097_v9 }
 0x23e   : >> { %2260 = vmatpush1.bf16.msra.mxu1 %v3119_v1  ;;  %v3127_v1 = vcombine.low %v6100_v14, %v6099_v11 }
 0x23f   : >> { %2219 = vmatpush1.bf16.msra.mxu0 %v3117_v23  ;;  %2261 = vmatprep.subr.bf16.mxu1 %v3124_v12  ;;  %v3125_v23 = vcombine.low %v6098_v7, %v6097_v9  ;;  %v6107_v7 = vld [vmem:[#allocation176_spill] sm:$0xff]  ;;  %v6108_v9 = vld [vmem:[#allocation174_spill] sm:$0xff] }
 0x240   : >> { %2220 = vmatprep.subr.bf16.mxu0 %v3122_v4  ;;  %v6102_v4 = vld [vmem:[#allocation169_spill] sm:$0xff]  ;;  %v3136_v11 = vcombine.high %v6108_v9, %v6107_v7 }
 0x241   : >> { %v3130_v12 = vcombine.high %v6102_v4, %v6101_v2  ;;  %v3129_v8 = vcombine.low %v6102_v4, %v6101_v2  ;;  %v6111_v2 = vld [vmem:[#allocation180_spill] sm:$0xff]  ;;  %v6112_v4 = vld [vmem:[#allocation178_spill] sm:$0xff] }
 0x242   : >> { %2262 = vmatpush1.bf16.msra.mxu1 %v3123_v10  ;;  %v6105_v10 = vld [vmem:[#allocation175_spill] sm:$0xff] }
 0x243   : >> { %2221 = vmatpush1.bf16.msra.mxu0 %v3121_v0  ;;  %2489 = vmatprep.subr.bf16.mxu1 %v3128_v17  ;;  %v3131_v0 = vcombine.low %v6104_v6, %v6103_v5  ;;  %v6106_v17 = vld [vmem:[#allocation173_spill] sm:$0xff]  ;;  %v3140_v5 = vcombine.high %v6112_v4, %v6111_v2  ;;  %v6113_v6 = vld [vmem:[#allocation183_spill] sm:$0xff] }
 0x244   : >> { %2448 = vmatprep.subr.bf16.mxu0 %v3126_v13  ;;  %v3134_v13 = vcombine.high %v6106_v17, %v6105_v10 }
 0x245   : >> { %2280 = vmatmul.mubr.bf16.vlgmr.msra.gmra.mrb[16].mxu1 %v2045_v18 }
 0x246   : >> { %2239 = vmatmul.mubr.bf16.vlgmr.msra.gmra.mrb[16].mxu0 %v2045_v18  ;;  %2490 = vmatpush1.bf16.msra.mxu1 %v3127_v1  ;;  %v3133_v18 = vcombine.low %v6106_v17, %v6105_v10  ;;  %v6110_v1 = vld [vmem:[#allocation177_spill] sm:$0xff] }
 0x247   : >> { %2449 = vmatpush1.bf16.msra.mxu0 %v3125_v23  ;;  %2491 = vmatprep.subr.bf16.mxu1 %v3132_v16  ;;  %v3135_v23 = vcombine.low %v6108_v9, %v6107_v7  ;;  %v6109_v16 = vld [vmem:[#allocation179_spill] sm:$0xff]  ;;  %v6114_v7 = vld [vmem:[#allocation181_spill] sm:$0xff]  ;;  %v6116_v9 = vld [vmem:[#allocation182_spill] sm:$0xff] }
 0x248   : >> { %2450 = vmatprep.subr.bf16.mxu0 %v3130_v12  ;;  %2480 = vmatprep.mubr.bf16.mxu0 %v6012_v3  ;;  %v3138_v12 = vcombine.high %v6110_v1, %v6109_v16  ;;  %v6129_v17 = vld [vmem:[#allocation245_spill] sm:$0xff] }
 0x249   : >> { %2521 = vmatprep.mubr.bf16.mxu1 %v6012_v3 }
 0x24a   : >> { %2492 = vmatpush1.bf16.msra.mxu1 %v3131_v0  ;;  %v3139_v0 = vcombine.low %v6112_v4, %v6111_v2  ;;  %v6118_v2 = vld [vmem:[#allocation185_spill] sm:$0xff]  ;;  %v6120_v4 = vld [vmem:[#allocation186_spill] sm:$0xff] }
 0x24b   : >> { %2451 = vmatpush1.bf16.msra.mxu0 %v3129_v8  ;;  %2493 = vmatprep.subr.bf16.mxu1 %v3136_v11  ;;  %v3137_v8 = vcombine.low %v6110_v1, %v6109_v16  ;;  %v6115_v11 = vld [vmem:[#allocation184_spill] sm:$0xff]  ;;  %v6117_v1 = vld [vmem:[#allocation187_spill] sm:$0xff] }
 0x24c   : >> { %2452 = vmatprep.subr.bf16.mxu0 %v3134_v13  ;;  %v3142_v13 = vcombine.high %v6114_v7, %v6113_v6  ;;  %v3144_v10 = vcombine.high %v6116_v9, %v6115_v11 }
 0x24e   : >> { %2494 = vmatpush1.bf16.msra.mxu1 %v3135_v23  ;;  %v3143_v23 = vcombine.low %v6116_v9, %v6115_v11  ;;  %v6124_v9 = vld [vmem:[#allocation190_spill] sm:$0xff] }
 0x24f   : >> { %2453 = vmatpush1.bf16.msra.mxu0 %v3133_v18  ;;  %2495 = vmatprep.subr.bf16.mxu1 %v3140_v5  ;;  %v3141_v18 = vcombine.low %v6114_v7, %v6113_v6  ;;  %v6119_v5 = vld [vmem:[#allocation188_spill] sm:$0xff]  ;;  %v6121_v6 = vld [vmem:[#allocation191_spill] sm:$0xff]  ;;  %v6122_v7 = vld [vmem:[#allocation189_spill] sm:$0xff] }
 0x250   : >> { %2454 = vmatprep.subr.bf16.mxu0 %v3138_v12  ;;  %v3146_v12 = vcombine.high %v6118_v2, %v6117_v1  ;;  %v3148_v14 = vcombine.high %v6120_v4, %v6119_v5 }
 0x252   : >> { %2496 = vmatpush1.bf16.msra.mxu1 %v3139_v0  ;;  %v3147_v0 = vcombine.low %v6120_v4, %v6119_v5  ;;  %v6128_v4 = vld [vmem:[#allocation194_spill] sm:$0xff] }
 0x253   : >> { %2455 = vmatpush1.bf16.msra.mxu0 %v3137_v8  ;;  %2497 = vmatprep.subr.bf16.mxu1 %v3144_v10  ;;  %v3145_v8 = vcombine.low %v6118_v2, %v6117_v1  ;;  %v6123_v10 = vld [vmem:[#allocation192_spill] sm:$0xff]  ;;  %v6125_v1 = vld [vmem:[#allocation195_spill] sm:$0xff]  ;;  %v6126_v2 = vld [vmem:[#allocation193_spill] sm:$0xff] }
 0x254   : >> { %2456 = vmatprep.subr.bf16.mxu0 %v3142_v13  ;;  %v3150_v13 = vcombine.high %v6122_v7, %v6121_v6  ;;  %v3152_v11 = vcombine.high %v6124_v9, %v6123_v10 }
 0x256   : >> { %2498 = vmatpush1.bf16.msra.mxu1 %v3143_v23  ;;  %v3151_v23 = vcombine.low %v6124_v9, %v6123_v10 }
 0x257   : >> { %2457 = vmatpush1.bf16.msra.mxu0 %v3141_v18  ;;  %2499 = vmatprep.subr.bf16.mxu1 %v3148_v14  ;;  %v3149_v18 = vcombine.low %v6122_v7, %v6121_v6  ;;  %v6127_v14 = vld [vmem:[#allocation196_spill] sm:$0xff] }
 0x258   : >> { %2458 = vmatprep.subr.bf16.mxu0 %v3146_v12  ;;  %v3154_v12 = vcombine.high %v6126_v2, %v6125_v1  ;;  %v3156_v5 = vcombine.high %v6128_v4, %v6127_v14 }
 0x25a   : >> { %2500 = vmatpush1.bf16.msra.mxu1 %v3147_v0  ;;  %v3155_v0 = vcombine.low %v6128_v4, %v6127_v14 }
 0x25b   : >> { %2459 = vmatpush1.bf16.msra.mxu0 %v3145_v8  ;;  %2501 = vmatprep.subr.bf16.mxu1 %v3152_v11  ;;  %v3153_v8 = vcombine.low %v6126_v2, %v6125_v1 }
 0x25c   : >> { %2460 = vmatprep.subr.bf16.mxu0 %v3150_v13 }
 0x25e   : >> { %2502 = vmatpush1.bf16.msra.mxu1 %v3151_v23 }
 0x25f   : >> { %2461 = vmatpush1.bf16.msra.mxu0 %v3149_v18  ;;  %2503 = vmatprep.subr.bf16.mxu1 %v3156_v5 }
 0x260   : >> { %2462 = vmatprep.subr.bf16.mxu0 %v3154_v12 }
 0x262   : >> { %2504 = vmatpush1.bf16.msra.mxu1 %v3155_v0 }
 0x263   : >> { %2463 = vmatpush1.bf16.msra.mxu0 %v3153_v8 }
 0x265   : >> { %2522 = vmatmul.mubr.bf16.vlgmr.msra.gmra.mrb[20].mxu1 %v4925_v15 }
 0x266   : >> { %2481 = vmatmul.mubr.bf16.vlgmr.msra.gmra.mrb[20].mxu0 %v4925_v15 }
 0x267   : >> { %2722 = vmatprep.mubr.bf16.mxu0 %v6012_v3  ;;  %v6130_v3 = vrot.slane %v6129_v17, %v4554_v28 }
 0x278   : >> { %v1143_v13 = vpop.f32.mrb[0].mxu1 }
 0x279   : >> { %v1102_v11 = vpop.f32.mrb[0].mxu0  ;;  %v1145_v23 = vpop.f32.mrb[1].mxu1 }
 0x27a   : >> { %v1104_v18 = vpop.f32.mrb[1].mxu0  ;;  %v1147_v7 = vpop.f32.mrb[2].mxu1 }
 0x27b   : >> { %v1106_v6 = vpop.f32.mrb[2].mxu0  ;;  %v1148_v2 = vpop.f32.mrb[3].mxu1 }
 0x27c   : >> { %v1107_v1 = vpop.f32.mrb[3].mxu0  ;;  %v6131_v6 = vrot.slane %v6129_v17, %v4562_v24 }
 0x2b8   : >> { %v1545_v4 = vpop.f32.mrb[4].mxu1 }
 0x2b9   : >> { %v1504_v9 = vpop.f32.mrb[4].mxu0  ;;  %v1546_v5 = vadd.f32 %v1545_v4, %v1143_v13  ;;  %v1547_v0 = vpop.f32.mrb[5].mxu1 }
 0x2ba   : >> { %v1505_v12 = vadd.f32 %v1504_v9, %v1102_v11  ;;  %v1506_v8 = vpop.f32.mrb[5].mxu0  ;;  %v1548_v14 = vadd.f32 %v1547_v0, %v1145_v23  ;;  %v1549_v15 = vpop.f32.mrb[6].mxu1  ;;  %v6132_v11 = vrot.slane %v6129_v17, %v4566_v30 }
 0x2bb   : >> { %v1507_v10 = vadd.f32 %v1506_v8, %v1104_v18  ;;  %v1508_v16 = vpop.f32.mrb[6].mxu0  ;;  %v1550_v22 = vpop.f32.mrb[7].mxu1 }
 0x2bc   : >> { %v1552_v19 = vadd.f32 %v1505_v12, %v6130_v3  ;;  %v1509_v20 = vpop.f32.mrb[7].mxu0  ;;  %v1555_v13 = vadd.f32 %v1548_v14, %v6132_v11  ;;  %v6136_v3 = vld [vmem:[#allocation232_spill] sm:$0xff] }
 0x2bd   : >> { %v1553_v2 = vadd.f32 %v1507_v10, %v6131_v6  ;;  %v6133_v20 = vrot.slane %v6129_v17, %v4564_v21  ;;  %v6135_v10 = vld [vmem:[#allocation229_spill] sm:$0xff]  ;;  %v6137_v6 = vld [vmem:[#allocation231_spill] sm:$0xff]  ;;  %v6142_v17 = vld [vmem:[#allocation238_spill] sm:$0xff] }
 0x2be   : >> { %v2535_v7 = vsub.f32 0.0, %v1552_v19  ;;  %v2548_v16 = vsub.f32 0.0, %v1555_v13  ;;  %v6134_v19 = vld [vmem:[#allocation230_spill] sm:$0xff] }
 0x2bf   : >> { %v2541_v1 = vsub.f32 0.0, %v1553_v2  ;;  %v1554_v22 = vadd.f32 %v1546_v5, %v6133_v20  ;;  %v3158_v0 = vcombine.high %v6135_v10, %v6134_v19  ;;  %v3157_v14 = vcombine.low %v6135_v10, %v6134_v19  ;;  %v6143_v19 = vld [vmem:[#allocation237_spill] sm:$0xff] }
 0x2c0   : >> { %v2536_v9 = vmul.f32 1.442695, %v2535_v7  ;;  %v2549_v18 = vmul.f32 1.442695, %v2548_v16  ;;  %v3160_v2 = vcombine.high %v6137_v6, %v6136_v3  ;;  %v3159_v5 = vcombine.low %v6137_v6, %v6136_v3  ;;  %v6138_v7 = vld [vmem:[#allocation234_spill] sm:$0xff]  ;;  %v2534_v16 = vld [vmem:[#allocation5] sm:$0xff] }
 0x2c1   : >> { %v2542_v4 = vmul.f32 1.442695, %v2541_v1  ;;  %2690 = vmatprep.subr.bf16.mxu0 %v3158_v0  ;;  %v6139_v1 = vld [vmem:[#allocation233_spill] sm:$0xff]  ;;  %v3166_v25 = vcombine.high %v6143_v19, %v6142_v17 }
 0x2c2   : >> { %3324 = vpow2.f32 %v2536_v9  ;;  %2691 = vmatpush1.bf16.msra.mxu0 %v3157_v14  ;;  %v3162_v9 = vcombine.high %v6139_v1, %v6138_v7 }
 0x2c3   : >> { %3326 = vpow2.f32 %v2542_v4  ;;  %2692 = vmatprep.subr.bf16.mxu0 %v3160_v2  ;;  %v3161_v4 = vcombine.low %v6139_v1, %v6138_v7 }
 0x2c4   : >> { %3328 = vpow2.f32 %v2549_v18 }
 0x2c5   : >> { %3330 = vtanh.f32 %v1554_v22 }
 0x2c6   : >> { %2693 = vmatpush1.bf16.msra.mxu0 %v3159_v5 }
 0x2c7   : >> { %2694 = vmatprep.subr.bf16.mxu0 %v3162_v9 }
 0x2ca   : >> { %2695 = vmatpush1.bf16.msra.mxu0 %v3161_v4 }
 0x2cc   : >> { %v3325_v23 = vpop.eup %3324 }
 0x2cd   : >> { %v3327_v12 = vpop.eup %3326  ;;  %v2538_v8 = vadd.f32 1.0, %v3325_v23  ;;  %v6140_v23 = vld [vmem:[#allocation236_spill] sm:$0xff] }
 0x2ce   : >> { %v2544_v15 = vadd.f32 1.0, %v3327_v12  ;;  %v3329_v11 = vpop.eup %3328  ;;  %v6141_v12 = vld [vmem:[#allocation235_spill] sm:$0xff] }
 0x2cf   : >> { %3332 = vrcp.f32 %v2538_v8  ;;  %v3331_v13 = vpop.eup %3330  ;;  %v3164_v8 = vcombine.high %v6141_v12, %v6140_v23  ;;  %v2551_v14 = vadd.f32 1.0, %v3329_v11  ;;  %v3163_v3 = vcombine.low %v6141_v12, %v6140_v23 }
 0x2d0   : >> { %3334 = vrcp.f32 %v2544_v15  ;;  %v3165_v11 = vcombine.low %v6143_v19, %v6142_v17 }
 0x2d1   : >> { %2696 = vmatprep.subr.bf16.mxu0 %v3164_v8  ;;  %3336 = vrcp.f32 %v2551_v14 }
 0x2d2   : >> { %2697 = vmatpush1.bf16.msra.mxu0 %v3163_v3  ;;  %v6146_v3 = vld [vmem:[#allocation242_spill] sm:$0xff] }
 0x2d3   : >> { %2698 = vmatprep.subr.bf16.mxu0 %v3166_v25 }
 0x2d6   : >> { %2699 = vmatpush1.bf16.msra.mxu0 %v3165_v11 }
 0x2d8   : >> { %v1792_v22 = vpop.f32.mrb[8].mxu1 }
 0x2d9   : >> { %v3333_v18 = vpop.eup %3332  ;;  %v1751_v20 = vpop.f32.mrb[8].mxu0 }
 0x2da   : >> { %v3335_v0 = vpop.eup %3334  ;;  %v2555_v15 = vmul.f32 %v3333_v18, %v3331_v13  ;;  %v1753_v2 = vpop.f32.mrb[9].mxu0  ;;  %v6144_v13 = vld [vmem:[#allocation240_spill] sm:$0xff]  ;;  %v6145_v18 = vld [vmem:[#allocation239_spill] sm:$0xff] }
 0x2db   : >> { %v1794_v5 = vpop.f32.mrb[9].mxu1  ;;  %v2554_v1 = vmul.f32 %v3335_v0, %v2534_v16  ;;  %v1755_v6 = vpop.f32.mrb[10].mxu0  ;;  %v3168_v16 = vcombine.high %v6145_v18, %v6144_v13  ;;  %v6148_v0 = vld [vmem:[#allocation244_spill] sm:$0xff] }
 0x2dc   : >> { %v1796_v9 = vpop.f32.mrb[10].mxu1  ;;  %v1756_v7 = vpop.f32.mrb[11].mxu0  ;;  %v3167_v6 = vcombine.low %v6145_v18, %v6144_v13 }
 0x2dd   : >> { %v1797_v4 = vpop.f32.mrb[11].mxu1  ;;  %v2556_v10 = vadd.f32 %v2555_v15, %v2554_v1  ;;  %2700 = vmatprep.subr.bf16.mxu0 %v3168_v16  ;;  %v6147_v7 = vld [vmem:[#allocation241_spill] sm:$0xff]  ;;  %v6149_v15 = vld [vmem:[#allocation243_spill] sm:$0xff]  ;;  %v3337_v25 = vpop.eup %3336 }
 0x2de   : >> { %v3170_v1 = vcombine.high %v6147_v7, %v6146_v3  ;;  %2701 = vmatpush1.bf16.msra.mxu0 %v3167_v6  ;;  %v3169_v8 = vcombine.low %v6147_v7, %v6146_v3  ;;  %v3171_v14 = vcombine.low %v6149_v15, %v6148_v0 }
 0x2df   : >> { %3338 = vtanh.f32 %v2556_v10  ;;  %2734 = vst [vmem:[#allocation5] sm:$0xff] %v2556_v10  ;;  %v3172_v10 = vcombine.high %v6149_v15, %v6148_v0 }
 0x2e0   : >> { %2702 = vmatprep.subr.bf16.mxu0 %v3170_v1 }
 0x2e2   : >> { %2703 = vmatpush1.bf16.msra.mxu0 %v3169_v8  ;;  %v6150_v8 = vrot.slane %v4588_v31, %v4554_v28 }
 0x2e3   : >> { %2704 = vmatprep.subr.bf16.mxu0 %v3172_v10  ;;  %v6151_v10 = vrot.slane %v4588_v31, %v4562_v24 }
 0x2e6   : >> { %2705 = vmatpush1.bf16.msra.mxu0 %v3171_v14 }
 0x2e9   : >> { %v3339_v9 = vpop.eup %3338 }
 0x2ea   : >> { %v2558_v4 = vmul.f32 %v3339_v9, %v3337_v25 }
 0x2ec   : >> { %2731 = vst [vmem:[#allocation2] sm:$0xff] %v2558_v4 }
 0x2f8   : >> { %v2034_v16 = vpop.f32.mrb[12].mxu1 }
 0x2f9   : >> { %v1993_v11 = vpop.f32.mrb[12].mxu0  ;;  %v2035_v12 = vadd.f32 %v2034_v16, %v1792_v22  ;;  %v2036_v3 = vpop.f32.mrb[13].mxu1 }
 0x2fa   : >> { %v1994_v6 = vadd.f32 %v1993_v11, %v1751_v20  ;;  %v1995_v13 = vpop.f32.mrb[13].mxu0  ;;  %v2037_v7 = vadd.f32 %v2036_v3, %v1794_v5  ;;  %v2038_v18 = vpop.f32.mrb[14].mxu1 }
 0x2fb   : >> { %v1996_v1 = vadd.f32 %v1995_v13, %v1753_v2  ;;  %v1997_v17 = vpop.f32.mrb[14].mxu0  ;;  %v2039_v15 = vpop.f32.mrb[15].mxu1  ;;  %v6152_v2 = vrot.slane %v4588_v31, %v4566_v30  ;;  %v6153_v18 = vrot.slane %v4588_v31, %v4564_v21 }
 0x2fc   : >> { %v2041_v19 = vadd.f32 %v1994_v6, %v6150_v8  ;;  %v1998_v0 = vpop.f32.mrb[15].mxu0  ;;  %v2559_v6 = vld [vmem:[#allocation6] sm:$0xff] }
 0x2fd   : >> { %v2042_v25 = vadd.f32 %v1996_v1, %v6151_v10  ;;  %v2044_v5 = vadd.f32 %v2037_v7, %v6152_v2  ;;  %v2043_v3 = vadd.f32 %v2035_v12, %v6153_v18 }
 0x2fe   : >> { %v2560_v14 = vsub.f32 0.0, %v2041_v19 }
 0x2ff   : >> { %v2566_v9 = vsub.f32 0.0, %v2042_v25  ;;  %v2573_v17 = vsub.f32 0.0, %v2044_v5 }
 0x300   : >> { %v2561_v20 = vmul.f32 1.442695, %v2560_v14 }
 0x301   : >> { %v2567_v22 = vmul.f32 1.442695, %v2566_v9  ;;  %v2574_v13 = vmul.f32 1.442695, %v2573_v17 }
 0x302   : >> { %3340 = vpow2.f32 %v2561_v20 }
 0x303   : >> { %3342 = vpow2.f32 %v2567_v22 }
 0x304   : >> { %3344 = vpow2.f32 %v2574_v13 }
 0x305   : >> { %3346 = vtanh.f32 %v2043_v3 }
 0x30c   : >> { %v3341_v0 = vpop.eup %3340 }
 0x30d   : >> { %v3343_v15 = vpop.eup %3342  ;;  %v2563_v4 = vadd.f32 1.0, %v3341_v0 }
 0x30e   : >> { %v2569_v19 = vadd.f32 1.0, %v3343_v15  ;;  %v3345_v11 = vpop.eup %3344 }
 0x30f   : >> { %3348 = vrcp.f32 %v2563_v4  ;;  %v3347_v16 = vpop.eup %3346  ;;  %v2576_v14 = vadd.f32 1.0, %v3345_v11 }
 0x310   : >> { %3350 = vrcp.f32 %v2569_v19 }
 0x311   : >> { %3352 = vrcp.f32 %v2576_v14 }
 0x318   : >> { %v2281_v8 = vpop.f32.mrb[16].mxu1 }
 0x319   : >> { %v3349_v7 = vpop.eup %3348  ;;  %v2240_v1 = vpop.f32.mrb[16].mxu0 }
 0x31a   : >> { %v3351_v10 = vpop.eup %3350  ;;  %v2580_v25 = vmul.f32 %v3349_v7, %v3347_v16  ;;  %v2242_v9 = vpop.f32.mrb[17].mxu0 }
 0x31b   : >> { %v2283_v20 = vpop.f32.mrb[17].mxu1  ;;  %v2579_v12 = vmul.f32 %v3351_v10, %v2559_v6  ;;  %v2244_v22 = vpop.f32.mrb[18].mxu0 }
 0x31c   : >> { %v2285_v2 = vpop.f32.mrb[18].mxu1  ;;  %v2245_v5 = vpop.f32.mrb[19].mxu0 }
 0x31d   : >> { %v2286_v17 = vpop.f32.mrb[19].mxu1  ;;  %v2581_v13 = vadd.f32 %v2580_v25, %v2579_v12  ;;  %v3353_v18 = vpop.eup %3352  ;;  %v6154_v25 = vrot.slane %v4593_v32, %v4554_v28  ;;  %v6155_v5 = vrot.slane %v4593_v32, %v4562_v24 }
 0x31f   : >> { %3354 = vtanh.f32 %v2581_v13  ;;  %2735 = vst [vmem:[#allocation6] sm:$0xff] %v2581_v13 }
 0x329   : >> { %v3355_v3 = vpop.eup %3354 }
 0x32a   : >> { %v2583_v0 = vmul.f32 %v3355_v3, %v3353_v18 }
 0x32c   : >> { %2732 = vst [vmem:[#allocation3] sm:$0xff] %v2583_v0 }
 0x338   : >> { %v2523_v4 = vpop.f32.mrb[20].mxu1 }
 0x339   : >> { %v2482_v15 = vpop.f32.mrb[20].mxu0  ;;  %v2524_v16 = vadd.f32 %v2523_v4, %v2281_v8  ;;  %v2525_v7 = vpop.f32.mrb[21].mxu1 }
 0x33a   : >> { %v2483_v19 = vadd.f32 %v2482_v15, %v2240_v1  ;;  %v2484_v11 = vpop.f32.mrb[21].mxu0  ;;  %v2526_v6 = vadd.f32 %v2525_v7, %v2283_v20  ;;  %v2527_v22 = vpop.f32.mrb[22].mxu1  ;;  %v6157_v15 = vrot.slane %v4593_v32, %v4564_v21 }
 0x33b   : >> { %v2485_v23 = vadd.f32 %v2484_v11, %v2242_v9  ;;  %v2486_v10 = vpop.f32.mrb[22].mxu0  ;;  %v2528_v2 = vpop.f32.mrb[23].mxu1  ;;  %v6156_v9 = vrot.slane %v4593_v32, %v4566_v30 }
 0x33c   : >> { %v2530_v14 = vadd.f32 %v2483_v19, %v6154_v25  ;;  %v2487_v12 = vpop.f32.mrb[23].mxu0  ;;  %v2532_v4 = vadd.f32 %v2524_v16, %v6157_v15  ;;  %v2584_v25 = vld [vmem:[#allocation7] sm:$0xff] }
 0x33d   : >> { %v2531_v17 = vadd.f32 %v2485_v23, %v6155_v5  ;;  %v2533_v20 = vadd.f32 %v2526_v6, %v6156_v9  ;;  %v6158_v9 = vrot.slane %v4606_v29, %v4554_v28 }
 0x33e   : >> { %v2585_v13 = vsub.f32 0.0, %v2530_v14 }
 0x33f   : >> { %v2591_v18 = vsub.f32 0.0, %v2531_v17  ;;  %v2598_v3 = vsub.f32 0.0, %v2533_v20 }
 0x340   : >> { %v2586_v1 = vmul.f32 1.442695, %v2585_v13 }
 0x341   : >> { %v2592_v8 = vmul.f32 1.442695, %v2591_v18  ;;  %v2599_v0 = vmul.f32 1.442695, %v2598_v3 }
 0x342   : >> { %3356 = vpow2.f32 %v2586_v1 }
 0x343   : >> { %3358 = vpow2.f32 %v2592_v8 }
 0x344   : >> { %3360 = vpow2.f32 %v2599_v0  ;;  %v6159_v0 = vrot.slane %v4606_v29, %v4562_v24 }
 0x345   : >> { %3362 = vtanh.f32 %v2532_v4 }
 0x34c   : >> { %v3357_v19 = vpop.eup %3356 }
 0x34d   : >> { %v3359_v11 = vpop.eup %3358  ;;  %v2588_v7 = vadd.f32 1.0, %v3357_v19 }
 0x34e   : >> { %v2594_v23 = vadd.f32 1.0, %v3359_v11  ;;  %v3361_v10 = vpop.eup %3360 }
 0x34f   : >> { %3364 = vrcp.f32 %v2588_v7  ;;  %v3363_v22 = vpop.eup %3362  ;;  %v2601_v2 = vadd.f32 1.0, %v3361_v10 }
 0x350   : >> { %3366 = vrcp.f32 %v2594_v23 }
 0x351   : >> { %3368 = vrcp.f32 %v2601_v2 }
 0x359   : >> { %v3365_v6 = vpop.eup %3364 }
 0x35a   : >> { %v3367_v14 = vpop.eup %3366  ;;  %v2605_v12 = vmul.f32 %v3365_v6, %v3363_v22 }
 0x35b   : >> { %v2604_v5 = vmul.f32 %v3367_v14, %v2584_v25  ;;  %v3369_v16 = vpop.eup %3368 }
 0x35d   : >> { %v2606_v17 = vadd.f32 %v2605_v12, %v2604_v5 }
 0x35f   : >> { %2736 = vst [vmem:[#allocation7] sm:$0xff] %v2606_v17  ;;  %3370 = vtanh.f32 %v2606_v17 }
 0x369   : >> { %v3371_v13 = vpop.eup %3370 }
 0x36a   : >> { %v2608_v18 = vmul.f32 %v3371_v13, %v3369_v16 }
 0x36c   : >> { %v2609_v1 = vpack.c.bf16 %v2608_v18, %v2608_v18  ;;  %2733 = vst [vmem:[#allocation4] sm:$0xff] %v2608_v18 }
 0x36e   : >> { %2723 = vmatmul.mubr.bf16.vlgmr.msra.gmra.mrb[24].mxu0 %v2609_v1 }
 0x43f   : > { %873 = sbr.rel (!%p871_p2) target bundleno = 379 (0x17b), region = 154 }
 0x441   : >> { %v2724_v8 = vpop.f32.mrb[24].mxu0 }
 0x442   : >> { %v2725_v20 = vadd.f32 %v2724_v8, %v6158_v9  ;;  %v2726_v3 = vpop.f32.mrb[25].mxu0 }
 0x443   : >> { %v2727_v15 = vadd.f32 %v2726_v3, %v6159_v0  ;;  %v2728_v4 = vpop.f32.mrb[26].mxu0 }
 0x444   : >> { %2737 = vst [vmem:[#allocation8] sm:$0xff] %v2725_v20  ;;  %2741 = vst [vmem:[%s2740_s19] sm:$0xff] %v2725_v20  ;;  %v2729_v19 = vpop.f32.mrb[27].mxu0 }
 0x445   : >> { %2738 = vst [vmem:[#allocation8 + $0x8] sm:$0xff] %v2727_v15  ;;  %2742 = vst [vmem:[%s2740_s19 + $0x8] sm:$0xff] %v2727_v15 }
 0x446   : > { %3611 = shalt.err (!%p3608_p8)
}
 0x447   : > { %s3612_s28 = scalar_lea.hbm %s5213_s2, 2560  ;;  %s3616_s19 = scalar_lea.hbm %s6160_s1, 5120 }
 0x448   : > { %p3613_p3 = scmp.ne.s32.totalorder %s5213_s2, %s3612_s28  ;;  %p3617_p13 = scmp.lt.u32.totalorder %s5213_s2, %s6160_s1 }
 0x449   : > { %p3618_p0 = scmp.lt.u32.totalorder %s3616_s19, %s3612_s28  ;;  %p3620_p9 = scmp.lt.u32.totalorder %s3612_s28, %s5213_s2 }
 0x44a   : > { %p3614_p12 = pnand %p3613_p3, %p6161_p7 }
 0x44b   : > { %p3619_p2 = por %p3618_p0, %p3617_p13 }
 0x44c   : > { %p3615_p1 = pneg %p3614_p12 }
 0x44d   : > { %p3621_p5 = por %p3620_p9, %p3619_p2 }
 0x44f   : > { %p3622_p11 = pnand %p3621_p5, %p3615_p1 }
 0x451   : > { %3625 = shalt.err (!%p3622_p11)
}
 0x452   : > { %s3705_s26 = smov 256   ;;  %s3706_s18 = smov 16  }
 0x453   : > { %3218 = dma.vmem_to_hbm [thread:$0]  (%p6161_p7), %s5215_s20, 2560, %s5213_s2, %s2744_s17, %s3705_s26, %s3705_s26, %s3706_s18  }
 0x454 PF: > { %s2773_s16 = sand.u32 1, %s3672_s21   ;;  %p6162_p4 = scmp.ne.s32.totalorder %s5694_s30, 0 }
 0x455   : > { %p6163_p6 = scmp.ge.s32.totalorder %s3684_s24, 2  ;;  %s2774_s13 = scalar_lea.sflag [#allocation11], %s2773_s16 }
 0x457   : > { %p3247_p10 = pnand %p6163_p6, %p6162_p4 }
 0x459   : > { %3667 = dma.done.wait (!%p3247_p10), %s2774_s13, 2560  }
 0x45a   : > { %3669 = vsyncadd (!%p3247_p10), %s2774_s13, 4294964736  ;;  %p29_p8 = scmp.ge.s32.totalorder %s3985_s9, 4   ;;  %s6164_s21 = smov %s3676_s22 }
 0x45b   : > { %s6165_s22 = smov %s3680_s23  ;;  %s6166_s23 = smov %s3997_s14 }
 0x45c   : > { %s6167_s24 = smov %s3985_s9  ;;  %31 = sbr.rel (!%p29_p8) target bundleno = 16 (0x10), region = 165 }
 0x463   :  { %2779 = vsyncpa [#allocation10], 1 }
 0x464   :  { %2781 = vsyncpa [#allocation10 + $0x1], 1 }
 0x465   :  { %2782 = vsyncpa [#allocation13], 1 }
 0x466   :  { %2783 = vsyncpa [#allocation16], 1 }
 0x467   :  { %2784 = vsyncpa [#allocation19], 1 }
 0x468   :  { %2785 = vsyncpa [#allocation22], 1 }
 0x469   :  { %2786 = vsyncpa [#allocation11], 1 }
 0x46a   :  { %2788 = vsyncpa [#allocation11 + $0x1], 1 }

</bundles_post_ra>
